<compile_context>
chip_gen: v6e
topology: v6e:2x2x1
jax: 0.10.0
libtpu: 0.0.40
codegen_flags: <defaults>
</compile_context>

<pallas_src>
import functools

import jax
import jax.numpy as jnp
from jax import lax
from jax.experimental import pallas as pl
from jax.experimental.pallas import tpu as pltpu

LEAKY_SLOPE = 0.2
BN_EPS = 1e-5


# ----------------------------- Pallas kernels ------------------------------

def _conv_bias_act_kernel(act, p_ref, w_ref, b_ref, o_ref):
    # p_ref: (tm, K) im2col patches, w_ref: (K, Cpad), b_ref: (1, Cpad),
    # o_ref: (tm, Cpad).  One MXU matmul + VPU/EUP epilogue.
    z = jnp.dot(p_ref[...], w_ref[...], preferred_element_type=jnp.float32)
    z = z + b_ref[...]
    if act == "leaky":
        o_ref[...] = jnp.where(z > 0, z, LEAKY_SLOPE * z)
    else:  # sigmoid head
        o_ref[...] = 1.0 / (1.0 + jnp.exp(-z))


def _conv_stats_kernel(p_ref, w_ref, o_ref, s_ref):
    # conv (no bias: cancelled by the following BatchNorm) + per-tile
    # per-channel [sum, sum_sq] written to a grid-indexed (1, 2, Cpad) slab.
    # No cross-iteration carry -> the grid axis stays fully "parallel".
    z = jnp.dot(p_ref[...], w_ref[...], preferred_element_type=jnp.float32)
    o_ref[...] = z
    s = jnp.sum(z, axis=0, keepdims=True)          # XLU sublane reduce
    ss = jnp.sum(z * z, axis=0, keepdims=True)
    s_ref[...] = jnp.concatenate([s, ss], axis=0)[None]


# ----------------------------- wrappers (glue) ------------------------------

def _round_up(x, m):
    return (x + m - 1) // m * m


def _im2col(x, k, stride, pad):
    """x: (N, H, W, C) -> (patches (N*Ho*Wo, k*k*C), Ho, Wo).

    Pure data-movement glue; XLA fuses the preceding per-channel scale/shift +
    LeakyReLU (when present) into this gather, so the BN activation never makes
    a dedicated HBM round trip.
    """
    # TODO(synk): stride-2 patch extraction stays as XLA glue; doing it in-kernel
    # would need strided VMEM gathers that Mosaic materializes as relayout copies.
    N, H, W, C = x.shape
    Ho = (H + 2 * pad - k) // stride + 1
    Wo = (W + 2 * pad - k) // stride + 1
    xp = jnp.pad(x, ((0, 0), (pad, pad), (pad, pad), (0, 0)))
    cols = []
    for ky in range(k):
        for kx in range(k):
            cols.append(lax.slice(
                xp,
                (0, ky, kx, 0),
                (N, ky + stride * (Ho - 1) + 1, kx + stride * (Wo - 1) + 1, C),
                (1, stride, stride, 1)))
    patches = jnp.stack(cols, axis=3)           # (N, Ho, Wo, k*k, C)
    return patches.reshape(N * Ho * Wo, k * k * C), Ho, Wo


def _pick_tm(M, target=512):
    """Largest tile <= target that divides M and keeps the (8,128) layout rule
    (multiple of 8, or the whole M when M is smaller / has no such divisor)."""
    if M <= target:
        return M
    for tm in range(target, 0, -1):
        if M % tm == 0 and tm % 8 == 0:
            return tm
    return M  # single tile: block == full array dim, always legal


def conv_bias_act_pallas(patches, w_mat, b, act):
    """act(conv + bias) as a single matmul+epilogue kernel. Returns (M, Cout)."""
    M, K = patches.shape
    Cout = w_mat.shape[1]
    Cpad = _round_up(Cout, 128)                 # lane-dense output slab
    wp = jnp.pad(w_mat, ((0, 0), (0, Cpad - Cout)))
    bp = jnp.pad(b, (0, Cpad - Cout)).reshape(1, Cpad)
    tm = _pick_tm(M)
    out = pl.pallas_call(
        functools.partial(_conv_bias_act_kernel, act),
        out_shape=jax.ShapeDtypeStruct((M, Cpad), jnp.float32),
        grid=(M // tm,),
        in_specs=[pl.BlockSpec((tm, K), lambda i: (i, 0)),
                  pl.BlockSpec((K, Cpad), lambda i: (0, 0)),   # resident weights
                  pl.BlockSpec((1, Cpad), lambda i: (0, 0))],
        out_specs=pl.BlockSpec((tm, Cpad), lambda i: (i, 0)),
        compiler_params=pltpu.CompilerParams(dimension_semantics=("parallel",)),
    )(patches, wp, bp)
    return out[:, :Cout]


def conv_stats_pallas(patches, w_mat):
    """conv (bias folded into BN) + per-channel [sum, sum_sq] in the same launch."""
    M, K = patches.shape
    Cout = w_mat.shape[1]
    Cpad = _round_up(Cout, 128)
    wp = jnp.pad(w_mat, ((0, 0), (0, Cpad - Cout)))
    tm = _pick_tm(M)
    nt = M // tm
    z, pstats = pl.pallas_call(
        _conv_stats_kernel,
        out_shape=(jax.ShapeDtypeStruct((M, Cpad), jnp.float32),
                   jax.ShapeDtypeStruct((nt, 2, Cpad), jnp.float32)),
        grid=(nt,),
        in_specs=[pl.BlockSpec((tm, K), lambda i: (i, 0)),
                  pl.BlockSpec((K, Cpad), lambda i: (0, 0))],
        out_specs=(pl.BlockSpec((tm, Cpad), lambda i: (i, 0)),
                   pl.BlockSpec((1, 2, Cpad), lambda i: (i, 0, 0))),
        compiler_params=pltpu.CompilerParams(dimension_semantics=("parallel",)),
    )(patches, wp)
    stats = jnp.sum(pstats, axis=0)             # tiny (nt,2,Cpad) XLA reduce
    return z[:, :Cout], stats[:, :Cout]


def discriminator_forward(x_nchw, conv_params, bn_params, eps=BN_EPS):
    """Forward of `discriminator` (training-mode BatchNorm statistics).

    conv_params: 5 tuples (w_hwio, b); bn_params: 3 tuples (gamma, beta) for conv2..conv4.
    Returns (out, feat4): out is (N,1,1,1) NCHW, feat4 the post-layer-4 activation (test aid).
    """
    x = jnp.transpose(x_nchw, (0, 2, 3, 1)).astype(jnp.float32)   # -> NHWC
    N = x.shape[0]

    # layer 1: conv + bias + LeakyReLU fully fused
    w, b = conv_params[0]
    Cout = w.shape[-1]
    p, Ho, Wo = _im2col(x, 4, 2, 1)
    y = conv_bias_act_pallas(p, w.reshape(-1, Cout), b, "leaky")
    x = y.reshape(N, Ho, Wo, Cout)

    feat4 = None
    # layers 2..4: conv + batch stats in one launch; scale/shift + LeakyReLU is
    # applied as the (XLA-fused) prologue of the next layer's im2col read.
    for li in range(1, 4):
        w, _b = conv_params[li]                   # bias cancelled by BN mean subtraction
        gamma, beta = bn_params[li - 1]
        Cout = w.shape[-1]
        p, Ho, Wo = _im2col(x, 4, 2, 1)
        M = p.shape[0]
        z, stats = conv_stats_pallas(p, w.reshape(-1, Cout))
        mean = stats[0] / M
        var = stats[1] / M - mean * mean          # biased variance (training-mode BN)
        scale = gamma * lax.rsqrt(var + eps)
        shift = beta - mean * scale
        a = z.reshape(N, Ho, Wo, Cout) * scale + shift
        x = jnp.where(a > 0, a, LEAKY_SLOPE * a)
        if li == 3:
            feat4 = jnp.transpose(x, (0, 3, 1, 2))

    # layer 5: conv(k4, s1, p0) + bias + sigmoid fully fused
    w, b = conv_params[4]
    Cout = w.shape[-1]
    p, Ho, Wo = _im2col(x, 4, 1, 0)
    y = conv_bias_act_pallas(p, w.reshape(-1, Cout), b, "sigmoid")
    out = jnp.transpose(y.reshape(N, Ho, Wo, Cout), (0, 3, 1, 2))  # -> NCHW
    return out, feat4


# ----------------------------- pure-JAX reference ---------------------------

def ref_forward(x_nchw, conv_params, bn_params, eps=BN_EPS):
    def conv(x, w, b, stride, pad):
        y = lax.conv_general_dilated(
            x, w, (stride, stride), ((pad, pad), (pad, pad)),
            dimension_numbers=('NCHW', 'HWIO', 'NCHW'))
        return y + b[None, :, None, None]

    def bn(x, g, bt):
        m = jnp.mean(x, axis=(0, 2, 3), keepdims=True)
        v = jnp.mean((x - m) ** 2, axis=(0, 2, 3), keepdims=True)
        return (x - m) * lax.rsqrt(v + eps) * g[None, :, None, None] + bt[None, :, None, None]

    def lrelu(x):
        return jnp.where(x > 0, x, LEAKY_SLOPE * x)

    x = x_nchw.astype(jnp.float32)
    w, b = conv_params[0]
    x = lrelu(conv(x, w, b, 2, 1))
    for li in range(1, 4):
        w, b = conv_params[li]
        g, bt = bn_params[li - 1]
        x = lrelu(bn(conv(x, w, b, 2, 1), g, bt))
    feat4 = x
    w, b = conv_params[4]
    out = 1.0 / (1.0 + jnp.exp(-conv(x, w, b, 1, 0)))
    return out, feat4


# ---------------------------------- main ------------------------------------

if __name__ == "__main__":
    # Small-scale config consistent with the module: d=16 (module default 128),
    # 64x64x3 input so the conv stack ends at 1x1 (64 -> 32 -> 16 -> 8 -> 4 -> 1).
    d = 16
    N = 2
    H = W = 64

    key = jax.random.PRNGKey(0)
    keys = jax.random.split(key, 12)

    chans = [3, d, d * 2, d * 4, d * 8, 1]
    conv_params = []
    for i in range(5):
        w = 0.02 * jax.random.normal(keys[i], (4, 4, chans[i], chans[i + 1]), jnp.float32)
        b = 0.1 * jax.random.normal(keys[5 + i], (chans[i + 1],), jnp.float32)
        conv_params.append((w, b))
    bn_params = []
    for i in range(3):
        c = chans[2 + i]
        g = 1.0 + 0.1 * jax.random.normal(jax.random.fold_in(keys[10], i), (c,), jnp.float32)
        bt = 0.1 * jax.random.normal(jax.random.fold_in(keys[11], i), (c,), jnp.float32)
        bn_params.append((g, bt))

    x = jax.random.normal(jax.random.fold_in(key, 123), (N, 3, H, W), jnp.float32)

    fwd = jax.jit(discriminator_forward)
    out, feat4 = fwd(x, conv_params, bn_params)
    out = jax.block_until_ready(out)

    assert out.shape == (N, 1, 1, 1), out.shape

    ref_out, ref_feat4 = ref_forward(x, conv_params, bn_params)
    err_out = float(jnp.max(jnp.abs(out - ref_out)))
    err_feat = float(jnp.max(jnp.abs(feat4 - ref_feat4)))
    if err_out < 1e-3 and err_feat < 1e-3:
        print("KERNEL_OK")
    else:
        print("MISMATCH out_err=", err_out, "feat_err=", err_feat)
</pallas_src>

<mosaic_0001>
module attributes {stable_mosaic.version = 11 : i64} {
  func.func @_conv_bias_act_kernel(%arg0: i32, %arg1: memref<512x48xf32, #tpu.memory_space<vmem>>, %arg2: memref<48x128xf32, #tpu.memory_space<vmem>>, %arg3: memref<1x128xf32, #tpu.memory_space<vmem>>, %arg4: memref<512x128xf32, #tpu.memory_space<vmem>>) attributes {dimension_semantics = [#tpu.dimension_semantics<parallel>], iteration_bounds = array<i64: 4>, scalar_prefetch = 0 : i64, scratch_operands = 0 : i64, tpu.core_type = #tpu.core_type<tc>, window_params = [{transform_indices = @transform_0, window_bounds = array<i64: 512, 48>}, {pipeline_mode = #tpu.pipeline_mode<synchronous>, transform_indices = @transform_1, window_bounds = array<i64: 48, 128>}, {pipeline_mode = #tpu.pipeline_mode<synchronous>, transform_indices = @transform_2, window_bounds = array<i64: 1, 128>}, {transform_indices = @transform_3, window_bounds = array<i64: 512, 128>}]} {
    %c0 = arith.constant 0 : index
    %c0_0 = arith.constant 0 : index
    %0 = vector.load %arg1[%c0, %c0_0] : memref<512x48xf32, #tpu.memory_space<vmem>>, vector<512x48xf32>
    %c0_1 = arith.constant 0 : index
    %c0_2 = arith.constant 0 : index
    %1 = vector.load %arg2[%c0_1, %c0_2] : memref<48x128xf32, #tpu.memory_space<vmem>>, vector<48x128xf32>
    %cst = arith.constant dense<0.000000e+00> : vector<512x128xf32>
    %2 = tpu.matmul %0, %1, %cst {dimension_numbers = #tpu.dot_dimension_numbers<[1], [0], [0], [1], [0, 0, 1, 1], [], []>} : vector<512x48xf32>, vector<48x128xf32>, vector<512x128xf32> -> vector<512x128xf32>
    %c0_3 = arith.constant 0 : index
    %c0_4 = arith.constant 0 : index
    %3 = vector.load %arg3[%c0_3, %c0_4] : memref<1x128xf32, #tpu.memory_space<vmem>>, vector<1x128xf32>
    %4 = vector.broadcast %3 : vector<1x128xf32> to vector<512x128xf32>
    %5 = arith.addf %2, %4 : vector<512x128xf32>
    %cst_5 = arith.constant 0.000000e+00 : f32
    %6 = vector.broadcast %cst_5 : f32 to vector<512x128xf32>
    %7 = arith.cmpf ogt, %5, %6 : vector<512x128xf32>
    %cst_6 = arith.constant 2.000000e-01 : f32
    %8 = vector.broadcast %cst_6 : f32 to vector<512x128xf32>
    %9 = arith.mulf %8, %5 : vector<512x128xf32>
    %10 = arith.select %7, %5, %9 : vector<512x128xi1>, vector<512x128xf32>
    %c0_7 = arith.constant 0 : index
    %c0_8 = arith.constant 0 : index
    %11 = vector.load %arg4[%c0_7, %c0_8] : memref<512x128xf32, #tpu.memory_space<vmem>>, vector<512x128xf32>
    tpu.vector_store %arg4[%c0_7, %c0_8], %10 {strides = array<i32>} : memref<512x128xf32, #tpu.memory_space<vmem>>, vector<512x128xf32>,
    return
  }
  func.func @transform_0(%arg0: i32) -> (i32, i32) {
    %c0_i32 = arith.constant 0 : i32
    %c0_i32_0 = arith.constant 0 : i32
    return %arg0, %c0_i32 : i32, i32
  }
  func.func @transform_1(%arg0: i32) -> (i32, i32) {
    %c0_i32 = arith.constant 0 : i32
    %c0_i32_0 = arith.constant 0 : i32
    %c0_i32_1 = arith.constant 0 : i32
    return %c0_i32, %c0_i32_0 : i32, i32
  }
  func.func @transform_2(%arg0: i32) -> (i32, i32) {
    %c0_i32 = arith.constant 0 : i32
    %c0_i32_0 = arith.constant 0 : i32
    %c0_i32_1 = arith.constant 0 : i32
    return %c0_i32, %c0_i32_0 : i32, i32
  }
  func.func @transform_3(%arg0: i32) -> (i32, i32) {
    %c0_i32 = arith.constant 0 : i32
    %c0_i32_0 = arith.constant 0 : i32
    return %arg0, %c0_i32 : i32, i32
  }
}

module attributes {stable_mosaic.version = 11 : i64} {
  func.func @_conv_stats_kernel(%arg0: i32, %arg1: memref<512x256xf32, #tpu.memory_space<vmem>>, %arg2: memref<256x128xf32, #tpu.memory_space<vmem>>, %arg3: memref<512x128xf32, #tpu.memory_space<vmem>>, %arg4: memref<1x2x128xf32, #tpu.memory_space<vmem>>) attributes {dimension_semantics = [#tpu.dimension_semantics<parallel>], iteration_bounds = array<i64: 1>, scalar_prefetch = 0 : i64, scratch_operands = 0 : i64, tpu.core_type = #tpu.core_type<tc>, window_params = [{transform_indices = @transform_0, window_bounds = array<i64: 512, 256>}, {pipeline_mode = #tpu.pipeline_mode<synchronous>, transform_indices = @transform_1, window_bounds = array<i64: 256, 128>}, {transform_indices = @transform_2, window_bounds = array<i64: 512, 128>}, {transform_indices = @transform_3, window_bounds = array<i64: 1, 2, 128>}]} {
    %c0 = arith.constant 0 : index
    %c0_0 = arith.constant 0 : index
    %0 = vector.load %arg1[%c0, %c0_0] : memref<512x256xf32, #tpu.memory_space<vmem>>, vector<512x256xf32>
    %c0_1 = arith.constant 0 : index
    %c0_2 = arith.constant 0 : index
    %1 = vector.load %arg2[%c0_1, %c0_2] : memref<256x128xf32, #tpu.memory_space<vmem>>, vector<256x128xf32>
    %cst = arith.constant dense<0.000000e+00> : vector<512x128xf32>
    %2 = tpu.matmul %0, %1, %cst {dimension_numbers = #tpu.dot_dimension_numbers<[1], [0], [0], [1], [0, 0, 1, 1], [], []>} : vector<512x256xf32>, vector<256x128xf32>, vector<512x128xf32> -> vector<512x128xf32>
    %c0_3 = arith.constant 0 : index
    %c0_4 = arith.constant 0 : index
    %3 = vector.load %arg3[%c0_3, %c0_4] : memref<512x128xf32, #tpu.memory_space<vmem>>, vector<512x128xf32>
    tpu.vector_store %arg3[%c0_3, %c0_4], %2 {strides = array<i32>} : memref<512x128xf32, #tpu.memory_space<vmem>>, vector<512x128xf32>,
    %cst_5 = arith.constant dense<0.000000e+00> : vector<128xf32>
    %4 = vector.multi_reduction <add>, %2, %cst_5 [0] : vector<512x128xf32> to vector<128xf32>
    %5 = vector.shape_cast %4 : vector<128xf32> to vector<1x128xf32>
    %6 = arith.mulf %2, %2 : vector<512x128xf32>
    %cst_6 = arith.constant dense<0.000000e+00> : vector<128xf32>
    %7 = vector.multi_reduction <add>, %6, %cst_6 [0] : vector<512x128xf32> to vector<128xf32>
    %8 = vector.shape_cast %7 : vector<128xf32> to vector<1x128xf32>
    %9 = tpu.concatenate %5, %8 in 0 : vector<1x128xf32>, vector<1x128xf32> -> vector<2x128xf32>
    %10 = vector.shape_cast %9 : vector<2x128xf32> to vector<1x2x128xf32>
    %c0_7 = arith.constant 0 : index
    %c0_8 = arith.constant 0 : index
    %c0_9 = arith.constant 0 : index
    %11 = vector.load %arg4[%c0_7, %c0_8, %c0_9] : memref<1x2x128xf32, #tpu.memory_space<vmem>>, vector<1x2x128xf32>
    tpu.vector_store %arg4[%c0_7, %c0_8, %c0_9], %10 {strides = array<i32>} : memref<1x2x128xf32, #tpu.memory_space<vmem>>, vector<1x2x128xf32>,
    return
  }
  func.func @transform_0(%arg0: i32) -> (i32, i32) {
    %c0_i32 = arith.constant 0 : i32
    %c0_i32_0 = arith.constant 0 : i32
    return %arg0, %c0_i32 : i32, i32
  }
  func.func @transform_1(%arg0: i32) -> (i32, i32) {
    %c0_i32 = arith.constant 0 : i32
    %c0_i32_0 = arith.constant 0 : i32
    %c0_i32_1 = arith.constant 0 : i32
    return %c0_i32, %c0_i32_0 : i32, i32
  }
  func.func @transform_2(%arg0: i32) -> (i32, i32) {
    %c0_i32 = arith.constant 0 : i32
    %c0_i32_0 = arith.constant 0 : i32
    return %arg0, %c0_i32 : i32, i32
  }
  func.func @transform_3(%arg0: i32) -> (i32, i32, i32) {
    %c0_i32 = arith.constant 0 : i32
    %c0_i32_0 = arith.constant 0 : i32
    %c0_i32_1 = arith.constant 0 : i32
    return %arg0, %c0_i32, %c0_i32_0 : i32, i32, i32
  }
}

module attributes {stable_mosaic.version = 11 : i64} {
  func.func @_conv_stats_kernel(%arg0: i32, %arg1: memref<128x512xf32, #tpu.memory_space<vmem>>, %arg2: memref<512x128xf32, #tpu.memory_space<vmem>>, %arg3: memref<128x128xf32, #tpu.memory_space<vmem>>, %arg4: memref<1x2x128xf32, #tpu.memory_space<vmem>>) attributes {dimension_semantics = [#tpu.dimension_semantics<parallel>], iteration_bounds = array<i64: 1>, scalar_prefetch = 0 : i64, scratch_operands = 0 : i64, tpu.core_type = #tpu.core_type<tc>, window_params = [{transform_indices = @transform_0, window_bounds = array<i64: 128, 512>}, {pipeline_mode = #tpu.pipeline_mode<synchronous>, transform_indices = @transform_1, window_bounds = array<i64: 512, 128>}, {transform_indices = @transform_2, window_bounds = array<i64: 128, 128>}, {transform_indices = @transform_3, window_bounds = array<i64: 1, 2, 128>}]} {
    %c0 = arith.constant 0 : index
    %c0_0 = arith.constant 0 : index
    %0 = vector.load %arg1[%c0, %c0_0] : memref<128x512xf32, #tpu.memory_space<vmem>>, vector<128x512xf32>
    %c0_1 = arith.constant 0 : index
    %c0_2 = arith.constant 0 : index
    %1 = vector.load %arg2[%c0_1, %c0_2] : memref<512x128xf32, #tpu.memory_space<vmem>>, vector<512x128xf32>
    %cst = arith.constant dense<0.000000e+00> : vector<128x128xf32>
    %2 = tpu.matmul %0, %1, %cst {dimension_numbers = #tpu.dot_dimension_numbers<[1], [0], [0], [1], [0, 0, 1, 1], [], []>} : vector<128x512xf32>, vector<512x128xf32>, vector<128x128xf32> -> vector<128x128xf32>
    %c0_3 = arith.constant 0 : index
    %c0_4 = arith.constant 0 : index
    %3 = vector.load %arg3[%c0_3, %c0_4] : memref<128x128xf32, #tpu.memory_space<vmem>>, vector<128x128xf32>
    tpu.vector_store %arg3[%c0_3, %c0_4], %2 {strides = array<i32>} : memref<128x128xf32, #tpu.memory_space<vmem>>, vector<128x128xf32>,
    %cst_5 = arith.constant dense<0.000000e+00> : vector<128xf32>
    %4 = vector.multi_reduction <add>, %2, %cst_5 [0] : vector<128x128xf32> to vector<128xf32>
    %5 = vector.shape_cast %4 : vector<128xf32> to vector<1x128xf32>
    %6 = arith.mulf %2, %2 : vector<128x128xf32>
    %cst_6 = arith.constant dense<0.000000e+00> : vector<128xf32>
    %7 = vector.multi_reduction <add>, %6, %cst_6 [0] : vector<128x128xf32> to vector<128xf32>
    %8 = vector.shape_cast %7 : vector<128xf32> to vector<1x128xf32>
    %9 = tpu.concatenate %5, %8 in 0 : vector<1x128xf32>, vector<1x128xf32> -> vector<2x128xf32>
    %10 = vector.shape_cast %9 : vector<2x128xf32> to vector<1x2x128xf32>
    %c0_7 = arith.constant 0 : index
    %c0_8 = arith.constant 0 : index
    %c0_9 = arith.constant 0 : index
    %11 = vector.load %arg4[%c0_7, %c0_8, %c0_9] : memref<1x2x128xf32, #tpu.memory_space<vmem>>, vector<1x2x128xf32>
    tpu.vector_store %arg4[%c0_7, %c0_8, %c0_9], %10 {strides = array<i32>} : memref<1x2x128xf32, #tpu.memory_space<vmem>>, vector<1x2x128xf32>,
    return
  }
  func.func @transform_0(%arg0: i32) -> (i32, i32) {
    %c0_i32 = arith.constant 0 : i32
    %c0_i32_0 = arith.constant 0 : i32
    return %arg0, %c0_i32 : i32, i32
  }
  func.func @transform_1(%arg0: i32) -> (i32, i32) {
    %c0_i32 = arith.constant 0 : i32
    %c0_i32_0 = arith.constant 0 : i32
    %c0_i32_1 = arith.constant 0 : i32
    return %c0_i32, %c0_i32_0 : i32, i32
  }
  func.func @transform_2(%arg0: i32) -> (i32, i32) {
    %c0_i32 = arith.constant 0 : i32
    %c0_i32_0 = arith.constant 0 : i32
    return %arg0, %c0_i32 : i32, i32
  }
  func.func @transform_3(%arg0: i32) -> (i32, i32, i32) {
    %c0_i32 = arith.constant 0 : i32
    %c0_i32_0 = arith.constant 0 : i32
    %c0_i32_1 = arith.constant 0 : i32
    return %arg0, %c0_i32, %c0_i32_0 : i32, i32, i32
  }
}

module attributes {stable_mosaic.version = 11 : i64} {
  func.func @_conv_stats_kernel(%arg0: i32, %arg1: memref<32x1024xf32, #tpu.memory_space<vmem>>, %arg2: memref<1024x128xf32, #tpu.memory_space<vmem>>, %arg3: memref<32x128xf32, #tpu.memory_space<vmem>>, %arg4: memref<1x2x128xf32, #tpu.memory_space<vmem>>) attributes {dimension_semantics = [#tpu.dimension_semantics<parallel>], iteration_bounds = array<i64: 1>, scalar_prefetch = 0 : i64, scratch_operands = 0 : i64, tpu.core_type = #tpu.core_type<tc>, window_params = [{transform_indices = @transform_0, window_bounds = array<i64: 32, 1024>}, {pipeline_mode = #tpu.pipeline_mode<synchronous>, transform_indices = @transform_1, window_bounds = array<i64: 1024, 128>}, {transform_indices = @transform_2, window_bounds = array<i64: 32, 128>}, {transform_indices = @transform_3, window_bounds = array<i64: 1, 2, 128>}]} {
    %c0 = arith.constant 0 : index
    %c0_0 = arith.constant 0 : index
    %0 = vector.load %arg1[%c0, %c0_0] : memref<32x1024xf32, #tpu.memory_space<vmem>>, vector<32x1024xf32>
    %c0_1 = arith.constant 0 : index
    %c0_2 = arith.constant 0 : index
    %1 = vector.load %arg2[%c0_1, %c0_2] : memref<1024x128xf32, #tpu.memory_space<vmem>>, vector<1024x128xf32>
    %cst = arith.constant dense<0.000000e+00> : vector<32x128xf32>
    %2 = tpu.matmul %0, %1, %cst {dimension_numbers = #tpu.dot_dimension_numbers<[1], [0], [0], [1], [0, 0, 1, 1], [], []>} : vector<32x1024xf32>, vector<1024x128xf32>, vector<32x128xf32> -> vector<32x128xf32>
    %c0_3 = arith.constant 0 : index
    %c0_4 = arith.constant 0 : index
    %3 = vector.load %arg3[%c0_3, %c0_4] : memref<32x128xf32, #tpu.memory_space<vmem>>, vector<32x128xf32>
    tpu.vector_store %arg3[%c0_3, %c0_4], %2 {strides = array<i32>} : memref<32x128xf32, #tpu.memory_space<vmem>>, vector<32x128xf32>,
    %cst_5 = arith.constant dense<0.000000e+00> : vector<128xf32>
    %4 = vector.multi_reduction <add>, %2, %cst_5 [0] : vector<32x128xf32> to vector<128xf32>
    %5 = vector.shape_cast %4 : vector<128xf32> to vector<1x128xf32>
    %6 = arith.mulf %2, %2 : vector<32x128xf32>
    %cst_6 = arith.constant dense<0.000000e+00> : vector<128xf32>
    %7 = vector.multi_reduction <add>, %6, %cst_6 [0] : vector<32x128xf32> to vector<128xf32>
    %8 = vector.shape_cast %7 : vector<128xf32> to vector<1x128xf32>
    %9 = tpu.concatenate %5, %8 in 0 : vector<1x128xf32>, vector<1x128xf32> -> vector<2x128xf32>
    %10 = vector.shape_cast %9 : vector<2x128xf32> to vector<1x2x128xf32>
    %c0_7 = arith.constant 0 : index
    %c0_8 = arith.constant 0 : index
    %c0_9 = arith.constant 0 : index
    %11 = vector.load %arg4[%c0_7, %c0_8, %c0_9] : memref<1x2x128xf32, #tpu.memory_space<vmem>>, vector<1x2x128xf32>
    tpu.vector_store %arg4[%c0_7, %c0_8, %c0_9], %10 {strides = array<i32>} : memref<1x2x128xf32, #tpu.memory_space<vmem>>, vector<1x2x128xf32>,
    return
  }
  func.func @transform_0(%arg0: i32) -> (i32, i32) {
    %c0_i32 = arith.constant 0 : i32
    %c0_i32_0 = arith.constant 0 : i32
    return %arg0, %c0_i32 : i32, i32
  }
  func.func @transform_1(%arg0: i32) -> (i32, i32) {
    %c0_i32 = arith.constant 0 : i32
    %c0_i32_0 = arith.constant 0 : i32
    %c0_i32_1 = arith.constant 0 : i32
    return %c0_i32, %c0_i32_0 : i32, i32
  }
  func.func @transform_2(%arg0: i32) -> (i32, i32) {
    %c0_i32 = arith.constant 0 : i32
    %c0_i32_0 = arith.constant 0 : i32
    return %arg0, %c0_i32 : i32, i32
  }
  func.func @transform_3(%arg0: i32) -> (i32, i32, i32) {
    %c0_i32 = arith.constant 0 : i32
    %c0_i32_0 = arith.constant 0 : i32
    %c0_i32_1 = arith.constant 0 : i32
    return %arg0, %c0_i32, %c0_i32_0 : i32, i32, i32
  }
}

module attributes {stable_mosaic.version = 11 : i64} {
  func.func @_conv_bias_act_kernel(%arg0: i32, %arg1: memref<2x2048xf32, #tpu.memory_space<vmem>>, %arg2: memref<2048x128xf32, #tpu.memory_space<vmem>>, %arg3: memref<1x128xf32, #tpu.memory_space<vmem>>, %arg4: memref<2x128xf32, #tpu.memory_space<vmem>>) attributes {dimension_semantics = [#tpu.dimension_semantics<parallel>], iteration_bounds = array<i64: 1>, scalar_prefetch = 0 : i64, scratch_operands = 0 : i64, tpu.core_type = #tpu.core_type<tc>, window_params = [{transform_indices = @transform_0, window_bounds = array<i64: 2, 2048>}, {pipeline_mode = #tpu.pipeline_mode<synchronous>, transform_indices = @transform_1, window_bounds = array<i64: 2048, 128>}, {pipeline_mode = #tpu.pipeline_mode<synchronous>, transform_indices = @transform_2, window_bounds = array<i64: 1, 128>}, {transform_indices = @transform_3, window_bounds = array<i64: 2, 128>}]} {
    %c0 = arith.constant 0 : index
    %c0_0 = arith.constant 0 : index
    %0 = vector.load %arg1[%c0, %c0_0] : memref<2x2048xf32, #tpu.memory_space<vmem>>, vector<2x2048xf32>
    %c0_1 = arith.constant 0 : index
    %c0_2 = arith.constant 0 : index
    %1 = vector.load %arg2[%c0_1, %c0_2] : memref<2048x128xf32, #tpu.memory_space<vmem>>, vector<2048x128xf32>
    %cst = arith.constant dense<0.000000e+00> : vector<2x128xf32>
    %2 = tpu.matmul %0, %1, %cst {dimension_numbers = #tpu.dot_dimension_numbers<[1], [0], [0], [1], [0, 0, 1, 1], [], []>} : vector<2x2048xf32>, vector<2048x128xf32>, vector<2x128xf32> -> vector<2x128xf32>
    %c0_3 = arith.constant 0 : index
    %c0_4 = arith.constant 0 : index
    %3 = vector.load %arg3[%c0_3, %c0_4] : memref<1x128xf32, #tpu.memory_space<vmem>>, vector<1x128xf32>
    %4 = vector.broadcast %3 : vector<1x128xf32> to vector<2x128xf32>
    %5 = arith.addf %2, %4 : vector<2x128xf32>
    %cst_5 = arith.constant 0.000000e+00 : f32
    %6 = vector.broadcast %cst_5 : f32 to vector<2x128xf32>
    %7 = arith.subf %6, %5 : vector<2x128xf32>
    %8 = math.exp %7 : vector<2x128xf32>
    %cst_6 = arith.constant 1.000000e+00 : f32
    %9 = vector.broadcast %cst_6 : f32 to vector<2x128xf32>
    %10 = arith.addf %9, %8 : vector<2x128xf32>
    %cst_7 = arith.constant 1.000000e+00 : f32
    %11 = vector.broadcast %cst_7 : f32 to vector<2x128xf32>
    %12 = arith.divf %11, %10 : vector<2x128xf32>
    %c0_8 = arith.constant 0 : index
    %c0_9 = arith.constant 0 : index
    %13 = vector.load %arg4[%c0_8, %c0_9] : memref<2x128xf32, #tpu.memory_space<vmem>>, vector<2x128xf32>
    tpu.vector_store %arg4[%c0_8, %c0_9], %12 {strides = array<i32>} : memref<2x128xf32, #tpu.memory_space<vmem>>, vector<2x128xf32>,
    return
  }
  func.func @transform_0(%arg0: i32) -> (i32, i32) {
    %c0_i32 = arith.constant 0 : i32
    %c0_i32_0 = arith.constant 0 : i32
    return %arg0, %c0_i32 : i32, i32
  }
  func.func @transform_1(%arg0: i32) -> (i32, i32) {
    %c0_i32 = arith.constant 0 : i32
    %c0_i32_0 = arith.constant 0 : i32
    %c0_i32_1 = arith.constant 0 : i32
    return %c0_i32, %c0_i32_0 : i32, i32
  }
  func.func @transform_2(%arg0: i32) -> (i32, i32) {
    %c0_i32 = arith.constant 0 : i32
    %c0_i32_0 = arith.constant 0 : i32
    %c0_i32_1 = arith.constant 0 : i32
    return %c0_i32, %c0_i32_0 : i32, i32
  }
  func.func @transform_3(%arg0: i32) -> (i32, i32) {
    %c0_i32 = arith.constant 0 : i32
    %c0_i32_0 = arith.constant 0 : i32
    return %arg0, %c0_i32 : i32, i32
  }
}

</mosaic_0001>

<bundles_post_ra>
// kernel: discriminator_forward.5
= control target key start
LH: loop header
LB: loop body
LE: loop exit
PB: predicated region body
PF: predicated region fallthrough
CT: control target
= control target key end

     0   :  { %s1443_s12 = smov 0   ;;  %s1750_s0 = inlined_call_operand.vmem [shape: f32[2048,48], index: 0, kind: input, shape index: {}]   ;;  %s1751_s1 = inlined_call_operand.vmem [shape: f32[48,128], index: 1, kind: input, shape index: {}]   ;;  %s1752_s2 = inlined_call_operand.vmem [shape: f32[1,128], index: 2, kind: input, shape index: {}]   ;;  %s1753_s3 = inlined_call_operand.vmem [shape: f32[2048,128], index: 3, kind: output, shape index: {}]  }
   0x1 LB: > { %s1141_s13 = sadd.s32 4294967295, %s1421_s12   ;;  %p1145_p0 = scmp.ge.s32.totalorder %s1421_s12, 1  ;;  %s1421_s12 = sphi %s1443_s12, %s13_s12  }
   0x2   : > { %p138_p1 = scmp.lt.s32.totalorder %s1421_s12, 5 }
   0x4   : > { %p139_p2 = pnand %p1145_p0, %p138_p1 }
   0x5   : > { %s1146_s18 = sshll.u32 (!%p139_p2), %s1141_s13, 6 }
   0x6   : > { %142 = sbr.rel (%p139_p2) target bundleno = 287 (0x11f), region = 32  ;;  %p163_p3 = scmp.lt.s32.totalorder (!%p139_p2), %s1146_s18, 255 }
   0xb   : > { %v243_v0 = vld [vmem:[%s1751_s1 + $0x28] sm:$0xff]  ;;  %v242_v1 = vld [vmem:[%s1751_s1 + $0x20] sm:$0xff]  ;;  %v241_v2 = vld [vmem:[%s1751_s1 + $0x18] sm:$0xff]  ;;  %s1755_s18 = smov (!%p163_p3, %s1146_s18), 255  ;;  %vm251_vm0 = vcmask 392192  }
   0xc   : > { %1287 = vmatprep.subr.mxu0 %v243_v0  ;;  %1395 = vmatprep.subr.mxu1 %v243_v0  ;;  %v240_v3 = vld [vmem:[%s1751_s1 + $0x10] sm:$0xff]  ;;  %s1147_s23 = sshll.u32 %s1755_s18, 3  ;;  %v239_v4 = vld [vmem:[%s1751_s1 + $0x8] sm:$0xff]  ;;  %v238_v5 = vld [vmem:[%s1751_s1] sm:$0xff] }
   0xd   : > { %1288 = vmatpush3.msra.mxu0 %v243_v0  ;;  %1401 = vmatpush3.msra.mxu1 %v243_v0  ;;  %s1474_s28 = scalar_lea.vmem %s1750_s0, %s1147_s23  ;;  %s1619_s8 = scalar_lea.vmem %s1753_s3, %s1147_s23 }
   0xe   : > { %1289 = vmatprep.subr.mxu0 %v242_v1  ;;  %1396 = vmatprep.subr.mxu1 %v242_v1  ;;  %v174_v6 = vld [vmem:[%s1474_s28] sm:$0xff]  ;;  %v175_v8 = vld [vmem:[%s1474_s28 + $0x8] sm:$0xff]  ;;  %v176_v10 = vld [vmem:[%s1474_s28 + $0x10] sm:$0xff] }
   0xf   : > { %1290 = vmatpush3.msra.mxu0 %v242_v1  ;;  %1402 = vmatpush3.msra.mxu1 %v242_v1  ;;  %v206_v7 = vld [vmem:[%s1474_s28 + $0x100] sm:$0xff]  ;;  %v207_v9 = vld [vmem:[%s1474_s28 + $0x108] sm:$0xff]  ;;  %v208_v11 = vld [vmem:[%s1474_s28 + $0x110] sm:$0xff] }
  0x10   : > { %1291 = vmatprep.subr.mxu0 %v241_v2  ;;  %1397 = vmatprep.subr.mxu1 %v241_v2  ;;  %v177_v12 = vld [vmem:[%s1474_s28 + $0x18] sm:$0xff]  ;;  %v178_v14 = vld [vmem:[%s1474_s28 + $0x20] sm:$0xff]  ;;  %v179_v16 = vld [vmem:[%s1474_s28 + $0x28] sm:$0xff] }
  0x11   : > { %1292 = vmatpush3.msra.mxu0 %v241_v2  ;;  %1403 = vmatpush3.msra.mxu1 %v241_v2  ;;  %v209_v13 = vld [vmem:[%s1474_s28 + $0x118] sm:$0xff]  ;;  %v210_v15 = vld [vmem:[%s1474_s28 + $0x120] sm:$0xff]  ;;  %v211_v17 = vld [vmem:[%s1474_s28 + $0x128] sm:$0xff] }
  0x12   : > { %1293 = vmatprep.subr.mxu0 %v240_v3  ;;  %1398 = vmatprep.subr.mxu1 %v240_v3  ;;  %v180_v18 = vld [vmem:[%s1474_s28 + $0x30] sm:$0xff]  ;;  %v181_v20 = vld [vmem:[%s1474_s28 + $0x38] sm:$0xff]  ;;  %v182_v22 = vld [vmem:[%s1474_s28 + $0x40] sm:$0xff] }
  0x13   : > { %1294 = vmatpush3.msra.mxu0 %v240_v3  ;;  %1404 = vmatpush3.msra.mxu1 %v240_v3  ;;  %v212_v19 = vld [vmem:[%s1474_s28 + $0x130] sm:$0xff]  ;;  %v213_v21 = vld [vmem:[%s1474_s28 + $0x138] sm:$0xff]  ;;  %v214_v23 = vld [vmem:[%s1474_s28 + $0x140] sm:$0xff] }
  0x14   : > { %1295 = vmatprep.subr.mxu0 %v239_v4  ;;  %1399 = vmatprep.subr.mxu1 %v239_v4  ;;  %v183_v24 = vld [vmem:[%s1474_s28 + $0x48] sm:$0xff]  ;;  %v184_v26 = vld [vmem:[%s1474_s28 + $0x50] sm:$0xff]  ;;  %v185_v28 = vld [vmem:[%s1474_s28 + $0x58] sm:$0xff] }
  0x15   : > { %1296 = vmatpush3.msra.mxu0 %v239_v4  ;;  %1405 = vmatpush3.msra.mxu1 %v239_v4  ;;  %v215_v25 = vld [vmem:[%s1474_s28 + $0x148] sm:$0xff]  ;;  %v216_v27 = vld [vmem:[%s1474_s28 + $0x150] sm:$0xff]  ;;  %v217_v29 = vld [vmem:[%s1474_s28 + $0x158] sm:$0xff] }
  0x16   : > { %1297 = vmatprep.subr.mxu0 %v238_v5  ;;  %1400 = vmatprep.subr.mxu1 %v238_v5  ;;  %v186_v30 = vld [vmem:[%s1474_s28 + $0x60] sm:$0xff]  ;;  %v187_v32 = vld [vmem:[%s1474_s28 + $0x68] sm:$0xff]  ;;  %v188_v34 = vld [vmem:[%s1474_s28 + $0x70] sm:$0xff] }
  0x17   : > { %1298 = vmatpush3.msra.mxu0 %v238_v5  ;;  %1406 = vmatpush3.msra.mxu1 %v238_v5  ;;  %v218_v31 = vld [vmem:[%s1474_s28 + $0x160] sm:$0xff]  ;;  %v219_v33 = vld [vmem:[%s1474_s28 + $0x168] sm:$0xff]  ;;  %v220_v35 = vld [vmem:[%s1474_s28 + $0x170] sm:$0xff] }
  0x18   : > { %1299 = vmatprep.mubr.msk.f32.mxu0 %vm251_vm0, %v174_v6  ;;  %1347 = vmatprep.mubr.msk.f32.mxu1 %vm251_vm0, %v206_v7  ;;  %v189_v36 = vld [vmem:[%s1474_s28 + $0x78] sm:$0xff]  ;;  %v190_v38 = vld [vmem:[%s1474_s28 + $0x80] sm:$0xff]  ;;  %v191_v40 = vld [vmem:[%s1474_s28 + $0x88] sm:$0xff] }
  0x19   : > { %1300 = vmatmul.mubr.msk.f32.vlgmr.msra.gmra.mxu0 %vm251_vm0, %v175_v8  ;;  %1348 = vmatmul.mubr.msk.f32.vlgmr.msra.gmra.mxu1 %vm251_vm0, %v207_v9  ;;  %v221_v37 = vld [vmem:[%s1474_s28 + $0x178] sm:$0xff]  ;;  %v222_v39 = vld [vmem:[%s1474_s28 + $0x180] sm:$0xff]  ;;  %v223_v41 = vld [vmem:[%s1474_s28 + $0x188] sm:$0xff] }
  0x1a   : > { %1302 = vmatprep.mubr.msk.f32.mxu0 %vm251_vm0, %v176_v10  ;;  %1350 = vmatprep.mubr.msk.f32.mxu1 %vm251_vm0, %v208_v11  ;;  %v192_v42 = vld [vmem:[%s1474_s28 + $0x90] sm:$0xff]  ;;  %v193_v44 = vld [vmem:[%s1474_s28 + $0x98] sm:$0xff]  ;;  %v194_v46 = vld [vmem:[%s1474_s28 + $0xa0] sm:$0xff] }
  0x1b   : > { %v224_v43 = vld [vmem:[%s1474_s28 + $0x190] sm:$0xff]  ;;  %v225_v45 = vld [vmem:[%s1474_s28 + $0x198] sm:$0xff]  ;;  %v226_v47 = vld [vmem:[%s1474_s28 + $0x1a0] sm:$0xff] }
  0x1c   : > { %v195_v48 = vld [vmem:[%s1474_s28 + $0xa8] sm:$0xff]  ;;  %v196_v50 = vld [vmem:[%s1474_s28 + $0xb0] sm:$0xff]  ;;  %v197_v52 = vld [vmem:[%s1474_s28 + $0xb8] sm:$0xff] }
  0x1d   : > { %1303 = vmatmul.mubr.msk.f32.gmra.mxu0 %vm251_vm0, %v177_v12  ;;  %1351 = vmatmul.mubr.msk.f32.gmra.mxu1 %vm251_vm0, %v209_v13  ;;  %v227_v49 = vld [vmem:[%s1474_s28 + $0x1a8] sm:$0xff]  ;;  %v228_v51 = vld [vmem:[%s1474_s28 + $0x1b0] sm:$0xff]  ;;  %v229_v53 = vld [vmem:[%s1474_s28 + $0x1b8] sm:$0xff] }
  0x1e   : > { %1305 = vmatprep.mubr.msk.f32.mxu0 %vm251_vm0, %v178_v14  ;;  %1353 = vmatprep.mubr.msk.f32.mxu1 %vm251_vm0, %v210_v15  ;;  %v198_v54 = vld [vmem:[%s1474_s28 + $0xc0] sm:$0xff]  ;;  %v199_v56 = vld [vmem:[%s1474_s28 + $0xc8] sm:$0xff]  ;;  %v200_v58 = vld [vmem:[%s1474_s28 + $0xd0] sm:$0xff] }
  0x1f   : > { %v230_v55 = vld [vmem:[%s1474_s28 + $0x1c0] sm:$0xff]  ;;  %v231_v57 = vld [vmem:[%s1474_s28 + $0x1c8] sm:$0xff]  ;;  %v232_v59 = vld [vmem:[%s1474_s28 + $0x1d0] sm:$0xff] }
  0x20   : > { %v201_v60 = vld [vmem:[%s1474_s28 + $0xd8] sm:$0xff]  ;;  %v202_v62 = vld [vmem:[%s1474_s28 + $0xe0] sm:$0xff]  ;;  %v203_v0 = vld [vmem:[%s1474_s28 + $0xe8] sm:$0xff] }
  0x21   : > { %1306 = vmatmul.mubr.msk.f32.gmra.mxu0 %vm251_vm0, %v179_v16  ;;  %1354 = vmatmul.mubr.msk.f32.gmra.mxu1 %vm251_vm0, %v211_v17  ;;  %v233_v61 = vld [vmem:[%s1474_s28 + $0x1d8] sm:$0xff]  ;;  %v234_v63 = vld [vmem:[%s1474_s28 + $0x1e0] sm:$0xff]  ;;  %v235_v1 = vld [vmem:[%s1474_s28 + $0x1e8] sm:$0xff] }
  0x22   : > { %1308 = vmatprep.mubr.msk.f32.mxu0 %vm251_vm0, %v180_v18  ;;  %1356 = vmatprep.mubr.msk.f32.mxu1 %vm251_vm0, %v212_v19  ;;  %v204_v2 = vld [vmem:[%s1474_s28 + $0xf0] sm:$0xff]  ;;  %v205_v4 = vld [vmem:[%s1474_s28 + $0xf8] sm:$0xff]  ;;  %v1610_v6 = vld [vmem:[%s1752_s2] ss:$0 sm:$0xff] }
  0x23   : > { %v236_v3 = vld [vmem:[%s1474_s28 + $0x1f0] sm:$0xff]  ;;  %v237_v5 = vld [vmem:[%s1474_s28 + $0x1f8] sm:$0xff] }
  0x25   : > { %1309 = vmatmul.mubr.msk.f32.gmra.mxu0 %vm251_vm0, %v181_v20  ;;  %1357 = vmatmul.mubr.msk.f32.gmra.mxu1 %vm251_vm0, %v213_v21 }
  0x26   : > { %1311 = vmatprep.mubr.msk.f32.mxu0 %vm251_vm0, %v182_v22  ;;  %1359 = vmatprep.mubr.msk.f32.mxu1 %vm251_vm0, %v214_v23 }
  0x29   : > { %1312 = vmatmul.mubr.msk.f32.gmra.mxu0 %vm251_vm0, %v183_v24  ;;  %1360 = vmatmul.mubr.msk.f32.gmra.mxu1 %vm251_vm0, %v215_v25 }
  0x2a   : > { %1314 = vmatprep.mubr.msk.f32.mxu0 %vm251_vm0, %v184_v26  ;;  %1362 = vmatprep.mubr.msk.f32.mxu1 %vm251_vm0, %v216_v27 }
  0x2d   : > { %1315 = vmatmul.mubr.msk.f32.gmra.mxu0 %vm251_vm0, %v185_v28  ;;  %1363 = vmatmul.mubr.msk.f32.gmra.mxu1 %vm251_vm0, %v217_v29 }
  0x2e   : > { %1317 = vmatprep.mubr.msk.f32.mxu0 %vm251_vm0, %v186_v30  ;;  %1365 = vmatprep.mubr.msk.f32.mxu1 %vm251_vm0, %v218_v31 }
  0x31   : > { %1318 = vmatmul.mubr.msk.f32.gmra.mxu0 %vm251_vm0, %v187_v32  ;;  %1366 = vmatmul.mubr.msk.f32.gmra.mxu1 %vm251_vm0, %v219_v33 }
  0x32   : > { %1320 = vmatprep.mubr.msk.f32.mxu0 %vm251_vm0, %v188_v34  ;;  %1368 = vmatprep.mubr.msk.f32.mxu1 %vm251_vm0, %v220_v35 }
  0x35   : > { %1321 = vmatmul.mubr.msk.f32.gmra.mxu0 %vm251_vm0, %v189_v36  ;;  %1369 = vmatmul.mubr.msk.f32.gmra.mxu1 %vm251_vm0, %v221_v37 }
  0x36   : > { %1323 = vmatprep.mubr.msk.f32.mxu0 %vm251_vm0, %v190_v38  ;;  %1371 = vmatprep.mubr.msk.f32.mxu1 %vm251_vm0, %v222_v39 }
  0x39   : > { %1324 = vmatmul.mubr.msk.f32.gmra.mxu0 %vm251_vm0, %v191_v40  ;;  %1372 = vmatmul.mubr.msk.f32.gmra.mxu1 %vm251_vm0, %v223_v41 }
  0x3a   : > { %1326 = vmatprep.mubr.msk.f32.mxu0 %vm251_vm0, %v192_v42  ;;  %1374 = vmatprep.mubr.msk.f32.mxu1 %vm251_vm0, %v224_v43 }
  0x3d   : > { %1327 = vmatmul.mubr.msk.f32.gmra.mxu0 %vm251_vm0, %v193_v44  ;;  %1375 = vmatmul.mubr.msk.f32.gmra.mxu1 %vm251_vm0, %v225_v45 }
  0x3e   : > { %1329 = vmatprep.mubr.msk.f32.mxu0 %vm251_vm0, %v194_v46  ;;  %1377 = vmatprep.mubr.msk.f32.mxu1 %vm251_vm0, %v226_v47 }
  0x41   : > { %1330 = vmatmul.mubr.msk.f32.gmra.mxu0 %vm251_vm0, %v195_v48  ;;  %1378 = vmatmul.mubr.msk.f32.gmra.mxu1 %vm251_vm0, %v227_v49 }
  0x42   : > { %1332 = vmatprep.mubr.msk.f32.mxu0 %vm251_vm0, %v196_v50  ;;  %1380 = vmatprep.mubr.msk.f32.mxu1 %vm251_vm0, %v228_v51 }
  0x45   : > { %1333 = vmatmul.mubr.msk.f32.gmra.mxu0 %vm251_vm0, %v197_v52  ;;  %1381 = vmatmul.mubr.msk.f32.gmra.mxu1 %vm251_vm0, %v229_v53 }
  0x46   : > { %1335 = vmatprep.mubr.msk.f32.mxu0 %vm251_vm0, %v198_v54  ;;  %1383 = vmatprep.mubr.msk.f32.mxu1 %vm251_vm0, %v230_v55 }
  0x49   : > { %1336 = vmatmul.mubr.msk.f32.gmra.mxu0 %vm251_vm0, %v199_v56  ;;  %1384 = vmatmul.mubr.msk.f32.gmra.mxu1 %vm251_vm0, %v231_v57 }
  0x4a   : > { %1338 = vmatprep.mubr.msk.f32.mxu0 %vm251_vm0, %v200_v58  ;;  %1386 = vmatprep.mubr.msk.f32.mxu1 %vm251_vm0, %v232_v59 }
  0x4d   : > { %1339 = vmatmul.mubr.msk.f32.gmra.mxu0 %vm251_vm0, %v201_v60  ;;  %1387 = vmatmul.mubr.msk.f32.gmra.mxu1 %vm251_vm0, %v233_v61 }
  0x4e   : > { %1341 = vmatprep.mubr.msk.f32.mxu0 %vm251_vm0, %v202_v62  ;;  %1389 = vmatprep.mubr.msk.f32.mxu1 %vm251_vm0, %v234_v63 }
  0x51   : > { %1342 = vmatmul.mubr.msk.f32.gmra.mxu0 %vm251_vm0, %v203_v0  ;;  %1390 = vmatmul.mubr.msk.f32.gmra.mxu1 %vm251_vm0, %v235_v1 }
  0x52   : > { %1344 = vmatprep.mubr.msk.f32.mxu0 %vm251_vm0, %v204_v2  ;;  %1392 = vmatprep.mubr.msk.f32.mxu1 %vm251_vm0, %v236_v3 }
  0x55   : > { %1345 = vmatmul.mubr.msk.f32.gmra.mxu0 %vm251_vm0, %v205_v4  ;;  %1393 = vmatmul.mubr.msk.f32.gmra.mxu1 %vm251_vm0, %v237_v5 }
  0xd9   : > { %v1301_v7 = vpop.f32.mrf.mxu0  ;;  %v1349_v8 = vpop.f32.mrf.mxu1 }
  0xda   : > { %v516_v9 = vadd.f32 %v1301_v7, %v1610_v6  ;;  %v676_v10 = vadd.f32 %v1349_v8, %v1610_v6 }
  0xdb   : > { %v510_v11 = vpop.f32.mrf.mxu0  ;;  %v670_v12 = vpop.f32.mrf.mxu1 }
  0xdc   : > { %vm830_vm1 = vcmp.gt.f32.partialorder %v516_v9, 0.0  ;;  %v894_v13 = vmul.f32 0.2, %v516_v9  ;;  %vm862_vm2 = vcmp.gt.f32.partialorder %v676_v10, 0.0  ;;  %v926_v14 = vmul.f32 0.2, %v676_v10 }
  0xdd   : > { %v511_v15 = vadd.f32 %v1610_v6, %v510_v11  ;;  %v671_v16 = vadd.f32 %v1610_v6, %v670_v12  ;;  %v1304_v17 = vpop.f32.mrf.mxu0  ;;  %v1352_v18 = vpop.f32.mrf.mxu1 }
  0xde   : > { %v958_v19 = vsel %vm830_vm1, %v516_v9, %v894_v13  ;;  %v990_v20 = vsel %vm862_vm2, %v676_v10, %v926_v14  ;;  %v526_v21 = vadd.f32 %v1304_v17, %v1610_v6  ;;  %v686_v22 = vadd.f32 %v1352_v18, %v1610_v6 }
  0xdf   : > { %1022 = vst [vmem:[%s1619_s8 + $0x8] sm:$0xff] %v958_v19  ;;  %1054 = vst [vmem:[%s1619_s8 + $0x108] sm:$0xff] %v990_v20  ;;  %vm829_vm3 = vcmp.gt.f32.partialorder %v511_v15, 0.0  ;;  %v893_v23 = vmul.f32 0.2, %v511_v15  ;;  %vm861_vm4 = vcmp.gt.f32.partialorder %v671_v16, 0.0  ;;  %v520_v25 = vpop.f32.mrf.mxu0  ;;  %v680_v26 = vpop.f32.mrf.mxu1 }
  0xe0   : > { %v925_v24 = vmul.f32 0.2, %v671_v16  ;;  %vm832_vm5 = vcmp.gt.f32.partialorder %v526_v21, 0.0  ;;  %v896_v27 = vmul.f32 0.2, %v526_v21  ;;  %vm864_vm6 = vcmp.gt.f32.partialorder %v686_v22, 0.0 }
  0xe1   : > { %v928_v28 = vmul.f32 0.2, %v686_v22  ;;  %v957_v29 = vsel %vm829_vm3, %v511_v15, %v893_v23  ;;  %v521_v31 = vadd.f32 %v1610_v6, %v520_v25  ;;  %v681_v32 = vadd.f32 %v1610_v6, %v680_v26  ;;  %v1307_v33 = vpop.f32.mrf.mxu0  ;;  %v1355_v34 = vpop.f32.mrf.mxu1 }
  0xe2   : > { %v989_v30 = vsel %vm861_vm4, %v671_v16, %v925_v24  ;;  %1021 = vst [vmem:[%s1619_s8] sm:$0xff] %v957_v29  ;;  %v960_v35 = vsel %vm832_vm5, %v526_v21, %v896_v27  ;;  %v536_v37 = vadd.f32 %v1307_v33, %v1610_v6  ;;  %v696_v38 = vadd.f32 %v1355_v34, %v1610_v6 }
  0xe3   : > { %1053 = vst [vmem:[%s1619_s8 + $0x100] sm:$0xff] %v989_v30  ;;  %v992_v36 = vsel %vm864_vm6, %v686_v22, %v928_v28  ;;  %1024 = vst [vmem:[%s1619_s8 + $0x18] sm:$0xff] %v960_v35  ;;  %vm831_vm7 = vcmp.gt.f32.partialorder %v521_v31, 0.0  ;;  %v895_v39 = vmul.f32 0.2, %v521_v31  ;;  %vm863_vm8 = vcmp.gt.f32.partialorder %v681_v32, 0.0  ;;  %v530_v41 = vpop.f32.mrf.mxu0  ;;  %v690_v42 = vpop.f32.mrf.mxu1 }
  0xe4   : > { %1056 = vst [vmem:[%s1619_s8 + $0x118] sm:$0xff] %v992_v36  ;;  %v927_v40 = vmul.f32 0.2, %v681_v32  ;;  %vm834_vm9 = vcmp.gt.f32.partialorder %v536_v37, 0.0  ;;  %v898_v43 = vmul.f32 0.2, %v536_v37  ;;  %v531_v47 = vadd.f32 %v1610_v6, %v530_v41 }
  0xe5   : > { %vm866_vm10 = vcmp.gt.f32.partialorder %v696_v38, 0.0  ;;  %v930_v44 = vmul.f32 0.2, %v696_v38  ;;  %v959_v45 = vsel %vm831_vm7, %v521_v31, %v895_v39  ;;  %v691_v48 = vadd.f32 %v1610_v6, %v690_v42  ;;  %v1310_v49 = vpop.f32.mrf.mxu0  ;;  %v1358_v50 = vpop.f32.mrf.mxu1 }
  0xe6   : > { %v991_v46 = vsel %vm863_vm8, %v681_v32, %v927_v40  ;;  %1023 = vst [vmem:[%s1619_s8 + $0x10] sm:$0xff] %v959_v45  ;;  %v962_v51 = vsel %vm834_vm9, %v536_v37, %v898_v43  ;;  %v546_v53 = vadd.f32 %v1310_v49, %v1610_v6  ;;  %v706_v54 = vadd.f32 %v1358_v50, %v1610_v6 }
  0xe7   : > { %1055 = vst [vmem:[%s1619_s8 + $0x110] sm:$0xff] %v991_v46  ;;  %v994_v52 = vsel %vm866_vm10, %v696_v38, %v930_v44  ;;  %1026 = vst [vmem:[%s1619_s8 + $0x28] sm:$0xff] %v962_v51  ;;  %vm833_vm11 = vcmp.gt.f32.partialorder %v531_v47, 0.0  ;;  %v897_v55 = vmul.f32 0.2, %v531_v47  ;;  %vm865_vm12 = vcmp.gt.f32.partialorder %v691_v48, 0.0  ;;  %v540_v57 = vpop.f32.mrf.mxu0  ;;  %v700_v58 = vpop.f32.mrf.mxu1 }
  0xe8   : > { %1058 = vst [vmem:[%s1619_s8 + $0x128] sm:$0xff] %v994_v52  ;;  %v929_v56 = vmul.f32 0.2, %v691_v48  ;;  %vm836_vm13 = vcmp.gt.f32.partialorder %v546_v53, 0.0  ;;  %v900_v59 = vmul.f32 0.2, %v546_v53  ;;  %v541_v63 = vadd.f32 %v1610_v6, %v540_v57 }
  0xe9   : > { %vm868_vm14 = vcmp.gt.f32.partialorder %v706_v54, 0.0  ;;  %v932_v60 = vmul.f32 0.2, %v706_v54  ;;  %v961_v61 = vsel %vm833_vm11, %v531_v47, %v897_v55  ;;  %v701_v0 = vadd.f32 %v1610_v6, %v700_v58  ;;  %v1313_v1 = vpop.f32.mrf.mxu0  ;;  %v1361_v2 = vpop.f32.mrf.mxu1 }
  0xea   : > { %v993_v62 = vsel %vm865_vm12, %v691_v48, %v929_v56  ;;  %1025 = vst [vmem:[%s1619_s8 + $0x20] sm:$0xff] %v961_v61  ;;  %v964_v3 = vsel %vm836_vm13, %v546_v53, %v900_v59  ;;  %v556_v5 = vadd.f32 %v1313_v1, %v1610_v6  ;;  %v716_v7 = vadd.f32 %v1361_v2, %v1610_v6 }
  0xeb   : > { %1057 = vst [vmem:[%s1619_s8 + $0x120] sm:$0xff] %v993_v62  ;;  %v996_v4 = vsel %vm868_vm14, %v706_v54, %v932_v60  ;;  %1028 = vst [vmem:[%s1619_s8 + $0x38] sm:$0xff] %v964_v3  ;;  %vm835_vm15 = vcmp.gt.f32.partialorder %v541_v63, 0.0  ;;  %v899_v8 = vmul.f32 0.2, %v541_v63  ;;  %vm867_vm0 = vcmp.gt.f32.partialorder %v701_v0, 0.0  ;;  %v550_v10 = vpop.f32.mrf.mxu0  ;;  %v710_v11 = vpop.f32.mrf.mxu1 }
  0xec   : > { %1060 = vst [vmem:[%s1619_s8 + $0x138] sm:$0xff] %v996_v4  ;;  %v931_v9 = vmul.f32 0.2, %v701_v0  ;;  %vm838_vm1 = vcmp.gt.f32.partialorder %v556_v5, 0.0  ;;  %v902_v12 = vmul.f32 0.2, %v556_v5  ;;  %v551_v16 = vadd.f32 %v1610_v6, %v550_v10 }
  0xed   : > { %vm870_vm2 = vcmp.gt.f32.partialorder %v716_v7, 0.0  ;;  %v934_v13 = vmul.f32 0.2, %v716_v7  ;;  %v963_v14 = vsel %vm835_vm15, %v541_v63, %v899_v8  ;;  %v711_v17 = vadd.f32 %v1610_v6, %v710_v11  ;;  %v1316_v18 = vpop.f32.mrf.mxu0  ;;  %v1364_v19 = vpop.f32.mrf.mxu1 }
  0xee   : > { %v995_v15 = vsel %vm867_vm0, %v701_v0, %v931_v9  ;;  %1027 = vst [vmem:[%s1619_s8 + $0x30] sm:$0xff] %v963_v14  ;;  %v966_v20 = vsel %vm838_vm1, %v556_v5, %v902_v12  ;;  %v566_v22 = vadd.f32 %v1316_v18, %v1610_v6  ;;  %v726_v23 = vadd.f32 %v1364_v19, %v1610_v6 }
  0xef   : > { %1059 = vst [vmem:[%s1619_s8 + $0x130] sm:$0xff] %v995_v15  ;;  %v998_v21 = vsel %vm870_vm2, %v716_v7, %v934_v13  ;;  %1030 = vst [vmem:[%s1619_s8 + $0x48] sm:$0xff] %v966_v20  ;;  %vm837_vm3 = vcmp.gt.f32.partialorder %v551_v16, 0.0  ;;  %v901_v24 = vmul.f32 0.2, %v551_v16  ;;  %vm869_vm4 = vcmp.gt.f32.partialorder %v711_v17, 0.0  ;;  %v560_v26 = vpop.f32.mrf.mxu0  ;;  %v720_v27 = vpop.f32.mrf.mxu1 }
  0xf0   : > { %1062 = vst [vmem:[%s1619_s8 + $0x148] sm:$0xff] %v998_v21  ;;  %v933_v25 = vmul.f32 0.2, %v711_v17  ;;  %vm840_vm5 = vcmp.gt.f32.partialorder %v566_v22, 0.0  ;;  %v904_v28 = vmul.f32 0.2, %v566_v22  ;;  %v561_v32 = vadd.f32 %v1610_v6, %v560_v26 }
  0xf1   : > { %vm872_vm6 = vcmp.gt.f32.partialorder %v726_v23, 0.0  ;;  %v936_v29 = vmul.f32 0.2, %v726_v23  ;;  %v965_v30 = vsel %vm837_vm3, %v551_v16, %v901_v24  ;;  %v721_v33 = vadd.f32 %v1610_v6, %v720_v27  ;;  %v1319_v34 = vpop.f32.mrf.mxu0  ;;  %v1367_v35 = vpop.f32.mrf.mxu1 }
  0xf2   : > { %v997_v31 = vsel %vm869_vm4, %v711_v17, %v933_v25  ;;  %1029 = vst [vmem:[%s1619_s8 + $0x40] sm:$0xff] %v965_v30  ;;  %v968_v36 = vsel %vm840_vm5, %v566_v22, %v904_v28  ;;  %v576_v38 = vadd.f32 %v1319_v34, %v1610_v6  ;;  %v736_v39 = vadd.f32 %v1367_v35, %v1610_v6 }
  0xf3   : > { %1061 = vst [vmem:[%s1619_s8 + $0x140] sm:$0xff] %v997_v31  ;;  %v1000_v37 = vsel %vm872_vm6, %v726_v23, %v936_v29  ;;  %1032 = vst [vmem:[%s1619_s8 + $0x58] sm:$0xff] %v968_v36  ;;  %vm839_vm7 = vcmp.gt.f32.partialorder %v561_v32, 0.0  ;;  %v903_v40 = vmul.f32 0.2, %v561_v32  ;;  %vm871_vm8 = vcmp.gt.f32.partialorder %v721_v33, 0.0  ;;  %v570_v42 = vpop.f32.mrf.mxu0  ;;  %v730_v43 = vpop.f32.mrf.mxu1 }
  0xf4   : > { %1064 = vst [vmem:[%s1619_s8 + $0x158] sm:$0xff] %v1000_v37  ;;  %v935_v41 = vmul.f32 0.2, %v721_v33  ;;  %vm842_vm9 = vcmp.gt.f32.partialorder %v576_v38, 0.0  ;;  %v906_v44 = vmul.f32 0.2, %v576_v38  ;;  %v571_v48 = vadd.f32 %v1610_v6, %v570_v42 }
  0xf5   : > { %vm874_vm10 = vcmp.gt.f32.partialorder %v736_v39, 0.0  ;;  %v938_v45 = vmul.f32 0.2, %v736_v39  ;;  %v967_v46 = vsel %vm839_vm7, %v561_v32, %v903_v40  ;;  %v731_v49 = vadd.f32 %v1610_v6, %v730_v43  ;;  %v1322_v50 = vpop.f32.mrf.mxu0  ;;  %v1370_v51 = vpop.f32.mrf.mxu1 }
  0xf6   : > { %v999_v47 = vsel %vm871_vm8, %v721_v33, %v935_v41  ;;  %1031 = vst [vmem:[%s1619_s8 + $0x50] sm:$0xff] %v967_v46  ;;  %v970_v52 = vsel %vm842_vm9, %v576_v38, %v906_v44  ;;  %v586_v54 = vadd.f32 %v1322_v50, %v1610_v6  ;;  %v746_v55 = vadd.f32 %v1370_v51, %v1610_v6 }
  0xf7   : > { %1063 = vst [vmem:[%s1619_s8 + $0x150] sm:$0xff] %v999_v47  ;;  %v1002_v53 = vsel %vm874_vm10, %v736_v39, %v938_v45  ;;  %1034 = vst [vmem:[%s1619_s8 + $0x68] sm:$0xff] %v970_v52  ;;  %vm841_vm11 = vcmp.gt.f32.partialorder %v571_v48, 0.0  ;;  %v905_v56 = vmul.f32 0.2, %v571_v48  ;;  %vm873_vm12 = vcmp.gt.f32.partialorder %v731_v49, 0.0  ;;  %v580_v58 = vpop.f32.mrf.mxu0  ;;  %v740_v59 = vpop.f32.mrf.mxu1 }
  0xf8   : > { %1066 = vst [vmem:[%s1619_s8 + $0x168] sm:$0xff] %v1002_v53  ;;  %v937_v57 = vmul.f32 0.2, %v731_v49  ;;  %vm844_vm13 = vcmp.gt.f32.partialorder %v586_v54, 0.0  ;;  %v908_v60 = vmul.f32 0.2, %v586_v54  ;;  %v581_v0 = vadd.f32 %v1610_v6, %v580_v58 }
  0xf9   : > { %vm876_vm14 = vcmp.gt.f32.partialorder %v746_v55, 0.0  ;;  %v940_v61 = vmul.f32 0.2, %v746_v55  ;;  %v969_v62 = vsel %vm841_vm11, %v571_v48, %v905_v56  ;;  %v741_v1 = vadd.f32 %v1610_v6, %v740_v59  ;;  %v1325_v2 = vpop.f32.mrf.mxu0  ;;  %v1373_v3 = vpop.f32.mrf.mxu1 }
  0xfa   : > { %v1001_v63 = vsel %vm873_vm12, %v731_v49, %v937_v57  ;;  %1033 = vst [vmem:[%s1619_s8 + $0x60] sm:$0xff] %v969_v62  ;;  %v972_v4 = vsel %vm844_vm13, %v586_v54, %v908_v60  ;;  %v596_v7 = vadd.f32 %v1325_v2, %v1610_v6  ;;  %v756_v8 = vadd.f32 %v1373_v3, %v1610_v6 }
  0xfb   : > { %1065 = vst [vmem:[%s1619_s8 + $0x160] sm:$0xff] %v1001_v63  ;;  %v1004_v5 = vsel %vm876_vm14, %v746_v55, %v940_v61  ;;  %1036 = vst [vmem:[%s1619_s8 + $0x78] sm:$0xff] %v972_v4  ;;  %vm843_vm15 = vcmp.gt.f32.partialorder %v581_v0, 0.0  ;;  %v907_v9 = vmul.f32 0.2, %v581_v0  ;;  %vm875_vm0 = vcmp.gt.f32.partialorder %v741_v1, 0.0  ;;  %v590_v11 = vpop.f32.mrf.mxu0  ;;  %v750_v12 = vpop.f32.mrf.mxu1 }
  0xfc   : > { %1068 = vst [vmem:[%s1619_s8 + $0x178] sm:$0xff] %v1004_v5  ;;  %v939_v10 = vmul.f32 0.2, %v741_v1  ;;  %vm846_vm1 = vcmp.gt.f32.partialorder %v596_v7, 0.0  ;;  %v910_v13 = vmul.f32 0.2, %v596_v7  ;;  %v591_v17 = vadd.f32 %v1610_v6, %v590_v11 }
  0xfd   : > { %vm878_vm2 = vcmp.gt.f32.partialorder %v756_v8, 0.0  ;;  %v942_v14 = vmul.f32 0.2, %v756_v8  ;;  %v971_v15 = vsel %vm843_vm15, %v581_v0, %v907_v9  ;;  %v751_v18 = vadd.f32 %v1610_v6, %v750_v12  ;;  %v1328_v19 = vpop.f32.mrf.mxu0  ;;  %v1376_v20 = vpop.f32.mrf.mxu1 }
  0xfe   : > { %v1003_v16 = vsel %vm875_vm0, %v741_v1, %v939_v10  ;;  %1035 = vst [vmem:[%s1619_s8 + $0x70] sm:$0xff] %v971_v15  ;;  %v974_v21 = vsel %vm846_vm1, %v596_v7, %v910_v13  ;;  %v606_v23 = vadd.f32 %v1328_v19, %v1610_v6  ;;  %v766_v24 = vadd.f32 %v1376_v20, %v1610_v6 }
  0xff   : > { %1067 = vst [vmem:[%s1619_s8 + $0x170] sm:$0xff] %v1003_v16  ;;  %v1006_v22 = vsel %vm878_vm2, %v756_v8, %v942_v14  ;;  %1038 = vst [vmem:[%s1619_s8 + $0x88] sm:$0xff] %v974_v21  ;;  %vm845_vm3 = vcmp.gt.f32.partialorder %v591_v17, 0.0  ;;  %v909_v25 = vmul.f32 0.2, %v591_v17  ;;  %vm877_vm4 = vcmp.gt.f32.partialorder %v751_v18, 0.0  ;;  %v600_v27 = vpop.f32.mrf.mxu0  ;;  %v760_v28 = vpop.f32.mrf.mxu1 }
 0x100   : > { %1070 = vst [vmem:[%s1619_s8 + $0x188] sm:$0xff] %v1006_v22  ;;  %v941_v26 = vmul.f32 0.2, %v751_v18  ;;  %vm848_vm5 = vcmp.gt.f32.partialorder %v606_v23, 0.0  ;;  %v912_v29 = vmul.f32 0.2, %v606_v23  ;;  %v601_v33 = vadd.f32 %v1610_v6, %v600_v27 }
 0x101   : > { %vm880_vm6 = vcmp.gt.f32.partialorder %v766_v24, 0.0  ;;  %v944_v30 = vmul.f32 0.2, %v766_v24  ;;  %v973_v31 = vsel %vm845_vm3, %v591_v17, %v909_v25  ;;  %v761_v34 = vadd.f32 %v1610_v6, %v760_v28  ;;  %v1331_v35 = vpop.f32.mrf.mxu0  ;;  %v1379_v36 = vpop.f32.mrf.mxu1 }
 0x102   : > { %v1005_v32 = vsel %vm877_vm4, %v751_v18, %v941_v26  ;;  %1037 = vst [vmem:[%s1619_s8 + $0x80] sm:$0xff] %v973_v31  ;;  %v976_v37 = vsel %vm848_vm5, %v606_v23, %v912_v29  ;;  %v616_v39 = vadd.f32 %v1331_v35, %v1610_v6  ;;  %v776_v40 = vadd.f32 %v1379_v36, %v1610_v6 }
 0x103   : > { %1069 = vst [vmem:[%s1619_s8 + $0x180] sm:$0xff] %v1005_v32  ;;  %v1008_v38 = vsel %vm880_vm6, %v766_v24, %v944_v30  ;;  %1040 = vst [vmem:[%s1619_s8 + $0x98] sm:$0xff] %v976_v37  ;;  %vm847_vm7 = vcmp.gt.f32.partialorder %v601_v33, 0.0  ;;  %v911_v41 = vmul.f32 0.2, %v601_v33  ;;  %vm879_vm8 = vcmp.gt.f32.partialorder %v761_v34, 0.0  ;;  %v610_v43 = vpop.f32.mrf.mxu0  ;;  %v770_v44 = vpop.f32.mrf.mxu1 }
 0x104   : > { %1072 = vst [vmem:[%s1619_s8 + $0x198] sm:$0xff] %v1008_v38  ;;  %v943_v42 = vmul.f32 0.2, %v761_v34  ;;  %vm850_vm9 = vcmp.gt.f32.partialorder %v616_v39, 0.0  ;;  %v914_v45 = vmul.f32 0.2, %v616_v39  ;;  %v611_v49 = vadd.f32 %v1610_v6, %v610_v43 }
 0x105   : > { %vm882_vm10 = vcmp.gt.f32.partialorder %v776_v40, 0.0  ;;  %v946_v46 = vmul.f32 0.2, %v776_v40  ;;  %v975_v47 = vsel %vm847_vm7, %v601_v33, %v911_v41  ;;  %v771_v50 = vadd.f32 %v1610_v6, %v770_v44  ;;  %v1334_v51 = vpop.f32.mrf.mxu0  ;;  %v1382_v52 = vpop.f32.mrf.mxu1 }
 0x106   : > { %v1007_v48 = vsel %vm879_vm8, %v761_v34, %v943_v42  ;;  %1039 = vst [vmem:[%s1619_s8 + $0x90] sm:$0xff] %v975_v47  ;;  %v978_v53 = vsel %vm850_vm9, %v616_v39, %v914_v45  ;;  %v626_v55 = vadd.f32 %v1334_v51, %v1610_v6  ;;  %v786_v56 = vadd.f32 %v1382_v52, %v1610_v6 }
 0x107   : > { %1071 = vst [vmem:[%s1619_s8 + $0x190] sm:$0xff] %v1007_v48  ;;  %v1010_v54 = vsel %vm882_vm10, %v776_v40, %v946_v46  ;;  %1042 = vst [vmem:[%s1619_s8 + $0xa8] sm:$0xff] %v978_v53  ;;  %vm849_vm11 = vcmp.gt.f32.partialorder %v611_v49, 0.0  ;;  %v913_v57 = vmul.f32 0.2, %v611_v49  ;;  %vm881_vm12 = vcmp.gt.f32.partialorder %v771_v50, 0.0  ;;  %v620_v59 = vpop.f32.mrf.mxu0  ;;  %v780_v60 = vpop.f32.mrf.mxu1 }
 0x108   : > { %1074 = vst [vmem:[%s1619_s8 + $0x1a8] sm:$0xff] %v1010_v54  ;;  %v945_v58 = vmul.f32 0.2, %v771_v50  ;;  %vm852_vm13 = vcmp.gt.f32.partialorder %v626_v55, 0.0  ;;  %v916_v61 = vmul.f32 0.2, %v626_v55  ;;  %v621_v1 = vadd.f32 %v1610_v6, %v620_v59 }
 0x109   : > { %vm884_vm14 = vcmp.gt.f32.partialorder %v786_v56, 0.0  ;;  %v948_v62 = vmul.f32 0.2, %v786_v56  ;;  %v977_v63 = vsel %vm849_vm11, %v611_v49, %v913_v57  ;;  %v781_v2 = vadd.f32 %v1610_v6, %v780_v60  ;;  %v1337_v3 = vpop.f32.mrf.mxu0  ;;  %v1385_v4 = vpop.f32.mrf.mxu1 }
 0x10a   : > { %v1009_v0 = vsel %vm881_vm12, %v771_v50, %v945_v58  ;;  %1041 = vst [vmem:[%s1619_s8 + $0xa0] sm:$0xff] %v977_v63  ;;  %v980_v5 = vsel %vm852_vm13, %v626_v55, %v916_v61  ;;  %v636_v8 = vadd.f32 %v1337_v3, %v1610_v6  ;;  %v796_v9 = vadd.f32 %v1385_v4, %v1610_v6 }
 0x10b   : > { %1073 = vst [vmem:[%s1619_s8 + $0x1a0] sm:$0xff] %v1009_v0  ;;  %v1012_v7 = vsel %vm884_vm14, %v786_v56, %v948_v62  ;;  %1044 = vst [vmem:[%s1619_s8 + $0xb8] sm:$0xff] %v980_v5  ;;  %vm851_vm15 = vcmp.gt.f32.partialorder %v621_v1, 0.0  ;;  %v915_v10 = vmul.f32 0.2, %v621_v1  ;;  %vm883_vm0 = vcmp.gt.f32.partialorder %v781_v2, 0.0  ;;  %v630_v12 = vpop.f32.mrf.mxu0  ;;  %v790_v13 = vpop.f32.mrf.mxu1 }
 0x10c   : > { %1076 = vst [vmem:[%s1619_s8 + $0x1b8] sm:$0xff] %v1012_v7  ;;  %v947_v11 = vmul.f32 0.2, %v781_v2  ;;  %vm854_vm1 = vcmp.gt.f32.partialorder %v636_v8, 0.0  ;;  %v918_v14 = vmul.f32 0.2, %v636_v8  ;;  %v631_v18 = vadd.f32 %v1610_v6, %v630_v12 }
 0x10d   : > { %vm886_vm2 = vcmp.gt.f32.partialorder %v796_v9, 0.0  ;;  %v950_v15 = vmul.f32 0.2, %v796_v9  ;;  %v979_v16 = vsel %vm851_vm15, %v621_v1, %v915_v10  ;;  %v791_v19 = vadd.f32 %v1610_v6, %v790_v13  ;;  %v1340_v20 = vpop.f32.mrf.mxu0  ;;  %v1388_v21 = vpop.f32.mrf.mxu1 }
 0x10e   : > { %v1011_v17 = vsel %vm883_vm0, %v781_v2, %v947_v11  ;;  %1043 = vst [vmem:[%s1619_s8 + $0xb0] sm:$0xff] %v979_v16  ;;  %v982_v22 = vsel %vm854_vm1, %v636_v8, %v918_v14  ;;  %v646_v24 = vadd.f32 %v1340_v20, %v1610_v6  ;;  %v806_v25 = vadd.f32 %v1388_v21, %v1610_v6 }
 0x10f   : > { %1075 = vst [vmem:[%s1619_s8 + $0x1b0] sm:$0xff] %v1011_v17  ;;  %v1014_v23 = vsel %vm886_vm2, %v796_v9, %v950_v15  ;;  %1046 = vst [vmem:[%s1619_s8 + $0xc8] sm:$0xff] %v982_v22  ;;  %vm853_vm3 = vcmp.gt.f32.partialorder %v631_v18, 0.0  ;;  %v917_v26 = vmul.f32 0.2, %v631_v18  ;;  %vm885_vm4 = vcmp.gt.f32.partialorder %v791_v19, 0.0  ;;  %v640_v28 = vpop.f32.mrf.mxu0  ;;  %v800_v29 = vpop.f32.mrf.mxu1 }
 0x110   : > { %1078 = vst [vmem:[%s1619_s8 + $0x1c8] sm:$0xff] %v1014_v23  ;;  %v949_v27 = vmul.f32 0.2, %v791_v19  ;;  %vm856_vm5 = vcmp.gt.f32.partialorder %v646_v24, 0.0  ;;  %v920_v30 = vmul.f32 0.2, %v646_v24  ;;  %v641_v34 = vadd.f32 %v1610_v6, %v640_v28 }
 0x111   : > { %vm888_vm6 = vcmp.gt.f32.partialorder %v806_v25, 0.0  ;;  %v952_v31 = vmul.f32 0.2, %v806_v25  ;;  %v981_v32 = vsel %vm853_vm3, %v631_v18, %v917_v26  ;;  %v801_v35 = vadd.f32 %v1610_v6, %v800_v29  ;;  %v1343_v36 = vpop.f32.mrf.mxu0  ;;  %v1391_v37 = vpop.f32.mrf.mxu1 }
 0x112   : > { %v1013_v33 = vsel %vm885_vm4, %v791_v19, %v949_v27  ;;  %1045 = vst [vmem:[%s1619_s8 + $0xc0] sm:$0xff] %v981_v32  ;;  %v984_v38 = vsel %vm856_vm5, %v646_v24, %v920_v30  ;;  %v656_v40 = vadd.f32 %v1343_v36, %v1610_v6  ;;  %v816_v41 = vadd.f32 %v1391_v37, %v1610_v6 }
 0x113   : > { %1077 = vst [vmem:[%s1619_s8 + $0x1c0] sm:$0xff] %v1013_v33  ;;  %v1016_v39 = vsel %vm888_vm6, %v806_v25, %v952_v31  ;;  %1048 = vst [vmem:[%s1619_s8 + $0xd8] sm:$0xff] %v984_v38  ;;  %vm855_vm7 = vcmp.gt.f32.partialorder %v641_v34, 0.0  ;;  %v919_v42 = vmul.f32 0.2, %v641_v34  ;;  %vm887_vm8 = vcmp.gt.f32.partialorder %v801_v35, 0.0  ;;  %v650_v44 = vpop.f32.mrf.mxu0  ;;  %v810_v45 = vpop.f32.mrf.mxu1 }
 0x114   : > { %1080 = vst [vmem:[%s1619_s8 + $0x1d8] sm:$0xff] %v1016_v39  ;;  %v951_v43 = vmul.f32 0.2, %v801_v35  ;;  %vm858_vm9 = vcmp.gt.f32.partialorder %v656_v40, 0.0  ;;  %v922_v46 = vmul.f32 0.2, %v656_v40  ;;  %v651_v50 = vadd.f32 %v1610_v6, %v650_v44 }
 0x115   : > { %vm890_vm10 = vcmp.gt.f32.partialorder %v816_v41, 0.0  ;;  %v954_v47 = vmul.f32 0.2, %v816_v41  ;;  %v983_v48 = vsel %vm855_vm7, %v641_v34, %v919_v42  ;;  %v811_v51 = vadd.f32 %v1610_v6, %v810_v45  ;;  %v1346_v52 = vpop.f32.mrf.mxu0  ;;  %v1394_v53 = vpop.f32.mrf.mxu1 }
 0x116   : > { %v1015_v49 = vsel %vm887_vm8, %v801_v35, %v951_v43  ;;  %1047 = vst [vmem:[%s1619_s8 + $0xd0] sm:$0xff] %v983_v48  ;;  %v986_v54 = vsel %vm858_vm9, %v656_v40, %v922_v46  ;;  %v666_v56 = vadd.f32 %v1346_v52, %v1610_v6  ;;  %v826_v57 = vadd.f32 %v1394_v53, %v1610_v6 }
 0x117   : > { %1079 = vst [vmem:[%s1619_s8 + $0x1d0] sm:$0xff] %v1015_v49  ;;  %v1018_v55 = vsel %vm890_vm10, %v816_v41, %v954_v47  ;;  %1050 = vst [vmem:[%s1619_s8 + $0xe8] sm:$0xff] %v986_v54  ;;  %vm857_vm11 = vcmp.gt.f32.partialorder %v651_v50, 0.0  ;;  %v921_v58 = vmul.f32 0.2, %v651_v50  ;;  %vm889_vm12 = vcmp.gt.f32.partialorder %v811_v51, 0.0  ;;  %v660_v60 = vpop.f32.mrf.mxu0  ;;  %v820_v61 = vpop.f32.mrf.mxu1 }
 0x118   : > { %1082 = vst [vmem:[%s1619_s8 + $0x1e8] sm:$0xff] %v1018_v55  ;;  %v953_v59 = vmul.f32 0.2, %v811_v51  ;;  %vm860_vm13 = vcmp.gt.f32.partialorder %v666_v56, 0.0  ;;  %v924_v62 = vmul.f32 0.2, %v666_v56  ;;  %v661_v2 = vadd.f32 %v1610_v6, %v660_v60 }
 0x119   : > { %vm892_vm14 = vcmp.gt.f32.partialorder %v826_v57, 0.0  ;;  %v956_v63 = vmul.f32 0.2, %v826_v57  ;;  %v985_v0 = vsel %vm857_vm11, %v651_v50, %v921_v58  ;;  %v821_v3 = vadd.f32 %v1610_v6, %v820_v61 }
 0x11a   : > { %v1017_v1 = vsel %vm889_vm12, %v811_v51, %v953_v59  ;;  %1049 = vst [vmem:[%s1619_s8 + $0xe0] sm:$0xff] %v985_v0  ;;  %v988_v4 = vsel %vm860_vm13, %v666_v56, %v924_v62  ;;  %vm859_vm15 = vcmp.gt.f32.partialorder %v661_v2, 0.0  ;;  %v923_v7 = vmul.f32 0.2, %v661_v2 }
 0x11b   : > { %1081 = vst [vmem:[%s1619_s8 + $0x1e0] sm:$0xff] %v1017_v1  ;;  %v1020_v5 = vsel %vm892_vm14, %v826_v57, %v956_v63  ;;  %1052 = vst [vmem:[%s1619_s8 + $0xf8] sm:$0xff] %v988_v4  ;;  %vm891_vm0 = vcmp.gt.f32.partialorder %v821_v3, 0.0  ;;  %v955_v8 = vmul.f32 0.2, %v821_v3 }
 0x11c   : > { %1084 = vst [vmem:[%s1619_s8 + $0x1f8] sm:$0xff] %v1020_v5  ;;  %v987_v9 = vsel %vm859_vm15, %v661_v2, %v923_v7 }
 0x11d   : > { %v1019_v10 = vsel %vm891_vm0, %v821_v3, %v955_v8  ;;  %1051 = vst [vmem:[%s1619_s8 + $0xf0] sm:$0xff] %v987_v9 }
 0x11e   : > { %1083 = vst [vmem:[%s1619_s8 + $0x1f0] sm:$0xff] %v1019_v10 }
 0x11f PF: > { %s13_s12 = sadd.s32 1, %s1421_s12  }
 0x120   : > { %p10_p4 = scmp.ge.s32.totalorder %s13_s12, 6  }
 0x122   :  { %12 = sbr.rel (!%p10_p4) target bundleno = 1 (0x1), region = 62 }

// kernel: discriminator_forward.6
= control target key start
LH: loop header
LB: loop body
LE: loop exit
PB: predicated region body
PF: predicated region fallthrough
CT: control target
= control target key end

     0   :  { %v900_v0 = vmov 0.0   ;;  %vm824_vm0 = vcmask 1040384   ;;  %s1984_s1 = inlined_call_operand.vmem [shape: f32[256,128], index: 1, kind: input, shape index: {}]   ;;  %s1985_s0 = inlined_call_operand.vmem [shape: f32[512,256], index: 0, kind: input, shape index: {}]   ;;  %s1986_s2 = inlined_call_operand.vmem [shape: f32[512,128], index: 2, kind: output, shape index: {0}]   ;;  %s1987_s3 = inlined_call_operand.vmem [shape: f32[1,2,128], index: 3, kind: output, shape index: {1}]  }
   0x1   :  { %173 = vmatprep.subr.mxu0 %v900_v0  ;;  %v156_v1 = vld [vmem:[%s1984_s1 + $0x78] sm:$0xff]  ;;  %v155_v2 = vld [vmem:[%s1984_s1 + $0x70] sm:$0xff]  ;;  %835 = vmatprep.subr.mxu1 %v900_v0  ;;  %v154_v3 = vld [vmem:[%s1984_s1 + $0x68] sm:$0xff] }
   0x2   :  { %174 = vmatpush1.msra.mxu0 %v156_v1  ;;  %867 = vmatpush1.msra.mxu1 %v156_v1  ;;  %v153_v4 = vld [vmem:[%s1984_s1 + $0x60] sm:$0xff]  ;;  %v152_v5 = vld [vmem:[%s1984_s1 + $0x58] sm:$0xff]  ;;  %v151_v6 = vld [vmem:[%s1984_s1 + $0x50] sm:$0xff] }
   0x3   :  { %175 = vmatprep.subr.mxu0 %v900_v0  ;;  %836 = vmatprep.subr.mxu1 %v900_v0  ;;  %v150_v7 = vld [vmem:[%s1984_s1 + $0x48] sm:$0xff]  ;;  %v149_v9 = vld [vmem:[%s1984_s1 + $0x40] sm:$0xff]  ;;  %v148_v10 = vld [vmem:[%s1984_s1 + $0x38] sm:$0xff] }
   0x4   :  { %176 = vmatpush1.msra.mxu0 %v155_v2  ;;  %868 = vmatpush1.msra.mxu1 %v155_v2  ;;  %v14_v8 = vld [vmem:[%s1985_s0 + $0x8] sm:$0xff]  ;;  %v147_v11 = vld [vmem:[%s1984_s1 + $0x30] sm:$0xff]  ;;  %v145_v13 = vld [vmem:[%s1984_s1 + $0x20] sm:$0xff] }
   0x5   :  { %177 = vmatprep.subr.mxu0 %v900_v0  ;;  %837 = vmatprep.subr.mxu1 %v900_v0  ;;  %v146_v12 = vld [vmem:[%s1984_s1 + $0x28] sm:$0xff]  ;;  %v144_v14 = vld [vmem:[%s1984_s1 + $0x18] sm:$0xff]  ;;  %v143_v15 = vld [vmem:[%s1984_s1 + $0x10] sm:$0xff] }
   0x6   :  { %178 = vmatpush1.msra.mxu0 %v154_v3  ;;  %869 = vmatpush1.msra.mxu1 %v154_v3  ;;  %v142_v16 = vld [vmem:[%s1984_s1 + $0x8] sm:$0xff]  ;;  %v141_v17 = vld [vmem:[%s1984_s1] sm:$0xff]  ;;  %v172_v18 = vld [vmem:[%s1984_s1 + $0xf8] sm:$0xff] }
   0x7   :  { %179 = vmatprep.subr.mxu0 %v900_v0  ;;  %838 = vmatprep.subr.mxu1 %v900_v0  ;;  %v171_v19 = vld [vmem:[%s1984_s1 + $0xf0] sm:$0xff]  ;;  %v170_v20 = vld [vmem:[%s1984_s1 + $0xe8] sm:$0xff]  ;;  %v169_v21 = vld [vmem:[%s1984_s1 + $0xe0] sm:$0xff] }
   0x8   :  { %180 = vmatpush1.msra.mxu0 %v153_v4  ;;  %870 = vmatpush1.msra.mxu1 %v153_v4  ;;  %v168_v22 = vld [vmem:[%s1984_s1 + $0xd8] sm:$0xff]  ;;  %v167_v23 = vld [vmem:[%s1984_s1 + $0xd0] sm:$0xff]  ;;  %v166_v24 = vld [vmem:[%s1984_s1 + $0xc8] sm:$0xff] }
   0x9   :  { %181 = vmatprep.subr.mxu0 %v900_v0  ;;  %839 = vmatprep.subr.mxu1 %v900_v0  ;;  %v165_v25 = vld [vmem:[%s1984_s1 + $0xc0] sm:$0xff]  ;;  %v164_v26 = vld [vmem:[%s1984_s1 + $0xb8] sm:$0xff]  ;;  %v163_v27 = vld [vmem:[%s1984_s1 + $0xb0] sm:$0xff] }
   0xa   :  { %182 = vmatpush1.msra.mxu0 %v152_v5  ;;  %871 = vmatpush1.msra.mxu1 %v152_v5  ;;  %v162_v28 = vld [vmem:[%s1984_s1 + $0xa8] sm:$0xff]  ;;  %v161_v29 = vld [vmem:[%s1984_s1 + $0xa0] sm:$0xff]  ;;  %v160_v30 = vld [vmem:[%s1984_s1 + $0x98] sm:$0xff] }
   0xb   :  { %183 = vmatprep.subr.mxu0 %v900_v0  ;;  %840 = vmatprep.subr.mxu1 %v900_v0  ;;  %v159_v31 = vld [vmem:[%s1984_s1 + $0x90] sm:$0xff]  ;;  %v158_v32 = vld [vmem:[%s1984_s1 + $0x88] sm:$0xff]  ;;  %v157_v33 = vld [vmem:[%s1984_s1 + $0x80] sm:$0xff] }
   0xc   :  { %184 = vmatpush1.msra.mxu0 %v151_v6  ;;  %237 = vmatprep.mubr.f32.mxu0 %v14_v8  ;;  %v13_v34 = vld [vmem:[%s1985_s0] sm:$0xff]  ;;  %v16_v35 = vld [vmem:[%s1985_s0 + $0x18] sm:$0xff]  ;;  %v78_v36 = vld [vmem:[%s1985_s0 + $0x208] sm:$0xff] }
   0xd   :  { %185 = vmatprep.subr.mxu0 %v900_v0  ;;  %872 = vmatpush1.msra.mxu1 %v151_v6  ;;  %v77_v37 = vld [vmem:[%s1985_s0 + $0x200] sm:$0xff]  ;;  %v80_v38 = vld [vmem:[%s1985_s0 + $0x218] sm:$0xff]  ;;  %v15_v39 = vld [vmem:[%s1985_s0 + $0x10] sm:$0xff] }
   0xe   :  { %186 = vmatpush1.msra.mxu0 %v150_v7  ;;  %841 = vmatprep.subr.mxu1 %v900_v0  ;;  %v18_v40 = vld [vmem:[%s1985_s0 + $0x28] sm:$0xff]  ;;  %v79_v41 = vld [vmem:[%s1985_s0 + $0x210] sm:$0xff]  ;;  %v17_v43 = vld [vmem:[%s1985_s0 + $0x20] sm:$0xff] }
   0xf   :  { %187 = vmatprep.subr.mxu0 %v900_v0  ;;  %873 = vmatpush1.msra.mxu1 %v150_v7  ;;  %v82_v42 = vld [vmem:[%s1985_s0 + $0x228] sm:$0xff]  ;;  %v20_v44 = vld [vmem:[%s1985_s0 + $0x38] sm:$0xff]  ;;  %v81_v45 = vld [vmem:[%s1985_s0 + $0x220] sm:$0xff] }
  0x10   :  { %188 = vmatpush1.msra.mxu0 %v149_v9  ;;  %842 = vmatprep.subr.mxu1 %v900_v0  ;;  %v84_v46 = vld [vmem:[%s1985_s0 + $0x238] sm:$0xff]  ;;  %v19_v47 = vld [vmem:[%s1985_s0 + $0x30] sm:$0xff]  ;;  %v22_v48 = vld [vmem:[%s1985_s0 + $0x48] sm:$0xff] }
  0x11   :  { %189 = vmatprep.subr.mxu0 %v900_v0  ;;  %874 = vmatpush1.msra.mxu1 %v149_v9  ;;  %v83_v49 = vld [vmem:[%s1985_s0 + $0x230] sm:$0xff]  ;;  %v86_v50 = vld [vmem:[%s1985_s0 + $0x248] sm:$0xff]  ;;  %v21_v51 = vld [vmem:[%s1985_s0 + $0x40] sm:$0xff] }
  0x12   :  { %190 = vmatpush1.msra.mxu0 %v148_v10  ;;  %843 = vmatprep.subr.mxu1 %v900_v0  ;;  %v24_v52 = vld [vmem:[%s1985_s0 + $0x58] sm:$0xff]  ;;  %v85_v53 = vld [vmem:[%s1985_s0 + $0x240] sm:$0xff]  ;;  %v23_v55 = vld [vmem:[%s1985_s0 + $0x50] sm:$0xff] }
  0x13   :  { %191 = vmatprep.subr.mxu0 %v900_v0  ;;  %875 = vmatpush1.msra.mxu1 %v148_v10  ;;  %v88_v54 = vld [vmem:[%s1985_s0 + $0x258] sm:$0xff]  ;;  %v26_v56 = vld [vmem:[%s1985_s0 + $0x68] sm:$0xff]  ;;  %v87_v57 = vld [vmem:[%s1985_s0 + $0x250] sm:$0xff] }
  0x14   :  { %192 = vmatpush1.msra.mxu0 %v147_v11  ;;  %844 = vmatprep.subr.mxu1 %v900_v0  ;;  %v90_v58 = vld [vmem:[%s1985_s0 + $0x268] sm:$0xff]  ;;  %v25_v59 = vld [vmem:[%s1985_s0 + $0x60] sm:$0xff]  ;;  %v28_v60 = vld [vmem:[%s1985_s0 + $0x78] sm:$0xff] }
  0x15   :  { %193 = vmatprep.subr.mxu0 %v900_v0  ;;  %876 = vmatpush1.msra.mxu1 %v147_v11  ;;  %v89_v61 = vld [vmem:[%s1985_s0 + $0x260] sm:$0xff]  ;;  %v92_v62 = vld [vmem:[%s1985_s0 + $0x278] sm:$0xff]  ;;  %v27_v63 = vld [vmem:[%s1985_s0 + $0x70] sm:$0xff] }
  0x16   :  { %194 = vmatpush1.msra.mxu0 %v146_v12  ;;  %845 = vmatprep.subr.mxu1 %v900_v0  ;;  %v91_v1 = vld [vmem:[%s1985_s0 + $0x270] sm:$0xff]  ;;  %v94_v2 = vld [vmem:[%s1985_s0 + $0x288] sm:$0xff]  ;;  %v29_v3 = vld [vmem:[%s1985_s0 + $0x80] sm:$0xff] }
  0x17   :  { %195 = vmatprep.subr.mxu0 %v900_v0  ;;  %877 = vmatpush1.msra.mxu1 %v146_v12  ;;  %v32_v4 = vld [vmem:[%s1985_s0 + $0x98] sm:$0xff]  ;;  %v93_v5 = vld [vmem:[%s1985_s0 + $0x280] sm:$0xff]  ;;  %v31_v7 = vld [vmem:[%s1985_s0 + $0x90] sm:$0xff] }
  0x18   :  { %196 = vmatpush1.msra.mxu0 %v145_v13  ;;  %846 = vmatprep.subr.mxu1 %v900_v0  ;;  %v96_v6 = vld [vmem:[%s1985_s0 + $0x298] sm:$0xff]  ;;  %v34_v8 = vld [vmem:[%s1985_s0 + $0xa8] sm:$0xff]  ;;  %v95_v9 = vld [vmem:[%s1985_s0 + $0x290] sm:$0xff] }
  0x19   :  { %197 = vmatprep.subr.mxu0 %v900_v0  ;;  %878 = vmatpush1.msra.mxu1 %v145_v13  ;;  %v98_v10 = vld [vmem:[%s1985_s0 + $0x2a8] sm:$0xff]  ;;  %v33_v11 = vld [vmem:[%s1985_s0 + $0xa0] sm:$0xff]  ;;  %v36_v12 = vld [vmem:[%s1985_s0 + $0xb8] sm:$0xff] }
  0x1a   :  { %198 = vmatpush1.msra.mxu0 %v144_v14  ;;  %847 = vmatprep.subr.mxu1 %v900_v0  ;;  %v97_v13 = vld [vmem:[%s1985_s0 + $0x2a0] sm:$0xff] }
  0x1b   :  { %199 = vmatprep.subr.mxu0 %v900_v0  ;;  %879 = vmatpush1.msra.mxu1 %v144_v14  ;;  %v100_v14 = vld [vmem:[%s1985_s0 + $0x2b8] sm:$0xff] }
  0x1c   :  { %200 = vmatpush1.msra.mxu0 %v143_v15  ;;  %848 = vmatprep.subr.mxu1 %v900_v0 }
  0x1d   :  { %201 = vmatprep.subr.mxu0 %v900_v0  ;;  %880 = vmatpush1.msra.mxu1 %v143_v15  ;;  %v35_v15 = vld [vmem:[%s1985_s0 + $0xb0] sm:$0xff] }
  0x1e   :  { %202 = vmatpush1.msra.mxu0 %v142_v16  ;;  %849 = vmatprep.subr.mxu1 %v900_v0 }
  0x1f   :  { %203 = vmatprep.subr.mxu0 %v900_v0  ;;  %881 = vmatpush1.msra.mxu1 %v142_v16  ;;  %v38_v16 = vld [vmem:[%s1985_s0 + $0xc8] sm:$0xff] }
  0x20   :  { %204 = vmatpush1.msra.mxu0 %v141_v17  ;;  %850 = vmatprep.subr.mxu1 %v900_v0 }
  0x21   :  { %205 = vmatprep.subr.mxu0 %v900_v0  ;;  %882 = vmatpush1.msra.mxu1 %v141_v17  ;;  %v99_v17 = vld [vmem:[%s1985_s0 + $0x2b0] sm:$0xff] }
  0x22   :  { %206 = vmatpush2.msra.mxu0 %v172_v18  ;;  %851 = vmatprep.subr.mxu1 %v900_v0 }
  0x23   :  { %207 = vmatprep.subr.mxu0 %v900_v0  ;;  %883 = vmatpush2.msra.mxu1 %v172_v18  ;;  %v102_v18 = vld [vmem:[%s1985_s0 + $0x2c8] sm:$0xff] }
  0x24   :  { %208 = vmatpush2.msra.mxu0 %v171_v19  ;;  %852 = vmatprep.subr.mxu1 %v900_v0 }
  0x25   :  { %209 = vmatprep.subr.mxu0 %v900_v0  ;;  %884 = vmatpush2.msra.mxu1 %v171_v19  ;;  %v37_v19 = vld [vmem:[%s1985_s0 + $0xc0] sm:$0xff] }
  0x26   :  { %210 = vmatpush2.msra.mxu0 %v170_v20  ;;  %853 = vmatprep.subr.mxu1 %v900_v0 }
  0x27   :  { %211 = vmatprep.subr.mxu0 %v900_v0  ;;  %885 = vmatpush2.msra.mxu1 %v170_v20  ;;  %v40_v20 = vld [vmem:[%s1985_s0 + $0xd8] sm:$0xff] }
  0x28   :  { %212 = vmatpush2.msra.mxu0 %v169_v21  ;;  %854 = vmatprep.subr.mxu1 %v900_v0 }
  0x29   :  { %213 = vmatprep.subr.mxu0 %v900_v0  ;;  %886 = vmatpush2.msra.mxu1 %v169_v21  ;;  %v101_v21 = vld [vmem:[%s1985_s0 + $0x2c0] sm:$0xff] }
  0x2a   :  { %214 = vmatpush2.msra.mxu0 %v168_v22  ;;  %855 = vmatprep.subr.mxu1 %v900_v0 }
  0x2b   :  { %215 = vmatprep.subr.mxu0 %v900_v0  ;;  %887 = vmatpush2.msra.mxu1 %v168_v22  ;;  %v104_v22 = vld [vmem:[%s1985_s0 + $0x2d8] sm:$0xff] }
  0x2c   :  { %216 = vmatpush2.msra.mxu0 %v167_v23  ;;  %856 = vmatprep.subr.mxu1 %v900_v0 }
  0x2d   :  { %217 = vmatprep.subr.mxu0 %v900_v0  ;;  %888 = vmatpush2.msra.mxu1 %v167_v23  ;;  %v39_v23 = vld [vmem:[%s1985_s0 + $0xd0] sm:$0xff] }
  0x2e   :  { %218 = vmatpush2.msra.mxu0 %v166_v24  ;;  %857 = vmatprep.subr.mxu1 %v900_v0 }
  0x2f   :  { %219 = vmatprep.subr.mxu0 %v900_v0  ;;  %889 = vmatpush2.msra.mxu1 %v166_v24  ;;  %v42_v24 = vld [vmem:[%s1985_s0 + $0xe8] sm:$0xff] }
  0x30   :  { %220 = vmatpush2.msra.mxu0 %v165_v25  ;;  %858 = vmatprep.subr.mxu1 %v900_v0 }
  0x31   :  { %221 = vmatprep.subr.mxu0 %v900_v0  ;;  %890 = vmatpush2.msra.mxu1 %v165_v25  ;;  %v103_v25 = vld [vmem:[%s1985_s0 + $0x2d0] sm:$0xff] }
  0x32   :  { %222 = vmatpush2.msra.mxu0 %v164_v26  ;;  %859 = vmatprep.subr.mxu1 %v900_v0 }
  0x33   :  { %223 = vmatprep.subr.mxu0 %v900_v0  ;;  %891 = vmatpush2.msra.mxu1 %v164_v26  ;;  %v106_v26 = vld [vmem:[%s1985_s0 + $0x2e8] sm:$0xff] }
  0x34   :  { %224 = vmatpush2.msra.mxu0 %v163_v27  ;;  %860 = vmatprep.subr.mxu1 %v900_v0 }
  0x35   :  { %225 = vmatprep.subr.mxu0 %v900_v0  ;;  %892 = vmatpush2.msra.mxu1 %v163_v27  ;;  %v41_v27 = vld [vmem:[%s1985_s0 + $0xe0] sm:$0xff] }
  0x36   :  { %226 = vmatpush2.msra.mxu0 %v162_v28  ;;  %861 = vmatprep.subr.mxu1 %v900_v0 }
  0x37   :  { %227 = vmatprep.subr.mxu0 %v900_v0  ;;  %893 = vmatpush2.msra.mxu1 %v162_v28  ;;  %v44_v28 = vld [vmem:[%s1985_s0 + $0xf8] sm:$0xff] }
  0x38   :  { %228 = vmatpush2.msra.mxu0 %v161_v29  ;;  %862 = vmatprep.subr.mxu1 %v900_v0 }
  0x39   :  { %229 = vmatprep.subr.mxu0 %v900_v0  ;;  %894 = vmatpush2.msra.mxu1 %v161_v29  ;;  %v105_v29 = vld [vmem:[%s1985_s0 + $0x2e0] sm:$0xff] }
  0x3a   :  { %230 = vmatpush2.msra.mxu0 %v160_v30  ;;  %863 = vmatprep.subr.mxu1 %v900_v0 }
  0x3b   :  { %231 = vmatprep.subr.mxu0 %v900_v0  ;;  %895 = vmatpush2.msra.mxu1 %v160_v30  ;;  %v108_v30 = vld [vmem:[%s1985_s0 + $0x2f8] sm:$0xff] }
  0x3c   :  { %232 = vmatpush2.msra.mxu0 %v159_v31  ;;  %864 = vmatprep.subr.mxu1 %v900_v0 }
  0x3d   :  { %233 = vmatprep.subr.mxu0 %v900_v0  ;;  %896 = vmatpush2.msra.mxu1 %v159_v31  ;;  %v43_v31 = vld [vmem:[%s1985_s0 + $0xf0] sm:$0xff] }
  0x3e   :  { %234 = vmatpush2.msra.mxu0 %v158_v32  ;;  %865 = vmatprep.subr.mxu1 %v900_v0 }
  0x3f   :  { %235 = vmatprep.subr.mxu0 %v900_v0  ;;  %897 = vmatpush2.msra.mxu1 %v158_v32  ;;  %v46_v32 = vld [vmem:[%s1985_s0 + $0x108] sm:$0xff] }
  0x40   :  { %236 = vmatpush2.msra.mxu0 %v157_v33  ;;  %866 = vmatprep.subr.mxu1 %v900_v0  ;;  %v30_v0 = vld [vmem:[%s1985_s0 + $0x88] sm:$0xff] }
  0x41   :  { %238 = vmatmul.mubr.f32.vlgmr.msra.gmra.mxu0 %v13_v34  ;;  %898 = vmatpush2.msra.mxu1 %v157_v33  ;;  %v107_v33 = vld [vmem:[%s1985_s0 + $0x2f0] sm:$0xff]  ;;  %v110_v34 = vld [vmem:[%s1985_s0 + $0x308] sm:$0xff] }
  0x42   :  { %242 = vmatprep.mubr.f32.mxu0 %v16_v35  ;;  %397 = vmatprep.mubr.f32.mxu1 %v78_v36  ;;  %v45_v35 = vld [vmem:[%s1985_s0 + $0x100] sm:$0xff]  ;;  %v48_v36 = vld [vmem:[%s1985_s0 + $0x118] sm:$0xff] }
  0x43   :  { %398 = vmatmul.mubr.f32.vlgmr.msra.gmra.mxu1 %v77_v37  ;;  %v109_v37 = vld [vmem:[%s1985_s0 + $0x300] sm:$0xff] }
  0x44   :  { %402 = vmatprep.mubr.f32.mxu1 %v80_v38  ;;  %v112_v38 = vld [vmem:[%s1985_s0 + $0x318] sm:$0xff] }
  0x45   :  { %243 = vmatmul.mubr.f32.gmra.mxu0 %v15_v39  ;;  %v47_v39 = vld [vmem:[%s1985_s0 + $0x110] sm:$0xff] }
  0x46   :  { %247 = vmatprep.mubr.f32.mxu0 %v18_v40  ;;  %v50_v40 = vld [vmem:[%s1985_s0 + $0x128] sm:$0xff] }
  0x47   :  { %403 = vmatmul.mubr.f32.gmra.mxu1 %v79_v41  ;;  %v111_v41 = vld [vmem:[%s1985_s0 + $0x310] sm:$0xff] }
  0x48   :  { %407 = vmatprep.mubr.f32.mxu1 %v82_v42  ;;  %v114_v42 = vld [vmem:[%s1985_s0 + $0x328] sm:$0xff] }
  0x49   :  { %248 = vmatmul.mubr.f32.gmra.mxu0 %v17_v43  ;;  %v49_v43 = vld [vmem:[%s1985_s0 + $0x120] sm:$0xff] }
  0x4a   :  { %252 = vmatprep.mubr.f32.mxu0 %v20_v44  ;;  %v52_v44 = vld [vmem:[%s1985_s0 + $0x138] sm:$0xff] }
  0x4b   :  { %408 = vmatmul.mubr.f32.gmra.mxu1 %v81_v45  ;;  %v113_v45 = vld [vmem:[%s1985_s0 + $0x320] sm:$0xff] }
  0x4c   :  { %412 = vmatprep.mubr.f32.mxu1 %v84_v46  ;;  %v116_v46 = vld [vmem:[%s1985_s0 + $0x338] sm:$0xff] }
  0x4d   :  { %253 = vmatmul.mubr.f32.gmra.mxu0 %v19_v47  ;;  %v51_v47 = vld [vmem:[%s1985_s0 + $0x130] sm:$0xff] }
  0x4e   :  { %257 = vmatprep.mubr.f32.mxu0 %v22_v48  ;;  %v54_v48 = vld [vmem:[%s1985_s0 + $0x148] sm:$0xff] }
  0x4f   :  { %413 = vmatmul.mubr.f32.gmra.mxu1 %v83_v49  ;;  %v115_v49 = vld [vmem:[%s1985_s0 + $0x330] sm:$0xff] }
  0x50   :  { %417 = vmatprep.mubr.f32.mxu1 %v86_v50  ;;  %v118_v50 = vld [vmem:[%s1985_s0 + $0x348] sm:$0xff] }
  0x51   :  { %258 = vmatmul.mubr.f32.gmra.mxu0 %v21_v51  ;;  %v53_v51 = vld [vmem:[%s1985_s0 + $0x140] sm:$0xff] }
  0x52   :  { %262 = vmatprep.mubr.f32.mxu0 %v24_v52  ;;  %v56_v52 = vld [vmem:[%s1985_s0 + $0x158] sm:$0xff] }
  0x53   :  { %418 = vmatmul.mubr.f32.gmra.mxu1 %v85_v53  ;;  %v117_v53 = vld [vmem:[%s1985_s0 + $0x340] sm:$0xff] }
  0x54   :  { %422 = vmatprep.mubr.f32.mxu1 %v88_v54  ;;  %v120_v54 = vld [vmem:[%s1985_s0 + $0x358] sm:$0xff] }
  0x55   :  { %263 = vmatmul.mubr.f32.gmra.mxu0 %v23_v55  ;;  %v55_v55 = vld [vmem:[%s1985_s0 + $0x150] sm:$0xff] }
  0x56   :  { %267 = vmatprep.mubr.f32.mxu0 %v26_v56  ;;  %v58_v56 = vld [vmem:[%s1985_s0 + $0x168] sm:$0xff] }
  0x57   :  { %423 = vmatmul.mubr.f32.gmra.mxu1 %v87_v57  ;;  %v119_v57 = vld [vmem:[%s1985_s0 + $0x350] sm:$0xff] }
  0x58   :  { %427 = vmatprep.mubr.f32.mxu1 %v90_v58  ;;  %v122_v58 = vld [vmem:[%s1985_s0 + $0x368] sm:$0xff] }
  0x59   :  { %268 = vmatmul.mubr.f32.gmra.mxu0 %v25_v59  ;;  %v57_v59 = vld [vmem:[%s1985_s0 + $0x160] sm:$0xff] }
  0x5a   :  { %272 = vmatprep.mubr.f32.mxu0 %v28_v60  ;;  %v60_v60 = vld [vmem:[%s1985_s0 + $0x178] sm:$0xff] }
  0x5b   :  { %428 = vmatmul.mubr.f32.gmra.mxu1 %v89_v61  ;;  %v121_v61 = vld [vmem:[%s1985_s0 + $0x360] sm:$0xff] }
  0x5c   :  { %432 = vmatprep.mubr.f32.mxu1 %v92_v62  ;;  %v124_v62 = vld [vmem:[%s1985_s0 + $0x378] sm:$0xff] }
  0x5d   :  { %273 = vmatmul.mubr.f32.gmra.mxu0 %v27_v63  ;;  %v59_v63 = vld [vmem:[%s1985_s0 + $0x170] sm:$0xff] }
  0x5e   :  { %277 = vmatprep.mubr.f32.mxu0 %v30_v0  ;;  %v62_v0 = vld [vmem:[%s1985_s0 + $0x188] sm:$0xff] }
  0x5f   :  { %433 = vmatmul.mubr.f32.gmra.mxu1 %v91_v1  ;;  %v123_v1 = vld [vmem:[%s1985_s0 + $0x370] sm:$0xff] }
  0x60   :  { %437 = vmatprep.mubr.f32.mxu1 %v94_v2  ;;  %v126_v2 = vld [vmem:[%s1985_s0 + $0x388] sm:$0xff] }
  0x61   :  { %278 = vmatmul.mubr.f32.gmra.mxu0 %v29_v3  ;;  %v61_v3 = vld [vmem:[%s1985_s0 + $0x180] sm:$0xff] }
  0x62   :  { %282 = vmatprep.mubr.f32.mxu0 %v32_v4  ;;  %v64_v4 = vld [vmem:[%s1985_s0 + $0x198] sm:$0xff] }
  0x63   :  { %438 = vmatmul.mubr.f32.gmra.mxu1 %v93_v5  ;;  %v125_v5 = vld [vmem:[%s1985_s0 + $0x380] sm:$0xff] }
  0x64   :  { %442 = vmatprep.mubr.f32.mxu1 %v96_v6  ;;  %v128_v6 = vld [vmem:[%s1985_s0 + $0x398] sm:$0xff] }
  0x65   :  { %283 = vmatmul.mubr.f32.gmra.mxu0 %v31_v7  ;;  %v63_v7 = vld [vmem:[%s1985_s0 + $0x190] sm:$0xff] }
  0x66   :  { %287 = vmatprep.mubr.f32.mxu0 %v34_v8  ;;  %v66_v8 = vld [vmem:[%s1985_s0 + $0x1a8] sm:$0xff] }
  0x67   :  { %443 = vmatmul.mubr.f32.gmra.mxu1 %v95_v9  ;;  %v127_v9 = vld [vmem:[%s1985_s0 + $0x390] sm:$0xff] }
  0x68   :  { %447 = vmatprep.mubr.f32.mxu1 %v98_v10  ;;  %v130_v10 = vld [vmem:[%s1985_s0 + $0x3a8] sm:$0xff] }
  0x69   :  { %288 = vmatmul.mubr.f32.gmra.mxu0 %v33_v11  ;;  %v65_v11 = vld [vmem:[%s1985_s0 + $0x1a0] sm:$0xff] }
  0x6a   :  { %292 = vmatprep.mubr.f32.mxu0 %v36_v12  ;;  %v68_v12 = vld [vmem:[%s1985_s0 + $0x1b8] sm:$0xff] }
  0x6b   :  { %448 = vmatmul.mubr.f32.gmra.mxu1 %v97_v13  ;;  %v129_v13 = vld [vmem:[%s1985_s0 + $0x3a0] sm:$0xff] }
  0x6c   :  { %452 = vmatprep.mubr.f32.mxu1 %v100_v14  ;;  %v132_v14 = vld [vmem:[%s1985_s0 + $0x3b8] sm:$0xff] }
  0x6d   :  { %293 = vmatmul.mubr.f32.gmra.mxu0 %v35_v15  ;;  %v67_v15 = vld [vmem:[%s1985_s0 + $0x1b0] sm:$0xff] }
  0x6e   :  { %297 = vmatprep.mubr.f32.mxu0 %v38_v16  ;;  %v70_v16 = vld [vmem:[%s1985_s0 + $0x1c8] sm:$0xff] }
  0x6f   :  { %453 = vmatmul.mubr.f32.gmra.mxu1 %v99_v17  ;;  %v131_v17 = vld [vmem:[%s1985_s0 + $0x3b0] sm:$0xff] }
  0x70   :  { %457 = vmatprep.mubr.f32.mxu1 %v102_v18  ;;  %v134_v18 = vld [vmem:[%s1985_s0 + $0x3c8] sm:$0xff] }
  0x71   :  { %298 = vmatmul.mubr.f32.gmra.mxu0 %v37_v19  ;;  %v69_v19 = vld [vmem:[%s1985_s0 + $0x1c0] sm:$0xff] }
  0x72   :  { %302 = vmatprep.mubr.f32.mxu0 %v40_v20  ;;  %v72_v20 = vld [vmem:[%s1985_s0 + $0x1d8] sm:$0xff] }
  0x73   :  { %458 = vmatmul.mubr.f32.gmra.mxu1 %v101_v21  ;;  %v133_v21 = vld [vmem:[%s1985_s0 + $0x3c0] sm:$0xff] }
  0x74   :  { %462 = vmatprep.mubr.f32.mxu1 %v104_v22  ;;  %v136_v22 = vld [vmem:[%s1985_s0 + $0x3d8] sm:$0xff] }
  0x75   :  { %303 = vmatmul.mubr.f32.gmra.mxu0 %v39_v23  ;;  %v71_v23 = vld [vmem:[%s1985_s0 + $0x1d0] sm:$0xff] }
  0x76   :  { %307 = vmatprep.mubr.f32.mxu0 %v42_v24  ;;  %v74_v24 = vld [vmem:[%s1985_s0 + $0x1e8] sm:$0xff] }
  0x77   :  { %463 = vmatmul.mubr.f32.gmra.mxu1 %v103_v25  ;;  %v135_v25 = vld [vmem:[%s1985_s0 + $0x3d0] sm:$0xff] }
  0x78   :  { %467 = vmatprep.mubr.f32.mxu1 %v106_v26  ;;  %v138_v26 = vld [vmem:[%s1985_s0 + $0x3e8] sm:$0xff] }
  0x79   :  { %308 = vmatmul.mubr.f32.gmra.mxu0 %v41_v27  ;;  %v73_v27 = vld [vmem:[%s1985_s0 + $0x1e0] sm:$0xff] }
  0x7a   :  { %312 = vmatprep.mubr.f32.mxu0 %v44_v28  ;;  %v76_v28 = vld [vmem:[%s1985_s0 + $0x1f8] sm:$0xff] }
  0x7b   :  { %468 = vmatmul.mubr.f32.gmra.mxu1 %v105_v29  ;;  %v137_v29 = vld [vmem:[%s1985_s0 + $0x3e0] sm:$0xff] }
  0x7c   :  { %472 = vmatprep.mubr.f32.mxu1 %v108_v30  ;;  %v140_v30 = vld [vmem:[%s1985_s0 + $0x3f8] sm:$0xff] }
  0x7d   :  { %313 = vmatmul.mubr.f32.gmra.mxu0 %v43_v31  ;;  %v75_v31 = vld [vmem:[%s1985_s0 + $0x1f0] sm:$0xff] }
  0x7e   :  { %317 = vmatprep.mubr.f32.mxu0 %v46_v32  ;;  %v139_v32 = vld [vmem:[%s1985_s0 + $0x3f0] sm:$0xff] }
  0x7f   :  { %473 = vmatmul.mubr.f32.gmra.mxu1 %v107_v33 }
  0x80   :  { %477 = vmatprep.mubr.f32.mxu1 %v110_v34 }
  0x81   :  { %318 = vmatmul.mubr.f32.gmra.mxu0 %v45_v35 }
  0x82   :  { %322 = vmatprep.mubr.f32.mxu0 %v48_v36 }
  0x83   :  { %478 = vmatmul.mubr.f32.gmra.mxu1 %v109_v37 }
  0x84   :  { %482 = vmatprep.mubr.f32.mxu1 %v112_v38 }
  0x85   :  { %323 = vmatmul.mubr.f32.gmra.mxu0 %v47_v39 }
  0x86   :  { %327 = vmatprep.mubr.f32.mxu0 %v50_v40 }
  0x87   :  { %483 = vmatmul.mubr.f32.gmra.mxu1 %v111_v41 }
  0x88   :  { %487 = vmatprep.mubr.f32.mxu1 %v114_v42 }
  0x89   :  { %328 = vmatmul.mubr.f32.gmra.mxu0 %v49_v43 }
  0x8a   :  { %332 = vmatprep.mubr.f32.mxu0 %v52_v44 }
  0x8b   :  { %488 = vmatmul.mubr.f32.gmra.mxu1 %v113_v45 }
  0x8c   :  { %492 = vmatprep.mubr.f32.mxu1 %v116_v46 }
  0x8d   :  { %333 = vmatmul.mubr.f32.gmra.mxu0 %v51_v47 }
  0x8e   :  { %337 = vmatprep.mubr.f32.mxu0 %v54_v48 }
  0x8f   :  { %493 = vmatmul.mubr.f32.gmra.mxu1 %v115_v49 }
  0x90   :  { %497 = vmatprep.mubr.f32.mxu1 %v118_v50 }
  0x91   :  { %338 = vmatmul.mubr.f32.gmra.mxu0 %v53_v51 }
  0x92   :  { %342 = vmatprep.mubr.f32.mxu0 %v56_v52 }
  0x93   :  { %498 = vmatmul.mubr.f32.gmra.mxu1 %v117_v53 }
  0x94   :  { %502 = vmatprep.mubr.f32.mxu1 %v120_v54 }
  0x95   :  { %343 = vmatmul.mubr.f32.gmra.mxu0 %v55_v55 }
  0x96   :  { %347 = vmatprep.mubr.f32.mxu0 %v58_v56 }
  0x97   :  { %503 = vmatmul.mubr.f32.gmra.mxu1 %v119_v57 }
  0x98   :  { %507 = vmatprep.mubr.f32.mxu1 %v122_v58 }
  0x99   :  { %348 = vmatmul.mubr.f32.gmra.mxu0 %v57_v59 }
  0x9a   :  { %352 = vmatprep.mubr.f32.mxu0 %v60_v60 }
  0x9b   :  { %508 = vmatmul.mubr.f32.gmra.mxu1 %v121_v61 }
  0x9c   :  { %512 = vmatprep.mubr.f32.mxu1 %v124_v62 }
  0x9d   :  { %353 = vmatmul.mubr.f32.gmra.mxu0 %v59_v63 }
  0x9e   :  { %357 = vmatprep.mubr.f32.mxu0 %v62_v0 }
  0x9f   :  { %513 = vmatmul.mubr.f32.gmra.mxu1 %v123_v1 }
  0xa0   :  { %517 = vmatprep.mubr.f32.mxu1 %v126_v2 }
  0xa1   :  { %358 = vmatmul.mubr.f32.gmra.mxu0 %v61_v3 }
  0xa2   :  { %362 = vmatprep.mubr.f32.mxu0 %v64_v4 }
  0xa3   :  { %518 = vmatmul.mubr.f32.gmra.mxu1 %v125_v5 }
  0xa4   :  { %522 = vmatprep.mubr.f32.mxu1 %v128_v6 }
  0xa5   :  { %363 = vmatmul.mubr.f32.gmra.mxu0 %v63_v7 }
  0xa6   :  { %367 = vmatprep.mubr.f32.mxu0 %v66_v8 }
  0xa7   :  { %523 = vmatmul.mubr.f32.gmra.mxu1 %v127_v9 }
  0xa8   :  { %527 = vmatprep.mubr.f32.mxu1 %v130_v10 }
  0xa9   :  { %368 = vmatmul.mubr.f32.gmra.mxu0 %v65_v11 }
  0xaa   :  { %372 = vmatprep.mubr.f32.mxu0 %v68_v12 }
  0xab   :  { %528 = vmatmul.mubr.f32.gmra.mxu1 %v129_v13 }
  0xac   :  { %532 = vmatprep.mubr.f32.mxu1 %v132_v14 }
  0xad   :  { %373 = vmatmul.mubr.f32.gmra.mxu0 %v67_v15 }
  0xae   :  { %377 = vmatprep.mubr.f32.mxu0 %v70_v16 }
  0xaf   :  { %533 = vmatmul.mubr.f32.gmra.mxu1 %v131_v17 }
  0xb0   :  { %537 = vmatprep.mubr.f32.mxu1 %v134_v18 }
  0xb1   :  { %378 = vmatmul.mubr.f32.gmra.mxu0 %v69_v19 }
  0xb2   :  { %382 = vmatprep.mubr.f32.mxu0 %v72_v20 }
  0xb3   :  { %538 = vmatmul.mubr.f32.gmra.mxu1 %v133_v21 }
  0xb4   :  { %542 = vmatprep.mubr.f32.mxu1 %v136_v22 }
  0xb5   :  { %383 = vmatmul.mubr.f32.gmra.mxu0 %v71_v23 }
  0xb6   :  { %387 = vmatprep.mubr.f32.mxu0 %v74_v24 }
  0xb7   :  { %543 = vmatmul.mubr.f32.gmra.mxu1 %v135_v25 }
  0xb8   :  { %547 = vmatprep.mubr.f32.mxu1 %v138_v26 }
  0xb9   :  { %388 = vmatmul.mubr.f32.gmra.mxu0 %v73_v27 }
  0xba   :  { %392 = vmatprep.mubr.f32.mxu0 %v76_v28 }
  0xbb   :  { %548 = vmatmul.mubr.f32.gmra.mxu1 %v137_v29 }
  0xbc   :  { %552 = vmatprep.mubr.f32.mxu1 %v140_v30 }
  0xbd   :  { %393 = vmatmul.mubr.f32.gmra.mxu0 %v75_v31 }
  0xbf   :  { %553 = vmatmul.mubr.f32.gmra.mxu1 %v139_v32 }
 0x101   :  { %v1465_v33 = vpop.f32.mrf.mxu0 }
 0x102   :  { %558 = vst [vmem:[%s1986_s2] sm:$0xff] %v1465_v33 }
 0x103   :  { %v241_v34 = vpop.f32.mrf.mxu0  ;;  %v1471_v35 = vpop.f32.mrf.mxu1 }
 0x104   :  { %590 = vst [vmem:[%s1986_s2 + $0x100] sm:$0xff] %v1471_v35 }
 0x105   :  { %v1477_v36 = vpop.f32.mrf.mxu0  ;;  %v401_v37 = vpop.f32.mrf.mxu1 }
 0x106   :  { %559 = vst [vmem:[%s1986_s2 + $0x8] sm:$0xff] %v1477_v36  ;;  %v692_v32 = vmul.f32 %v1477_v36, %v1477_v36 }
 0x107   :  { %v246_v38 = vpop.f32.mrf.mxu0  ;;  %v1483_v39 = vpop.f32.mrf.mxu1 }
 0x108   :  { %591 = vst [vmem:[%s1986_s2 + $0x108] sm:$0xff] %v1483_v39  ;;  %v691_v38 = vmul.f32 %v1465_v33, %v1465_v33 }
 0x109   :  { %v1489_v40 = vpop.f32.mrf.mxu0  ;;  %v406_v41 = vpop.f32.mrf.mxu1 }
 0x10a   :  { %560 = vst [vmem:[%s1986_s2 + $0x10] sm:$0xff] %v1489_v40  ;;  %v622_v41 = vadd.f32 %v1477_v36, %v1465_v33 }
 0x10b   :  { %v251_v42 = vpop.f32.mrf.mxu0  ;;  %v1495_v43 = vpop.f32.mrf.mxu1 }
 0x10c   :  { %592 = vst [vmem:[%s1986_s2 + $0x110] sm:$0xff] %v1495_v43  ;;  %v693_v42 = vmul.f32 %v1489_v40, %v1489_v40 }
 0x10d   :  { %v1501_v44 = vpop.f32.mrf.mxu0  ;;  %v411_v45 = vpop.f32.mrf.mxu1 }
 0x10e   :  { %561 = vst [vmem:[%s1986_s2 + $0x18] sm:$0xff] %v1501_v44 }
 0x10f   :  { %v256_v46 = vpop.f32.mrf.mxu0  ;;  %v1507_v47 = vpop.f32.mrf.mxu1 }
 0x110   :  { %593 = vst [vmem:[%s1986_s2 + $0x118] sm:$0xff] %v1507_v47 }
 0x111   :  { %v1513_v48 = vpop.f32.mrf.mxu0  ;;  %v416_v49 = vpop.f32.mrf.mxu1 }
 0x112   :  { %562 = vst [vmem:[%s1986_s2 + $0x20] sm:$0xff] %v1513_v48  ;;  %v755_v49 = vadd.f32 %v692_v32, %v691_v38 }
 0x113   :  { %v261_v50 = vpop.f32.mrf.mxu0  ;;  %v1519_v51 = vpop.f32.mrf.mxu1 }
 0x114   :  { %594 = vst [vmem:[%s1986_s2 + $0x120] sm:$0xff] %v1519_v51  ;;  %v623_v50 = vadd.f32 %v622_v41, %v1489_v40 }
 0x115   :  { %v1525_v52 = vpop.f32.mrf.mxu0  ;;  %v421_v53 = vpop.f32.mrf.mxu1 }
 0x116   :  { %563 = vst [vmem:[%s1986_s2 + $0x28] sm:$0xff] %v1525_v52  ;;  %v694_v53 = vmul.f32 %v1501_v44, %v1501_v44 }
 0x117   :  { %v266_v54 = vpop.f32.mrf.mxu0  ;;  %v1531_v55 = vpop.f32.mrf.mxu1 }
 0x118   :  { %595 = vst [vmem:[%s1986_s2 + $0x128] sm:$0xff] %v1531_v55  ;;  %v756_v54 = vadd.f32 %v755_v49, %v693_v42 }
 0x119   :  { %v1537_v56 = vpop.f32.mrf.mxu0  ;;  %v426_v57 = vpop.f32.mrf.mxu1 }
 0x11a   :  { %564 = vst [vmem:[%s1986_s2 + $0x30] sm:$0xff] %v1537_v56  ;;  %v624_v57 = vadd.f32 %v623_v50, %v1501_v44 }
 0x11b   :  { %v271_v58 = vpop.f32.mrf.mxu0  ;;  %v1543_v59 = vpop.f32.mrf.mxu1 }
 0x11c   :  { %596 = vst [vmem:[%s1986_s2 + $0x130] sm:$0xff] %v1543_v59  ;;  %v695_v58 = vmul.f32 %v1513_v48, %v1513_v48 }
 0x11d   :  { %v1549_v60 = vpop.f32.mrf.mxu0  ;;  %v431_v61 = vpop.f32.mrf.mxu1 }
 0x11e   :  { %565 = vst [vmem:[%s1986_s2 + $0x38] sm:$0xff] %v1549_v60 }
 0x11f   :  { %v276_v62 = vpop.f32.mrf.mxu0  ;;  %v1555_v63 = vpop.f32.mrf.mxu1 }
 0x120   :  { %597 = vst [vmem:[%s1986_s2 + $0x138] sm:$0xff] %v1555_v63  ;;  %v757_v62 = vadd.f32 %v756_v54, %v694_v53 }
 0x121   :  { %v1561_v0 = vpop.f32.mrf.mxu0  ;;  %v436_v1 = vpop.f32.mrf.mxu1 }
 0x122   :  { %566 = vst [vmem:[%s1986_s2 + $0x40] sm:$0xff] %v1561_v0  ;;  %v625_v1 = vadd.f32 %v624_v57, %v1513_v48 }
 0x123   :  { %v281_v2 = vpop.f32.mrf.mxu0  ;;  %v1567_v3 = vpop.f32.mrf.mxu1 }
 0x124   :  { %598 = vst [vmem:[%s1986_s2 + $0x140] sm:$0xff] %v1567_v3  ;;  %v696_v2 = vmul.f32 %v1525_v52, %v1525_v52 }
 0x125   :  { %v1573_v4 = vpop.f32.mrf.mxu0  ;;  %v441_v5 = vpop.f32.mrf.mxu1 }
 0x126   :  { %567 = vst [vmem:[%s1986_s2 + $0x48] sm:$0xff] %v1573_v4 }
 0x127   :  { %v286_v6 = vpop.f32.mrf.mxu0  ;;  %v1579_v7 = vpop.f32.mrf.mxu1 }
 0x128   :  { %599 = vst [vmem:[%s1986_s2 + $0x148] sm:$0xff] %v1579_v7  ;;  %v758_v6 = vadd.f32 %v757_v62, %v695_v58 }
 0x129   :  { %v1585_v8 = vpop.f32.mrf.mxu0  ;;  %v446_v9 = vpop.f32.mrf.mxu1 }
 0x12a   :  { %568 = vst [vmem:[%s1986_s2 + $0x50] sm:$0xff] %v1585_v8  ;;  %v626_v9 = vadd.f32 %v625_v1, %v1525_v52 }
 0x12b   :  { %v291_v10 = vpop.f32.mrf.mxu0  ;;  %v1591_v11 = vpop.f32.mrf.mxu1 }
 0x12c   :  { %600 = vst [vmem:[%s1986_s2 + $0x150] sm:$0xff] %v1591_v11  ;;  %v697_v10 = vmul.f32 %v1537_v56, %v1537_v56 }
 0x12d   :  { %v1597_v12 = vpop.f32.mrf.mxu0  ;;  %v451_v13 = vpop.f32.mrf.mxu1 }
 0x12e   :  { %569 = vst [vmem:[%s1986_s2 + $0x58] sm:$0xff] %v1597_v12 }
 0x12f   :  { %v296_v14 = vpop.f32.mrf.mxu0  ;;  %v1603_v15 = vpop.f32.mrf.mxu1 }
 0x130   :  { %601 = vst [vmem:[%s1986_s2 + $0x158] sm:$0xff] %v1603_v15  ;;  %v759_v14 = vadd.f32 %v758_v6, %v696_v2 }
 0x131   :  { %v1609_v16 = vpop.f32.mrf.mxu0  ;;  %v456_v17 = vpop.f32.mrf.mxu1 }
 0x132   :  { %570 = vst [vmem:[%s1986_s2 + $0x60] sm:$0xff] %v1609_v16  ;;  %v627_v17 = vadd.f32 %v626_v9, %v1537_v56 }
 0x133   :  { %v301_v18 = vpop.f32.mrf.mxu0  ;;  %v1615_v19 = vpop.f32.mrf.mxu1 }
 0x134   :  { %602 = vst [vmem:[%s1986_s2 + $0x160] sm:$0xff] %v1615_v19  ;;  %v698_v18 = vmul.f32 %v1549_v60, %v1549_v60 }
 0x135   :  { %v1621_v20 = vpop.f32.mrf.mxu0  ;;  %v461_v21 = vpop.f32.mrf.mxu1 }
 0x136   :  { %571 = vst [vmem:[%s1986_s2 + $0x68] sm:$0xff] %v1621_v20 }
 0x137   :  { %v306_v22 = vpop.f32.mrf.mxu0  ;;  %v1627_v23 = vpop.f32.mrf.mxu1 }
 0x138   :  { %603 = vst [vmem:[%s1986_s2 + $0x168] sm:$0xff] %v1627_v23  ;;  %v760_v22 = vadd.f32 %v759_v14, %v697_v10 }
 0x139   :  { %v1633_v24 = vpop.f32.mrf.mxu0  ;;  %v466_v25 = vpop.f32.mrf.mxu1 }
 0x13a   :  { %572 = vst [vmem:[%s1986_s2 + $0x70] sm:$0xff] %v1633_v24  ;;  %v628_v25 = vadd.f32 %v627_v17, %v1549_v60 }
 0x13b   :  { %v311_v26 = vpop.f32.mrf.mxu0  ;;  %v1639_v27 = vpop.f32.mrf.mxu1 }
 0x13c   :  { %604 = vst [vmem:[%s1986_s2 + $0x170] sm:$0xff] %v1639_v27  ;;  %v699_v26 = vmul.f32 %v1561_v0, %v1561_v0  ;;  %v629_v32 = vadd.f32 %v628_v25, %v1561_v0 }
 0x13d   :  { %v1645_v28 = vpop.f32.mrf.mxu0  ;;  %v471_v29 = vpop.f32.mrf.mxu1 }
 0x13e   :  { %573 = vst [vmem:[%s1986_s2 + $0x78] sm:$0xff] %v1645_v28  ;;  %v630_v42 = vadd.f32 %v629_v32, %v1573_v4 }
 0x13f   :  { %v316_v30 = vpop.f32.mrf.mxu0  ;;  %v1651_v31 = vpop.f32.mrf.mxu1 }
 0x140   :  { %605 = vst [vmem:[%s1986_s2 + $0x178] sm:$0xff] %v1651_v31  ;;  %v761_v30 = vadd.f32 %v760_v22, %v698_v18  ;;  %v631_v53 = vadd.f32 %v630_v42, %v1585_v8 }
 0x141   :  { %v1659_v34 = vpop.f32.mrf.mxu0  ;;  %v476_v37 = vpop.f32.mrf.mxu1 }
 0x142   :  { %574 = vst [vmem:[%s1986_s2 + $0x80] sm:$0xff] %v1659_v34  ;;  %v700_v37 = vmul.f32 %v1573_v4, %v1573_v4  ;;  %v762_v41 = vadd.f32 %v761_v30, %v699_v26  ;;  %v632_v58 = vadd.f32 %v631_v53, %v1597_v12 }
 0x143   :  { %v321_v45 = vpop.f32.mrf.mxu0  ;;  %v1671_v46 = vpop.f32.mrf.mxu1 }
 0x144   :  { %606 = vst [vmem:[%s1986_s2 + $0x180] sm:$0xff] %v1671_v46  ;;  %v701_v45 = vmul.f32 %v1585_v8, %v1585_v8  ;;  %v763_v50 = vadd.f32 %v762_v41, %v700_v37  ;;  %v633_v2 = vadd.f32 %v632_v58, %v1609_v16 }
 0x145   :  { %v1680_v33 = vpop.f32.mrf.mxu0  ;;  %v481_v36 = vpop.f32.mrf.mxu1 }
 0x146   :  { %575 = vst [vmem:[%s1986_s2 + $0x88] sm:$0xff] %v1680_v33  ;;  %v702_v36 = vmul.f32 %v1597_v12, %v1597_v12  ;;  %v764_v57 = vadd.f32 %v763_v50, %v701_v45  ;;  %v634_v10 = vadd.f32 %v633_v2, %v1621_v20 }
 0x147   :  { %v326_v40 = vpop.f32.mrf.mxu0  ;;  %v1689_v61 = vpop.f32.mrf.mxu1 }
 0x148   :  { %607 = vst [vmem:[%s1986_s2 + $0x188] sm:$0xff] %v1689_v61  ;;  %v703_v40 = vmul.f32 %v1609_v16, %v1609_v16  ;;  %v765_v1 = vadd.f32 %v764_v57, %v702_v36  ;;  %v635_v18 = vadd.f32 %v634_v10, %v1633_v24 }
 0x149   :  { %v1698_v44 = vpop.f32.mrf.mxu0  ;;  %v486_v5 = vpop.f32.mrf.mxu1 }
 0x14a   :  { %576 = vst [vmem:[%s1986_s2 + $0x90] sm:$0xff] %v1698_v44  ;;  %v704_v5 = vmul.f32 %v1621_v20, %v1621_v20  ;;  %v766_v9 = vadd.f32 %v765_v1, %v703_v40  ;;  %v636_v26 = vadd.f32 %v635_v18, %v1645_v28 }
 0x14b   :  { %v331_v48 = vpop.f32.mrf.mxu0  ;;  %v1707_v13 = vpop.f32.mrf.mxu1 }
 0x14c   :  { %608 = vst [vmem:[%s1986_s2 + $0x190] sm:$0xff] %v1707_v13  ;;  %v705_v48 = vmul.f32 %v1633_v24, %v1633_v24  ;;  %v767_v17 = vadd.f32 %v766_v9, %v704_v5  ;;  %v637_v37 = vadd.f32 %v636_v26, %v1659_v34 }
 0x14d   :  { %v1716_v52 = vpop.f32.mrf.mxu0  ;;  %v491_v21 = vpop.f32.mrf.mxu1 }
 0x14e   :  { %577 = vst [vmem:[%s1986_s2 + $0x98] sm:$0xff] %v1716_v52  ;;  %v706_v21 = vmul.f32 %v1645_v28, %v1645_v28  ;;  %v768_v25 = vadd.f32 %v767_v17, %v705_v48  ;;  %v638_v45 = vadd.f32 %v637_v37, %v1680_v33 }
 0x14f   :  { %v336_v56 = vpop.f32.mrf.mxu0  ;;  %v1725_v29 = vpop.f32.mrf.mxu1 }
 0x150   :  { %609 = vst [vmem:[%s1986_s2 + $0x198] sm:$0xff] %v1725_v29  ;;  %v707_v56 = vmul.f32 %v1659_v34, %v1659_v34  ;;  %v769_v32 = vadd.f32 %v768_v25, %v706_v21  ;;  %v639_v36 = vadd.f32 %v638_v45, %v1698_v44 }
 0x151   :  { %v1734_v60 = vpop.f32.mrf.mxu0  ;;  %v496_v38 = vpop.f32.mrf.mxu1 }
 0x152   :  { %578 = vst [vmem:[%s1986_s2 + $0xa0] sm:$0xff] %v1734_v60  ;;  %v708_v38 = vmul.f32 %v1680_v33, %v1680_v33  ;;  %v770_v42 = vadd.f32 %v769_v32, %v707_v56  ;;  %v640_v40 = vadd.f32 %v639_v36, %v1716_v52 }
 0x153   :  { %v341_v0 = vpop.f32.mrf.mxu0  ;;  %v1743_v49 = vpop.f32.mrf.mxu1 }
 0x154   :  { %610 = vst [vmem:[%s1986_s2 + $0x1a0] sm:$0xff] %v1743_v49  ;;  %v709_v0 = vmul.f32 %v1698_v44, %v1698_v44  ;;  %v771_v53 = vadd.f32 %v770_v42, %v708_v38  ;;  %v641_v5 = vadd.f32 %v640_v40, %v1734_v60 }
 0x155   :  { %v1752_v4 = vpop.f32.mrf.mxu0  ;;  %v501_v54 = vpop.f32.mrf.mxu1 }
 0x156   :  { %579 = vst [vmem:[%s1986_s2 + $0xa8] sm:$0xff] %v1752_v4  ;;  %v710_v54 = vmul.f32 %v1716_v52, %v1716_v52  ;;  %v772_v58 = vadd.f32 %v771_v53, %v709_v0  ;;  %v642_v48 = vadd.f32 %v641_v5, %v1752_v4 }
 0x157   :  { %v346_v8 = vpop.f32.mrf.mxu0  ;;  %v1761_v62 = vpop.f32.mrf.mxu1 }
 0x158   :  { %611 = vst [vmem:[%s1986_s2 + $0x1a8] sm:$0xff] %v1761_v62  ;;  %v711_v8 = vmul.f32 %v1734_v60, %v1734_v60  ;;  %v773_v2 = vadd.f32 %v772_v58, %v710_v54 }
 0x159   :  { %v349_v12 = vpop.f32.mrf.mxu0  ;;  %v506_v6 = vpop.f32.mrf.mxu1 }
 0x15a   :  { %580 = vst [vmem:[%s1986_s2 + $0xb0] sm:$0xff] %v349_v12  ;;  %v712_v6 = vmul.f32 %v1752_v4, %v1752_v4  ;;  %v774_v10 = vadd.f32 %v773_v2, %v711_v8  ;;  %v643_v21 = vadd.f32 %v642_v48, %v349_v12 }
 0x15b   :  { %v351_v16 = vpop.f32.mrf.mxu0  ;;  %v1776_v14 = vpop.f32.mrf.mxu1 }
 0x15c   :  { %612 = vst [vmem:[%s1986_s2 + $0x1b0] sm:$0xff] %v1776_v14  ;;  %v713_v16 = vmul.f32 %v349_v12, %v349_v12  ;;  %v775_v18 = vadd.f32 %v774_v10, %v712_v6 }
 0x15d   :  { %v354_v20 = vpop.f32.mrf.mxu0  ;;  %v511_v22 = vpop.f32.mrf.mxu1 }
 0x15e   :  { %581 = vst [vmem:[%s1986_s2 + $0xb8] sm:$0xff] %v354_v20  ;;  %v714_v22 = vmul.f32 %v354_v20, %v354_v20  ;;  %v776_v56 = vadd.f32 %v775_v18, %v713_v16  ;;  %v644_v4 = vadd.f32 %v643_v21, %v354_v20 }
 0x15f   :  { %v356_v24 = vpop.f32.mrf.mxu0  ;;  %v1791_v30 = vpop.f32.mrf.mxu1 }
 0x160   :  { %613 = vst [vmem:[%s1986_s2 + $0x1b8] sm:$0xff] %v1791_v30  ;;  %v777_v38 = vadd.f32 %v776_v56, %v714_v22 }
 0x161   :  { %v359_v28 = vpop.f32.mrf.mxu0  ;;  %v516_v41 = vpop.f32.mrf.mxu1 }
 0x162   :  { %582 = vst [vmem:[%s1986_s2 + $0xc0] sm:$0xff] %v359_v28  ;;  %v715_v24 = vmul.f32 %v359_v28, %v359_v28  ;;  %v645_v12 = vadd.f32 %v644_v4, %v359_v28 }
 0x163   :  { %v361_v34 = vpop.f32.mrf.mxu0  ;;  %v1806_v50 = vpop.f32.mrf.mxu1 }
 0x164   :  { %614 = vst [vmem:[%s1986_s2 + $0x1c0] sm:$0xff] %v1806_v50  ;;  %v778_v0 = vadd.f32 %v777_v38, %v715_v24 }
 0x165   :  { %v364_v33 = vpop.f32.mrf.mxu0  ;;  %v521_v57 = vpop.f32.mrf.mxu1 }
 0x166   :  { %583 = vst [vmem:[%s1986_s2 + $0xc8] sm:$0xff] %v364_v33  ;;  %v716_v41 = vmul.f32 %v364_v33, %v364_v33  ;;  %v646_v20 = vadd.f32 %v645_v12, %v364_v33 }
 0x167   :  { %v366_v44 = vpop.f32.mrf.mxu0  ;;  %v1821_v1 = vpop.f32.mrf.mxu1 }
 0x168   :  { %615 = vst [vmem:[%s1986_s2 + $0x1c8] sm:$0xff] %v1821_v1  ;;  %v779_v54 = vadd.f32 %v778_v0, %v716_v41 }
 0x169   :  { %v369_v52 = vpop.f32.mrf.mxu0  ;;  %v526_v9 = vpop.f32.mrf.mxu1 }
 0x16a   :  { %584 = vst [vmem:[%s1986_s2 + $0xd0] sm:$0xff] %v369_v52  ;;  %v717_v34 = vmul.f32 %v369_v52, %v369_v52  ;;  %v647_v28 = vadd.f32 %v646_v20, %v369_v52 }
 0x16b   :  { %v371_v17 = vpop.f32.mrf.mxu0  ;;  %v1834_v60 = vpop.f32.mrf.mxu1 }
 0x16c   :  { %616 = vst [vmem:[%s1986_s2 + $0x1d0] sm:$0xff] %v1834_v60  ;;  %v780_v8 = vadd.f32 %v779_v54, %v717_v34  ;;  %v724_v34 = vmul.f32 %v1483_v39, %v1483_v39 }
 0x16d   :  { %v374_v25 = vpop.f32.mrf.mxu0  ;;  %v531_v26 = vpop.f32.mrf.mxu1 }
 0x16e   :  { %585 = vst [vmem:[%s1986_s2 + $0xd8] sm:$0xff] %v374_v25  ;;  %v718_v57 = vmul.f32 %v374_v25, %v374_v25  ;;  %v648_v33 = vadd.f32 %v647_v28, %v374_v25  ;;  %v725_v28 = vmul.f32 %v1495_v43, %v1495_v43 }
 0x16f   :  { %v376_v32 = vpop.f32.mrf.mxu0  ;;  %v1843_v37 = vpop.f32.mrf.mxu1 }
 0x170   :  { %617 = vst [vmem:[%s1986_s2 + $0x1d8] sm:$0xff] %v1843_v37  ;;  %v781_v6 = vadd.f32 %v780_v8, %v718_v57 }
 0x171   :  { %v379_v42 = vpop.f32.mrf.mxu0  ;;  %v536_v45 = vpop.f32.mrf.mxu1 }
 0x172   :  { %586 = vst [vmem:[%s1986_s2 + $0xe0] sm:$0xff] %v379_v42  ;;  %v719_v44 = vmul.f32 %v379_v42, %v379_v42  ;;  %v649_v52 = vadd.f32 %v648_v33, %v379_v42  ;;  %v723_v42 = vmul.f32 %v1471_v35, %v1471_v35  ;;  %v727_v33 = vmul.f32 %v1519_v51, %v1519_v51 }
 0x173   :  { %v381_v53 = vpop.f32.mrf.mxu0  ;;  %v1852_v36 = vpop.f32.mrf.mxu1 }
 0x174   :  { %618 = vst [vmem:[%s1986_s2 + $0x1e0] sm:$0xff] %v1852_v36  ;;  %v782_v16 = vadd.f32 %v781_v6, %v719_v44 }
 0x175   :  { %v384_v58 = vpop.f32.mrf.mxu0  ;;  %v541_v40 = vpop.f32.mrf.mxu1 }
 0x176   :  { %587 = vst [vmem:[%s1986_s2 + $0xe8] sm:$0xff] %v384_v58  ;;  %v720_v9 = vmul.f32 %v384_v58, %v384_v58  ;;  %v650_v17 = vadd.f32 %v649_v52, %v384_v58 }
 0x177   :  { %v386_v2 = vpop.f32.mrf.mxu0  ;;  %v1861_v5 = vpop.f32.mrf.mxu1 }
 0x178   :  { %619 = vst [vmem:[%s1986_s2 + $0x1e8] sm:$0xff] %v1861_v5  ;;  %v783_v25 = vadd.f32 %v782_v16, %v720_v9 }
 0x179   :  { %v389_v10 = vpop.f32.mrf.mxu0  ;;  %v546_v48 = vpop.f32.mrf.mxu1 }
 0x17a   :  { %588 = vst [vmem:[%s1986_s2 + $0xf0] sm:$0xff] %v389_v10  ;;  %v721_v18 = vmul.f32 %v389_v10, %v389_v10  ;;  %v651_v26 = vadd.f32 %v650_v17, %v389_v10 }
 0x17b   :  { %v391_v21 = vpop.f32.mrf.mxu0  ;;  %v1870_v22 = vpop.f32.mrf.mxu1 }
 0x17c   :  { %620 = vst [vmem:[%s1986_s2 + $0x1f0] sm:$0xff] %v1870_v22  ;;  %v784_v24 = vadd.f32 %v783_v25, %v721_v18 }
 0x17d   :  { %v394_v56 = vpop.f32.mrf.mxu0  ;;  %v551_v4 = vpop.f32.mrf.mxu1 }
 0x17e   :  { %589 = vst [vmem:[%s1986_s2 + $0xf8] sm:$0xff] %v394_v56  ;;  %v652_v32 = vadd.f32 %v651_v26, %v394_v56  ;;  %v722_v38 = vmul.f32 %v394_v56, %v394_v56 }
 0x17f   :  { %v396_v12 = vpop.f32.mrf.mxu0  ;;  %v1879_v41 = vpop.f32.mrf.mxu1 }
 0x180   :  { %v653_v45 = vadd.f32 %v652_v32, %v1471_v35  ;;  %v785_v0 = vadd.f32 %v784_v24, %v722_v38  ;;  %621 = vst [vmem:[%s1986_s2 + $0x1f8] sm:$0xff] %v1879_v41  ;;  %v726_v35 = vmul.f32 %v1507_v47, %v1507_v47 }
 0x181   :  { %v556_v20 = vpop.f32.mrf.mxu1 }
 0x182   :  { %v654_v53 = vadd.f32 %v653_v45, %v1483_v39  ;;  %v786_v54 = vadd.f32 %v785_v0, %v723_v42  ;;  %v728_v39 = vmul.f32 %v1531_v55, %v1531_v55 }
 0x184   :  { %v655_v57 = vadd.f32 %v654_v53, %v1495_v43  ;;  %v787_v58 = vadd.f32 %v786_v54, %v724_v34  ;;  %v729_v43 = vmul.f32 %v1543_v59, %v1543_v59  ;;  %v739_v53 = vmul.f32 %v1671_v46, %v1671_v46 }
 0x186   :  { %v656_v40 = vadd.f32 %v655_v57, %v1507_v47  ;;  %v788_v8 = vadd.f32 %v787_v58, %v725_v28  ;;  %v730_v47 = vmul.f32 %v1555_v63, %v1555_v63  ;;  %v740_v57 = vmul.f32 %v1689_v61, %v1689_v61 }
 0x188   :  { %v657_v44 = vadd.f32 %v656_v40, %v1519_v51  ;;  %v789_v2 = vadd.f32 %v788_v8, %v726_v35  ;;  %v731_v51 = vmul.f32 %v1567_v3, %v1567_v3  ;;  %v741_v35 = vmul.f32 %v1707_v13, %v1707_v13 }
 0x189   :  { %v742_v8 = vmul.f32 %v1725_v29, %v1725_v29 }
 0x18a   :  { %v658_v6 = vadd.f32 %v657_v44, %v1531_v55  ;;  %v790_v52 = vadd.f32 %v789_v2, %v727_v33  ;;  %v732_v55 = vmul.f32 %v1579_v7, %v1579_v7  ;;  %v743_v44 = vmul.f32 %v1743_v49, %v1743_v49 }
 0x18c   :  { %v659_v9 = vadd.f32 %v658_v6, %v1543_v59  ;;  %v791_v10 = vadd.f32 %v790_v52, %v728_v39  ;;  %v733_v59 = vmul.f32 %v1591_v11, %v1591_v11  ;;  %v744_v39 = vmul.f32 %v1761_v62, %v1761_v62 }
 0x18d   :  { %v745_v52 = vmul.f32 %v1776_v14, %v1776_v14 }
 0x18e   :  { %v660_v48 = vadd.f32 %v659_v9, %v1555_v63  ;;  %v792_v16 = vadd.f32 %v791_v10, %v729_v43  ;;  %v734_v63 = vmul.f32 %v1603_v15, %v1603_v15  ;;  %v746_v9 = vmul.f32 %v1791_v30, %v1791_v30 }
 0x190   :  { %v793_v17 = vadd.f32 %v792_v16, %v730_v47  ;;  %v661_v18 = vadd.f32 %v660_v48, %v1567_v3  ;;  %v735_v3 = vmul.f32 %v1615_v19, %v1615_v19  ;;  %v747_v47 = vmul.f32 %v1806_v50, %v1806_v50 }
 0x191   :  { %v748_v16 = vmul.f32 %v1821_v1, %v1821_v1 }
 0x192   :  { %v662_v21 = vadd.f32 %v661_v18, %v1579_v7  ;;  %v794_v25 = vadd.f32 %v793_v17, %v731_v51  ;;  %v736_v7 = vmul.f32 %v1627_v23, %v1627_v23  ;;  %v749_v17 = vmul.f32 %v1834_v60, %v1834_v60 }
 0x194   :  { %v663_v26 = vadd.f32 %v662_v21, %v1591_v11  ;;  %v795_v56 = vadd.f32 %v794_v25, %v732_v55  ;;  %v737_v11 = vmul.f32 %v1639_v27, %v1639_v27  ;;  %v750_v55 = vmul.f32 %v1843_v37, %v1843_v37 }
 0x195   :  { %v751_v25 = vmul.f32 %v1852_v36, %v1852_v36 }
 0x196   :  { %v664_v4 = vadd.f32 %v663_v26, %v1603_v15  ;;  %v796_v24 = vadd.f32 %v795_v56, %v733_v59  ;;  %v738_v15 = vmul.f32 %v1651_v31, %v1651_v31  ;;  %v752_v26 = vmul.f32 %v1861_v5, %v1861_v5 }
 0x198   :  { %v665_v32 = vadd.f32 %v664_v4, %v1615_v19  ;;  %v797_v38 = vadd.f32 %v796_v24, %v734_v63  ;;  %v753_v63 = vmul.f32 %v1870_v22, %v1870_v22 }
 0x19a   :  { %v666_v12 = vadd.f32 %v665_v32, %v1627_v23  ;;  %v798_v42 = vadd.f32 %v797_v38, %v735_v3 }
 0x19c   :  { %v667_v45 = vadd.f32 %v666_v12, %v1639_v27  ;;  %v799_v0 = vadd.f32 %v798_v42, %v736_v7 }
 0x19e   :  { %v668_v20 = vadd.f32 %v667_v45, %v1651_v31  ;;  %v800_v34 = vadd.f32 %v799_v0, %v737_v11 }
 0x1a0   :  { %v669_v19 = vadd.f32 %v668_v20, %v1671_v46  ;;  %v801_v54 = vadd.f32 %v800_v34, %v738_v15 }
 0x1a2   :  { %v802_v23 = vadd.f32 %v801_v54, %v739_v53  ;;  %v670_v28 = vadd.f32 %v669_v19, %v1689_v61 }
 0x1a4   :  { %v803_v27 = vadd.f32 %v802_v23, %v740_v57  ;;  %v671_v58 = vadd.f32 %v670_v28, %v1707_v13 }
 0x1a6   :  { %v804_v31 = vadd.f32 %v803_v27, %v741_v35  ;;  %v672_v40 = vadd.f32 %v671_v58, %v1725_v29 }
 0x1a8   :  { %v805_v46 = vadd.f32 %v804_v31, %v742_v8  ;;  %v673_v33 = vadd.f32 %v672_v40, %v1743_v49 }
 0x1aa   :  { %v806_v2 = vadd.f32 %v805_v46, %v743_v44  ;;  %v674_v61 = vadd.f32 %v673_v33, %v1761_v62 }
 0x1ac   :  { %v807_v6 = vadd.f32 %v806_v2, %v744_v39  ;;  %v675_v13 = vadd.f32 %v674_v61, %v1776_v14 }
 0x1ae   :  { %v808_v43 = vadd.f32 %v807_v6, %v745_v52  ;;  %v676_v29 = vadd.f32 %v675_v13, %v1791_v30 }
 0x1b0   :  { %v809_v10 = vadd.f32 %v808_v43, %v746_v9  ;;  %v677_v49 = vadd.f32 %v676_v29, %v1806_v50 }
 0x1b2   :  { %v810_v48 = vadd.f32 %v809_v10, %v747_v47  ;;  %v678_v62 = vadd.f32 %v677_v49, %v1821_v1 }
 0x1b4   :  { %v811_v51 = vadd.f32 %v810_v48, %v748_v16  ;;  %v679_v14 = vadd.f32 %v678_v62, %v1834_v60 }
 0x1b6   :  { %v812_v18 = vadd.f32 %v811_v51, %v749_v17  ;;  %v680_v30 = vadd.f32 %v679_v14, %v1843_v37  ;;  %v754_v37 = vmul.f32 %v1879_v41, %v1879_v41 }
 0x1b8   :  { %v813_v21 = vadd.f32 %v812_v18, %v750_v55  ;;  %v681_v50 = vadd.f32 %v680_v30, %v1852_v36 }
 0x1ba   :  { %v814_v59 = vadd.f32 %v813_v21, %v751_v25  ;;  %v682_v1 = vadd.f32 %v681_v50, %v1861_v5 }
 0x1bc   :  { %v815_v56 = vadd.f32 %v814_v59, %v752_v26  ;;  %v683_v60 = vadd.f32 %v682_v1, %v1870_v22 }
 0x1be   :  { %v816_v4 = vadd.f32 %v815_v56, %v753_v63  ;;  %v684_v24 = vadd.f32 %v683_v60, %v1879_v41 }
 0x1c0   :  { %v685_v3 = vrot.slane %v684_v24, 4  ;;  %v817_v36 = vadd.f32 %v816_v4, %v754_v37 }
 0x1c2   :  { %v686_v32 = vadd.f32 %v685_v3, %v684_v24  ;;  %v818_v38 = vrot.slane %v817_v36, 4 }
 0x1c4   :  { %v687_v7 = vrot.slane %v686_v32, 2  ;;  %v819_v12 = vadd.f32 %v818_v38, %v817_v36 }
 0x1c6   :  { %v688_v42 = vadd.f32 %v687_v7, %v686_v32  ;;  %v820_v5 = vrot.slane %v819_v12, 2 }
 0x1c8   :  { %v689_v11 = vrot.slane %v688_v42, 1  ;;  %v821_v45 = vadd.f32 %v820_v5, %v819_v12 }
 0x1ca   :  { %v822_v0 = vrot.slane %v821_v45, 1  ;;  %v690_v15 = vadd.f32 %v689_v11, %v688_v42 }
 0x1cc   :  { %v823_v22 = vadd.f32 %v822_v0, %v821_v45 }
 0x1ce   :  { %v825_v20 = vsel %vm824_vm0, %v690_v15, %v823_v22 }
 0x1cf   :  { %826 = vst [vmem:[%s1987_s3] sm:$0x3] %v825_v20 }

// kernel: discriminator_forward.7
= control target key start
LH: loop header
LB: loop body
LE: loop exit
PB: predicated region body
PF: predicated region fallthrough
CT: control target
= control target key end

     0   :  { %vm505_vm0 = vcmask 1040384   ;;  %s1137_s1 = inlined_call_operand.vmem [shape: f32[512,128], index: 1, kind: input, shape index: {}]   ;;  %s1138_s0 = inlined_call_operand.vmem [shape: f32[128,512], index: 0, kind: input, shape index: {}]   ;;  %s1139_s2 = inlined_call_operand.vmem [shape: f32[128,128], index: 2, kind: output, shape index: {0}]   ;;  %s1140_s3 = inlined_call_operand.vmem [shape: f32[1,2,128], index: 3, kind: output, shape index: {1}]  }
   0x1   :  { %v108_v0 = vld [vmem:[%s1137_s1 + $0xf8] sm:$0xff]  ;;  %v107_v4 = vld [vmem:[%s1137_s1 + $0xf0] sm:$0xff]  ;;  %v106_v8 = vld [vmem:[%s1137_s1 + $0xe8] sm:$0xff] }
   0x2   :  { %v140_v1 = vld [vmem:[%s1137_s1 + $0x1f8] sm:$0xff]  ;;  %516 = vmatprep.subr.mxu0 %v108_v0  ;;  %v139_v5 = vld [vmem:[%s1137_s1 + $0x1f0] sm:$0xff]  ;;  %v138_v9 = vld [vmem:[%s1137_s1 + $0x1e8] sm:$0xff] }
   0x3   :  { %v92_v2 = vld [vmem:[%s1137_s1 + $0x78] sm:$0xff]  ;;  %596 = vmatprep.subr.mxu1 %v140_v1  ;;  %v91_v6 = vld [vmem:[%s1137_s1 + $0x70] sm:$0xff]  ;;  %v90_v10 = vld [vmem:[%s1137_s1 + $0x68] sm:$0xff] }
   0x4   :  { %v124_v3 = vld [vmem:[%s1137_s1 + $0x178] sm:$0xff]  ;;  %517 = vmatpush3.msra.mxu0 %v92_v2  ;;  %v123_v7 = vld [vmem:[%s1137_s1 + $0x170] sm:$0xff]  ;;  %v122_v11 = vld [vmem:[%s1137_s1 + $0x168] sm:$0xff] }
   0x5   :  { %597 = vmatpush3.msra.mxu1 %v124_v3  ;;  %518 = vmatprep.subr.mxu0 %v107_v4  ;;  %v105_v12 = vld [vmem:[%s1137_s1 + $0xe0] sm:$0xff]  ;;  %v104_v16 = vld [vmem:[%s1137_s1 + $0xd8] sm:$0xff]  ;;  %v103_v20 = vld [vmem:[%s1137_s1 + $0xd0] sm:$0xff] }
   0x6   :  { %598 = vmatprep.subr.mxu1 %v139_v5  ;;  %519 = vmatpush3.msra.mxu0 %v91_v6  ;;  %v137_v13 = vld [vmem:[%s1137_s1 + $0x1e0] sm:$0xff]  ;;  %v136_v17 = vld [vmem:[%s1137_s1 + $0x1d8] sm:$0xff]  ;;  %v135_v21 = vld [vmem:[%s1137_s1 + $0x1d0] sm:$0xff] }
   0x7   :  { %599 = vmatpush3.msra.mxu1 %v123_v7  ;;  %520 = vmatprep.subr.mxu0 %v106_v8  ;;  %v89_v14 = vld [vmem:[%s1137_s1 + $0x60] sm:$0xff]  ;;  %v88_v18 = vld [vmem:[%s1137_s1 + $0x58] sm:$0xff]  ;;  %v87_v22 = vld [vmem:[%s1137_s1 + $0x50] sm:$0xff] }
   0x8   :  { %600 = vmatprep.subr.mxu1 %v138_v9  ;;  %v121_v15 = vld [vmem:[%s1137_s1 + $0x160] sm:$0xff]  ;;  %521 = vmatpush3.msra.mxu0 %v90_v10  ;;  %v120_v19 = vld [vmem:[%s1137_s1 + $0x158] sm:$0xff]  ;;  %v119_v23 = vld [vmem:[%s1137_s1 + $0x150] sm:$0xff] }
   0x9   :  { %601 = vmatpush3.msra.mxu1 %v122_v11  ;;  %522 = vmatprep.subr.mxu0 %v105_v12  ;;  %v102_v24 = vld [vmem:[%s1137_s1 + $0xc8] sm:$0xff]  ;;  %v101_v28 = vld [vmem:[%s1137_s1 + $0xc0] sm:$0xff]  ;;  %v100_v32 = vld [vmem:[%s1137_s1 + $0xb8] sm:$0xff] }
   0xa   :  { %602 = vmatprep.subr.mxu1 %v137_v13  ;;  %523 = vmatpush3.msra.mxu0 %v89_v14  ;;  %v134_v25 = vld [vmem:[%s1137_s1 + $0x1c8] sm:$0xff]  ;;  %v133_v29 = vld [vmem:[%s1137_s1 + $0x1c0] sm:$0xff]  ;;  %v132_v33 = vld [vmem:[%s1137_s1 + $0x1b8] sm:$0xff] }
   0xb   :  { %603 = vmatpush3.msra.mxu1 %v121_v15  ;;  %524 = vmatprep.subr.mxu0 %v104_v16  ;;  %v86_v26 = vld [vmem:[%s1137_s1 + $0x48] sm:$0xff]  ;;  %v85_v30 = vld [vmem:[%s1137_s1 + $0x40] sm:$0xff]  ;;  %v84_v34 = vld [vmem:[%s1137_s1 + $0x38] sm:$0xff] }
   0xc   :  { %604 = vmatprep.subr.mxu1 %v136_v17  ;;  %525 = vmatpush3.msra.mxu0 %v88_v18  ;;  %v118_v27 = vld [vmem:[%s1137_s1 + $0x148] sm:$0xff]  ;;  %v117_v31 = vld [vmem:[%s1137_s1 + $0x140] sm:$0xff]  ;;  %v116_v35 = vld [vmem:[%s1137_s1 + $0x138] sm:$0xff] }
   0xd   :  { %605 = vmatpush3.msra.mxu1 %v120_v19  ;;  %526 = vmatprep.subr.mxu0 %v103_v20  ;;  %v99_v36 = vld [vmem:[%s1137_s1 + $0xb0] sm:$0xff]  ;;  %v98_v40 = vld [vmem:[%s1137_s1 + $0xa8] sm:$0xff]  ;;  %v97_v44 = vld [vmem:[%s1137_s1 + $0xa0] sm:$0xff] }
   0xe   :  { %606 = vmatprep.subr.mxu1 %v135_v21  ;;  %527 = vmatpush3.msra.mxu0 %v87_v22  ;;  %v131_v37 = vld [vmem:[%s1137_s1 + $0x1b0] sm:$0xff]  ;;  %v130_v41 = vld [vmem:[%s1137_s1 + $0x1a8] sm:$0xff]  ;;  %v129_v45 = vld [vmem:[%s1137_s1 + $0x1a0] sm:$0xff] }
   0xf   :  { %607 = vmatpush3.msra.mxu1 %v119_v23  ;;  %528 = vmatprep.subr.mxu0 %v102_v24  ;;  %v83_v38 = vld [vmem:[%s1137_s1 + $0x30] sm:$0xff]  ;;  %v82_v42 = vld [vmem:[%s1137_s1 + $0x28] sm:$0xff]  ;;  %v81_v46 = vld [vmem:[%s1137_s1 + $0x20] sm:$0xff] }
  0x10   :  { %608 = vmatprep.subr.mxu1 %v134_v25  ;;  %529 = vmatpush3.msra.mxu0 %v86_v26  ;;  %v115_v39 = vld [vmem:[%s1137_s1 + $0x130] sm:$0xff]  ;;  %v114_v43 = vld [vmem:[%s1137_s1 + $0x128] sm:$0xff]  ;;  %v113_v47 = vld [vmem:[%s1137_s1 + $0x120] sm:$0xff] }
  0x11   :  { %609 = vmatpush3.msra.mxu1 %v118_v27  ;;  %530 = vmatprep.subr.mxu0 %v101_v28  ;;  %v96_v48 = vld [vmem:[%s1137_s1 + $0x98] sm:$0xff]  ;;  %v95_v52 = vld [vmem:[%s1137_s1 + $0x90] sm:$0xff]  ;;  %v94_v56 = vld [vmem:[%s1137_s1 + $0x88] sm:$0xff] }
  0x12   :  { %610 = vmatprep.subr.mxu1 %v133_v29  ;;  %531 = vmatpush3.msra.mxu0 %v85_v30  ;;  %v128_v49 = vld [vmem:[%s1137_s1 + $0x198] sm:$0xff]  ;;  %v127_v53 = vld [vmem:[%s1137_s1 + $0x190] sm:$0xff]  ;;  %v126_v57 = vld [vmem:[%s1137_s1 + $0x188] sm:$0xff] }
  0x13   :  { %611 = vmatpush3.msra.mxu1 %v117_v31  ;;  %532 = vmatprep.subr.mxu0 %v100_v32  ;;  %v80_v50 = vld [vmem:[%s1137_s1 + $0x18] sm:$0xff]  ;;  %v79_v54 = vld [vmem:[%s1137_s1 + $0x10] sm:$0xff]  ;;  %v78_v58 = vld [vmem:[%s1137_s1 + $0x8] sm:$0xff] }
  0x14   :  { %612 = vmatprep.subr.mxu1 %v132_v33  ;;  %533 = vmatpush3.msra.mxu0 %v84_v34  ;;  %v112_v51 = vld [vmem:[%s1137_s1 + $0x118] sm:$0xff]  ;;  %v111_v55 = vld [vmem:[%s1137_s1 + $0x110] sm:$0xff]  ;;  %v110_v59 = vld [vmem:[%s1137_s1 + $0x108] sm:$0xff] }
  0x15   :  { %613 = vmatpush3.msra.mxu1 %v116_v35  ;;  %534 = vmatprep.subr.mxu0 %v99_v36  ;;  %v93_v60 = vld [vmem:[%s1137_s1 + $0x80] sm:$0xff]  ;;  %v14_v63 = vld [vmem:[%s1138_s0 + $0x8] sm:$0xff]  ;;  %v16_v1 = vld [vmem:[%s1138_s0 + $0x18] sm:$0xff] }
  0x16   :  { %614 = vmatprep.subr.mxu1 %v131_v37  ;;  %535 = vmatpush3.msra.mxu0 %v83_v38  ;;  %v125_v61 = vld [vmem:[%s1137_s1 + $0x180] sm:$0xff]  ;;  %v15_v3 = vld [vmem:[%s1138_s0 + $0x10] sm:$0xff]  ;;  %v18_v4 = vld [vmem:[%s1138_s0 + $0x28] sm:$0xff] }
  0x17   :  { %615 = vmatpush3.msra.mxu1 %v115_v39  ;;  %536 = vmatprep.subr.mxu0 %v98_v40  ;;  %v77_v62 = vld [vmem:[%s1137_s1] sm:$0xff]  ;;  %v20_v5 = vld [vmem:[%s1138_s0 + $0x38] sm:$0xff]  ;;  %v19_v7 = vld [vmem:[%s1138_s0 + $0x30] sm:$0xff] }
  0x18   :  { %616 = vmatprep.subr.mxu1 %v130_v41  ;;  %537 = vmatpush3.msra.mxu0 %v82_v42  ;;  %v109_v0 = vld [vmem:[%s1137_s1 + $0x100] sm:$0xff]  ;;  %v22_v8 = vld [vmem:[%s1138_s0 + $0x48] sm:$0xff]  ;;  %v24_v9 = vld [vmem:[%s1138_s0 + $0x58] sm:$0xff] }
  0x19   :  { %617 = vmatpush3.msra.mxu1 %v114_v43  ;;  %538 = vmatprep.subr.mxu0 %v97_v44  ;;  %v13_v2 = vld [vmem:[%s1138_s0] sm:$0xff]  ;;  %v23_v11 = vld [vmem:[%s1138_s0 + $0x50] sm:$0xff]  ;;  %v26_v12 = vld [vmem:[%s1138_s0 + $0x68] sm:$0xff] }
  0x1a   :  { %618 = vmatprep.subr.mxu1 %v129_v45  ;;  %539 = vmatpush3.msra.mxu0 %v81_v46  ;;  %v17_v6 = vld [vmem:[%s1138_s0 + $0x20] sm:$0xff]  ;;  %v28_v13 = vld [vmem:[%s1138_s0 + $0x78] sm:$0xff]  ;;  %v27_v15 = vld [vmem:[%s1138_s0 + $0x70] sm:$0xff] }
  0x1b   :  { %619 = vmatpush3.msra.mxu1 %v113_v47  ;;  %540 = vmatprep.subr.mxu0 %v96_v48  ;;  %v21_v10 = vld [vmem:[%s1138_s0 + $0x40] sm:$0xff]  ;;  %v30_v16 = vld [vmem:[%s1138_s0 + $0x88] sm:$0xff]  ;;  %v32_v17 = vld [vmem:[%s1138_s0 + $0x98] sm:$0xff] }
  0x1c   :  { %620 = vmatprep.subr.mxu1 %v128_v49  ;;  %541 = vmatpush3.msra.mxu0 %v80_v50  ;;  %v25_v14 = vld [vmem:[%s1138_s0 + $0x60] sm:$0xff]  ;;  %v31_v19 = vld [vmem:[%s1138_s0 + $0x90] sm:$0xff]  ;;  %v34_v20 = vld [vmem:[%s1138_s0 + $0xa8] sm:$0xff] }
  0x1d   :  { %621 = vmatpush3.msra.mxu1 %v112_v51  ;;  %542 = vmatprep.subr.mxu0 %v95_v52  ;;  %v29_v18 = vld [vmem:[%s1138_s0 + $0x80] sm:$0xff]  ;;  %v36_v21 = vld [vmem:[%s1138_s0 + $0xb8] sm:$0xff]  ;;  %v35_v23 = vld [vmem:[%s1138_s0 + $0xb0] sm:$0xff] }
  0x1e   :  { %622 = vmatprep.subr.mxu1 %v127_v53  ;;  %543 = vmatpush3.msra.mxu0 %v79_v54  ;;  %v33_v22 = vld [vmem:[%s1138_s0 + $0xa0] sm:$0xff]  ;;  %v38_v24 = vld [vmem:[%s1138_s0 + $0xc8] sm:$0xff]  ;;  %v40_v25 = vld [vmem:[%s1138_s0 + $0xd8] sm:$0xff] }
  0x1f   :  { %623 = vmatpush3.msra.mxu1 %v111_v55  ;;  %544 = vmatprep.subr.mxu0 %v94_v56  ;;  %v37_v26 = vld [vmem:[%s1138_s0 + $0xc0] sm:$0xff]  ;;  %v39_v27 = vld [vmem:[%s1138_s0 + $0xd0] sm:$0xff]  ;;  %v42_v28 = vld [vmem:[%s1138_s0 + $0xe8] sm:$0xff] }
  0x20   :  { %624 = vmatprep.subr.mxu1 %v126_v57  ;;  %545 = vmatpush3.msra.mxu0 %v78_v58  ;;  %v44_v29 = vld [vmem:[%s1138_s0 + $0xf8] sm:$0xff]  ;;  %v41_v30 = vld [vmem:[%s1138_s0 + $0xe0] sm:$0xff]  ;;  %v43_v31 = vld [vmem:[%s1138_s0 + $0xf0] sm:$0xff] }
  0x21   :  { %625 = vmatpush3.msra.mxu1 %v110_v59  ;;  %546 = vmatprep.subr.mxu0 %v93_v60  ;;  %v46_v32 = vld [vmem:[%s1138_s0 + $0x108] sm:$0xff]  ;;  %v48_v33 = vld [vmem:[%s1138_s0 + $0x118] sm:$0xff]  ;;  %v45_v34 = vld [vmem:[%s1138_s0 + $0x100] sm:$0xff] }
  0x22   :  { %626 = vmatprep.subr.mxu1 %v125_v61  ;;  %547 = vmatpush3.msra.mxu0 %v77_v62  ;;  %v47_v35 = vld [vmem:[%s1138_s0 + $0x110] sm:$0xff]  ;;  %v50_v36 = vld [vmem:[%s1138_s0 + $0x128] sm:$0xff]  ;;  %v52_v37 = vld [vmem:[%s1138_s0 + $0x138] sm:$0xff] }
  0x23   :  { %205 = vmatprep.mubr.f32.mxu0 %v14_v63  ;;  %627 = vmatpush3.msra.mxu1 %v109_v0  ;;  %v49_v38 = vld [vmem:[%s1138_s0 + $0x120] sm:$0xff]  ;;  %v51_v39 = vld [vmem:[%s1138_s0 + $0x130] sm:$0xff]  ;;  %v54_v40 = vld [vmem:[%s1138_s0 + $0x148] sm:$0xff] }
  0x24   :  { %350 = vmatprep.mubr.f32.mxu1 %v16_v1  ;;  %206 = vmatmul.mubr.f32.vlgmr.msra.gmra.mxu0 %v13_v2  ;;  %v56_v41 = vld [vmem:[%s1138_s0 + $0x158] sm:$0xff]  ;;  %v53_v42 = vld [vmem:[%s1138_s0 + $0x140] sm:$0xff]  ;;  %v55_v43 = vld [vmem:[%s1138_s0 + $0x150] sm:$0xff] }
  0x25   :  { %351 = vmatmul.mubr.f32.vlgmr.msra.gmra.mxu1 %v15_v3  ;;  %210 = vmatprep.mubr.f32.mxu0 %v18_v4  ;;  %v58_v44 = vld [vmem:[%s1138_s0 + $0x168] sm:$0xff]  ;;  %v60_v45 = vld [vmem:[%s1138_s0 + $0x178] sm:$0xff]  ;;  %v57_v46 = vld [vmem:[%s1138_s0 + $0x160] sm:$0xff] }
  0x26   :  { %355 = vmatprep.mubr.f32.mxu1 %v20_v5  ;;  %v59_v47 = vld [vmem:[%s1138_s0 + $0x170] sm:$0xff]  ;;  %v62_v48 = vld [vmem:[%s1138_s0 + $0x188] sm:$0xff]  ;;  %v64_v49 = vld [vmem:[%s1138_s0 + $0x198] sm:$0xff] }
  0x27   :  { %v61_v50 = vld [vmem:[%s1138_s0 + $0x180] sm:$0xff]  ;;  %v63_v51 = vld [vmem:[%s1138_s0 + $0x190] sm:$0xff]  ;;  %v66_v52 = vld [vmem:[%s1138_s0 + $0x1a8] sm:$0xff] }
  0x28   :  { %211 = vmatmul.mubr.f32.gmra.mxu0 %v17_v6  ;;  %v68_v53 = vld [vmem:[%s1138_s0 + $0x1b8] sm:$0xff]  ;;  %v65_v54 = vld [vmem:[%s1138_s0 + $0x1a0] sm:$0xff]  ;;  %v67_v55 = vld [vmem:[%s1138_s0 + $0x1b0] sm:$0xff] }
  0x29   :  { %356 = vmatmul.mubr.f32.gmra.mxu1 %v19_v7  ;;  %215 = vmatprep.mubr.f32.mxu0 %v22_v8  ;;  %v70_v56 = vld [vmem:[%s1138_s0 + $0x1c8] sm:$0xff]  ;;  %v72_v57 = vld [vmem:[%s1138_s0 + $0x1d8] sm:$0xff]  ;;  %v69_v58 = vld [vmem:[%s1138_s0 + $0x1c0] sm:$0xff] }
  0x2a   :  { %360 = vmatprep.mubr.f32.mxu1 %v24_v9  ;;  %v71_v59 = vld [vmem:[%s1138_s0 + $0x1d0] sm:$0xff]  ;;  %v74_v60 = vld [vmem:[%s1138_s0 + $0x1e8] sm:$0xff]  ;;  %v76_v61 = vld [vmem:[%s1138_s0 + $0x1f8] sm:$0xff] }
  0x2b   :  { %v73_v62 = vld [vmem:[%s1138_s0 + $0x1e0] sm:$0xff]  ;;  %v75_v63 = vld [vmem:[%s1138_s0 + $0x1f0] sm:$0xff] }
  0x2c   :  { %216 = vmatmul.mubr.f32.gmra.mxu0 %v21_v10 }
  0x2d   :  { %361 = vmatmul.mubr.f32.gmra.mxu1 %v23_v11  ;;  %220 = vmatprep.mubr.f32.mxu0 %v26_v12 }
  0x2e   :  { %365 = vmatprep.mubr.f32.mxu1 %v28_v13 }
  0x30   :  { %221 = vmatmul.mubr.f32.gmra.mxu0 %v25_v14 }
  0x31   :  { %366 = vmatmul.mubr.f32.gmra.mxu1 %v27_v15  ;;  %225 = vmatprep.mubr.f32.mxu0 %v30_v16 }
  0x32   :  { %370 = vmatprep.mubr.f32.mxu1 %v32_v17 }
  0x34   :  { %226 = vmatmul.mubr.f32.gmra.mxu0 %v29_v18 }
  0x35   :  { %371 = vmatmul.mubr.f32.gmra.mxu1 %v31_v19  ;;  %230 = vmatprep.mubr.f32.mxu0 %v34_v20 }
  0x36   :  { %375 = vmatprep.mubr.f32.mxu1 %v36_v21 }
  0x38   :  { %231 = vmatmul.mubr.f32.gmra.mxu0 %v33_v22 }
  0x39   :  { %376 = vmatmul.mubr.f32.gmra.mxu1 %v35_v23  ;;  %235 = vmatprep.mubr.f32.mxu0 %v38_v24 }
  0x3a   :  { %380 = vmatprep.mubr.f32.mxu1 %v40_v25 }
  0x3c   :  { %236 = vmatmul.mubr.f32.gmra.mxu0 %v37_v26 }
  0x3d   :  { %381 = vmatmul.mubr.f32.gmra.mxu1 %v39_v27  ;;  %240 = vmatprep.mubr.f32.mxu0 %v42_v28 }
  0x3e   :  { %385 = vmatprep.mubr.f32.mxu1 %v44_v29 }
  0x40   :  { %241 = vmatmul.mubr.f32.gmra.mxu0 %v41_v30 }
  0x41   :  { %386 = vmatmul.mubr.f32.gmra.mxu1 %v43_v31  ;;  %245 = vmatprep.mubr.f32.mxu0 %v46_v32 }
  0x42   :  { %390 = vmatprep.mubr.f32.mxu1 %v48_v33 }
  0x44   :  { %246 = vmatmul.mubr.f32.gmra.mxu0 %v45_v34 }
  0x45   :  { %391 = vmatmul.mubr.f32.gmra.mxu1 %v47_v35  ;;  %250 = vmatprep.mubr.f32.mxu0 %v50_v36 }
  0x46   :  { %395 = vmatprep.mubr.f32.mxu1 %v52_v37 }
  0x48   :  { %251 = vmatmul.mubr.f32.gmra.mxu0 %v49_v38 }
  0x49   :  { %396 = vmatmul.mubr.f32.gmra.mxu1 %v51_v39  ;;  %255 = vmatprep.mubr.f32.mxu0 %v54_v40 }
  0x4a   :  { %400 = vmatprep.mubr.f32.mxu1 %v56_v41 }
  0x4c   :  { %256 = vmatmul.mubr.f32.gmra.mxu0 %v53_v42 }
  0x4d   :  { %401 = vmatmul.mubr.f32.gmra.mxu1 %v55_v43  ;;  %260 = vmatprep.mubr.f32.mxu0 %v58_v44 }
  0x4e   :  { %405 = vmatprep.mubr.f32.mxu1 %v60_v45 }
  0x50   :  { %261 = vmatmul.mubr.f32.gmra.mxu0 %v57_v46 }
  0x51   :  { %406 = vmatmul.mubr.f32.gmra.mxu1 %v59_v47  ;;  %265 = vmatprep.mubr.f32.mxu0 %v62_v48 }
  0x52   :  { %410 = vmatprep.mubr.f32.mxu1 %v64_v49 }
  0x54   :  { %266 = vmatmul.mubr.f32.gmra.mxu0 %v61_v50 }
  0x55   :  { %411 = vmatmul.mubr.f32.gmra.mxu1 %v63_v51  ;;  %270 = vmatprep.mubr.f32.mxu0 %v66_v52 }
  0x56   :  { %415 = vmatprep.mubr.f32.mxu1 %v68_v53 }
  0x58   :  { %271 = vmatmul.mubr.f32.gmra.mxu0 %v65_v54 }
  0x59   :  { %416 = vmatmul.mubr.f32.gmra.mxu1 %v67_v55  ;;  %275 = vmatprep.mubr.f32.mxu0 %v70_v56 }
  0x5a   :  { %420 = vmatprep.mubr.f32.mxu1 %v72_v57 }
  0x5c   :  { %276 = vmatmul.mubr.f32.gmra.mxu0 %v69_v58 }
  0x5d   :  { %421 = vmatmul.mubr.f32.gmra.mxu1 %v71_v59  ;;  %280 = vmatprep.mubr.f32.mxu0 %v74_v60 }
  0x5e   :  { %425 = vmatprep.mubr.f32.mxu1 %v76_v61 }
  0x60   :  { %281 = vmatmul.mubr.f32.gmra.mxu0 %v73_v62 }
  0x61   :  { %426 = vmatmul.mubr.f32.gmra.mxu1 %v75_v63 }
  0xe4   :  { %v548_v0 = vpop.f32.mrf.mxu0 }
  0xe5   :  { %v628_v1 = vpop.f32.mrf.mxu1 }
  0xe6   :  { %v549_v2 = vpop.f32.mrf.mxu0 }
  0xe7   :  { %v629_v3 = vpop.f32.mrf.mxu1  ;;  %v550_v4 = vadd.f32 %v549_v2, %v548_v0 }
  0xe8   :  { %v630_v5 = vadd.f32 %v629_v3, %v628_v1  ;;  %v551_v6 = vpop.f32.mrf.mxu0 }
  0xe9   :  { %v631_v7 = vpop.f32.mrf.mxu1 }
  0xea   :  { %v1080_v8 = vadd.f32 %v630_v5, %v550_v4  ;;  %v552_v9 = vpop.f32.mrf.mxu0 }
  0xeb   :  { %v632_v10 = vpop.f32.mrf.mxu1  ;;  %v553_v11 = vadd.f32 %v552_v9, %v551_v6 }
  0xec   :  { %431 = vst [vmem:[%s1139_s2] sm:$0xff] %v1080_v8  ;;  %v633_v12 = vadd.f32 %v632_v10, %v631_v7  ;;  %v554_v13 = vpop.f32.mrf.mxu0  ;;  %v468_v2 = vmul.f32 %v1080_v8, %v1080_v8 }
  0xed   :  { %v634_v14 = vpop.f32.mrf.mxu1 }
  0xee   :  { %v358_v15 = vadd.f32 %v633_v12, %v553_v11  ;;  %v555_v16 = vpop.f32.mrf.mxu0 }
  0xef   :  { %v635_v17 = vpop.f32.mrf.mxu1  ;;  %v556_v18 = vadd.f32 %v555_v16, %v554_v13 }
  0xf0   :  { %432 = vst [vmem:[%s1139_s2 + $0x8] sm:$0xff] %v358_v15  ;;  %v636_v19 = vadd.f32 %v635_v17, %v634_v14  ;;  %v557_v20 = vpop.f32.mrf.mxu0  ;;  %v469_v62 = vmul.f32 %v358_v15, %v358_v15  ;;  %v447_v6 = vadd.f32 %v358_v15, %v1080_v8 }
  0xf1   :  { %v637_v21 = vpop.f32.mrf.mxu1 }
  0xf2   :  { %v363_v22 = vadd.f32 %v636_v19, %v556_v18  ;;  %v558_v23 = vpop.f32.mrf.mxu0  ;;  %v484_v10 = vadd.f32 %v469_v62, %v468_v2 }
  0xf3   :  { %v638_v24 = vpop.f32.mrf.mxu1  ;;  %v559_v25 = vadd.f32 %v558_v23, %v557_v20 }
  0xf4   :  { %433 = vst [vmem:[%s1139_s2 + $0x10] sm:$0xff] %v363_v22  ;;  %v639_v26 = vadd.f32 %v638_v24, %v637_v21  ;;  %v560_v27 = vpop.f32.mrf.mxu0  ;;  %v470_v3 = vmul.f32 %v363_v22, %v363_v22  ;;  %v448_v14 = vadd.f32 %v447_v6, %v363_v22 }
  0xf5   :  { %v640_v28 = vpop.f32.mrf.mxu1 }
  0xf6   :  { %v368_v29 = vadd.f32 %v639_v26, %v559_v25  ;;  %v561_v30 = vpop.f32.mrf.mxu0  ;;  %v485_v17 = vadd.f32 %v484_v10, %v470_v3 }
  0xf7   :  { %v641_v31 = vpop.f32.mrf.mxu1  ;;  %v562_v32 = vadd.f32 %v561_v30, %v560_v27 }
  0xf8   :  { %434 = vst [vmem:[%s1139_s2 + $0x18] sm:$0xff] %v368_v29  ;;  %v642_v33 = vadd.f32 %v641_v31, %v640_v28  ;;  %v563_v34 = vpop.f32.mrf.mxu0  ;;  %v471_v11 = vmul.f32 %v368_v29, %v368_v29  ;;  %v449_v21 = vadd.f32 %v448_v14, %v368_v29 }
  0xf9   :  { %v643_v35 = vpop.f32.mrf.mxu1 }
  0xfa   :  { %v373_v36 = vadd.f32 %v642_v33, %v562_v32  ;;  %v564_v37 = vpop.f32.mrf.mxu0  ;;  %v486_v23 = vadd.f32 %v485_v17, %v471_v11 }
  0xfb   :  { %v644_v38 = vpop.f32.mrf.mxu1  ;;  %v565_v39 = vadd.f32 %v564_v37, %v563_v34 }
  0xfc   :  { %435 = vst [vmem:[%s1139_s2 + $0x20] sm:$0xff] %v373_v36  ;;  %v645_v40 = vadd.f32 %v644_v38, %v643_v35  ;;  %v566_v41 = vpop.f32.mrf.mxu0  ;;  %v472_v18 = vmul.f32 %v373_v36, %v373_v36  ;;  %v450_v27 = vadd.f32 %v449_v21, %v373_v36 }
  0xfd   :  { %v646_v42 = vpop.f32.mrf.mxu1 }
  0xfe   :  { %v378_v43 = vadd.f32 %v645_v40, %v565_v39  ;;  %v567_v44 = vpop.f32.mrf.mxu0  ;;  %v487_v30 = vadd.f32 %v486_v23, %v472_v18 }
  0xff   :  { %v647_v45 = vpop.f32.mrf.mxu1  ;;  %v568_v46 = vadd.f32 %v567_v44, %v566_v41 }
 0x100   :  { %436 = vst [vmem:[%s1139_s2 + $0x28] sm:$0xff] %v378_v43  ;;  %v648_v47 = vadd.f32 %v647_v45, %v646_v42  ;;  %v569_v48 = vpop.f32.mrf.mxu0  ;;  %v473_v24 = vmul.f32 %v378_v43, %v378_v43  ;;  %v451_v33 = vadd.f32 %v450_v27, %v378_v43 }
 0x101   :  { %v649_v49 = vpop.f32.mrf.mxu1 }
 0x102   :  { %v383_v50 = vadd.f32 %v648_v47, %v568_v46  ;;  %v570_v51 = vpop.f32.mrf.mxu0  ;;  %v488_v35 = vadd.f32 %v487_v30, %v473_v24 }
 0x103   :  { %v650_v52 = vpop.f32.mrf.mxu1  ;;  %v571_v53 = vadd.f32 %v570_v51, %v569_v48 }
 0x104   :  { %437 = vst [vmem:[%s1139_s2 + $0x30] sm:$0xff] %v383_v50  ;;  %v651_v54 = vadd.f32 %v650_v52, %v649_v49  ;;  %v572_v55 = vpop.f32.mrf.mxu0  ;;  %v474_v22 = vmul.f32 %v383_v50, %v383_v50  ;;  %v452_v40 = vadd.f32 %v451_v33, %v383_v50 }
 0x105   :  { %v652_v56 = vpop.f32.mrf.mxu1 }
 0x106   :  { %v388_v57 = vadd.f32 %v651_v54, %v571_v53  ;;  %v573_v58 = vpop.f32.mrf.mxu0  ;;  %v489_v42 = vadd.f32 %v488_v35, %v474_v22 }
 0x107   :  { %v653_v59 = vpop.f32.mrf.mxu1  ;;  %v574_v60 = vadd.f32 %v573_v58, %v572_v55 }
 0x108   :  { %438 = vst [vmem:[%s1139_s2 + $0x38] sm:$0xff] %v388_v57  ;;  %v654_v61 = vadd.f32 %v653_v59, %v652_v56  ;;  %v575_v63 = vpop.f32.mrf.mxu0  ;;  %v475_v37 = vmul.f32 %v388_v57, %v388_v57  ;;  %v453_v46 = vadd.f32 %v452_v40, %v388_v57 }
 0x109   :  { %v655_v0 = vpop.f32.mrf.mxu1 }
 0x10a   :  { %v393_v1 = vadd.f32 %v654_v61, %v574_v60  ;;  %v576_v4 = vpop.f32.mrf.mxu0  ;;  %v490_v48 = vadd.f32 %v489_v42, %v475_v37 }
 0x10b   :  { %v656_v5 = vpop.f32.mrf.mxu1  ;;  %v577_v7 = vadd.f32 %v576_v4, %v575_v63 }
 0x10c   :  { %439 = vst [vmem:[%s1139_s2 + $0x40] sm:$0xff] %v393_v1  ;;  %v657_v9 = vadd.f32 %v656_v5, %v655_v0  ;;  %v578_v12 = vpop.f32.mrf.mxu0  ;;  %v476_v36 = vmul.f32 %v393_v1, %v393_v1  ;;  %v454_v53 = vadd.f32 %v453_v46, %v393_v1 }
 0x10d   :  { %v658_v13 = vpop.f32.mrf.mxu1 }
 0x10e   :  { %v398_v16 = vadd.f32 %v657_v9, %v577_v7  ;;  %v579_v19 = vpop.f32.mrf.mxu0  ;;  %v491_v55 = vadd.f32 %v490_v48, %v476_v36 }
 0x10f   :  { %v659_v20 = vpop.f32.mrf.mxu1  ;;  %v580_v8 = vadd.f32 %v579_v19, %v578_v12 }
 0x110   :  { %440 = vst [vmem:[%s1139_s2 + $0x48] sm:$0xff] %v398_v16  ;;  %v660_v15 = vadd.f32 %v659_v20, %v658_v13  ;;  %v581_v25 = vpop.f32.mrf.mxu0  ;;  %v477_v49 = vmul.f32 %v398_v16, %v398_v16  ;;  %v455_v59 = vadd.f32 %v454_v53, %v398_v16 }
 0x111   :  { %v661_v26 = vpop.f32.mrf.mxu1 }
 0x112   :  { %v403_v28 = vadd.f32 %v660_v15, %v580_v8  ;;  %v582_v31 = vpop.f32.mrf.mxu0  ;;  %v492_v61 = vadd.f32 %v491_v55, %v477_v49 }
 0x113   :  { %v662_v32 = vpop.f32.mrf.mxu1  ;;  %v583_v29 = vadd.f32 %v582_v31, %v581_v25 }
 0x114   :  { %441 = vst [vmem:[%s1139_s2 + $0x50] sm:$0xff] %v403_v28  ;;  %v663_v34 = vadd.f32 %v662_v32, %v661_v26  ;;  %v584_v38 = vpop.f32.mrf.mxu0  ;;  %v478_v50 = vmul.f32 %v403_v28, %v403_v28  ;;  %v456_v2 = vadd.f32 %v455_v59, %v403_v28 }
 0x115   :  { %v664_v39 = vpop.f32.mrf.mxu1 }
 0x116   :  { %v408_v41 = vadd.f32 %v663_v34, %v583_v29  ;;  %v585_v44 = vpop.f32.mrf.mxu0  ;;  %v493_v4 = vadd.f32 %v492_v61, %v478_v50 }
 0x117   :  { %v665_v45 = vpop.f32.mrf.mxu1  ;;  %v586_v43 = vadd.f32 %v585_v44, %v584_v38 }
 0x118   :  { %442 = vst [vmem:[%s1139_s2 + $0x58] sm:$0xff] %v408_v41  ;;  %v666_v47 = vadd.f32 %v665_v45, %v664_v39  ;;  %v587_v51 = vpop.f32.mrf.mxu0  ;;  %v479_v62 = vmul.f32 %v408_v41, %v408_v41  ;;  %v457_v7 = vadd.f32 %v456_v2, %v408_v41 }
 0x119   :  { %v667_v52 = vpop.f32.mrf.mxu1 }
 0x11a   :  { %v413_v54 = vadd.f32 %v666_v47, %v586_v43  ;;  %v588_v56 = vpop.f32.mrf.mxu0  ;;  %v494_v11 = vadd.f32 %v493_v4, %v479_v62 }
 0x11b   :  { %v668_v58 = vpop.f32.mrf.mxu1  ;;  %v589_v57 = vadd.f32 %v588_v56, %v587_v51 }
 0x11c   :  { %443 = vst [vmem:[%s1139_s2 + $0x60] sm:$0xff] %v413_v54  ;;  %v669_v60 = vadd.f32 %v668_v58, %v667_v52  ;;  %v590_v63 = vpop.f32.mrf.mxu0  ;;  %v480_v1 = vmul.f32 %v413_v54, %v413_v54  ;;  %v458_v14 = vadd.f32 %v457_v7, %v413_v54 }
 0x11d   :  { %v670_v0 = vpop.f32.mrf.mxu1 }
 0x11e   :  { %v418_v3 = vadd.f32 %v669_v60, %v589_v57  ;;  %v591_v5 = vpop.f32.mrf.mxu0  ;;  %v495_v18 = vadd.f32 %v494_v11, %v480_v1 }
 0x11f   :  { %v671_v6 = vpop.f32.mrf.mxu1  ;;  %v592_v9 = vadd.f32 %v591_v5, %v590_v63 }
 0x120   :  { %444 = vst [vmem:[%s1139_s2 + $0x68] sm:$0xff] %v418_v3  ;;  %v672_v10 = vadd.f32 %v671_v6, %v670_v0  ;;  %v593_v12 = vpop.f32.mrf.mxu0  ;;  %v481_v16 = vmul.f32 %v418_v3, %v418_v3  ;;  %v459_v21 = vadd.f32 %v458_v14, %v418_v3 }
 0x121   :  { %v673_v13 = vpop.f32.mrf.mxu1 }
 0x122   :  { %v423_v17 = vadd.f32 %v672_v10, %v592_v9  ;;  %v594_v19 = vpop.f32.mrf.mxu0  ;;  %v496_v24 = vadd.f32 %v495_v18, %v481_v16 }
 0x123   :  { %v674_v20 = vpop.f32.mrf.mxu1  ;;  %v595_v15 = vadd.f32 %v594_v19, %v593_v12 }
 0x124   :  { %445 = vst [vmem:[%s1139_s2 + $0x70] sm:$0xff] %v423_v17  ;;  %v482_v8 = vmul.f32 %v423_v17, %v423_v17  ;;  %v675_v23 = vadd.f32 %v674_v20, %v673_v13  ;;  %v460_v25 = vadd.f32 %v459_v21, %v423_v17 }
 0x126   :  { %v428_v26 = vadd.f32 %v675_v23, %v595_v15  ;;  %v497_v27 = vadd.f32 %v496_v24, %v482_v8 }
 0x128   :  { %446 = vst [vmem:[%s1139_s2 + $0x78] sm:$0xff] %v428_v26  ;;  %v461_v28 = vadd.f32 %v460_v25, %v428_v26  ;;  %v483_v30 = vmul.f32 %v428_v26, %v428_v26 }
 0x12a   :  { %v462_v22 = vrot.slane %v461_v28, 4  ;;  %v498_v31 = vadd.f32 %v497_v27, %v483_v30 }
 0x12c   :  { %v463_v32 = vadd.f32 %v462_v22, %v461_v28  ;;  %v499_v33 = vrot.slane %v498_v31, 4 }
 0x12e   :  { %v464_v29 = vrot.slane %v463_v32, 2  ;;  %v500_v34 = vadd.f32 %v499_v33, %v498_v31 }
 0x130   :  { %v465_v35 = vadd.f32 %v464_v29, %v463_v32  ;;  %v501_v37 = vrot.slane %v500_v34, 2 }
 0x132   :  { %v466_v38 = vrot.slane %v465_v35, 1  ;;  %v502_v39 = vadd.f32 %v501_v37, %v500_v34 }
 0x134   :  { %v503_v40 = vrot.slane %v502_v39, 1  ;;  %v467_v41 = vadd.f32 %v466_v38, %v465_v35 }
 0x136   :  { %v504_v42 = vadd.f32 %v503_v40, %v502_v39 }
 0x138   :  { %v506_v36 = vsel %vm505_vm0, %v467_v41, %v504_v42 }
 0x139   :  { %507 = vst [vmem:[%s1140_s3] sm:$0x3] %v506_v36 }

// kernel: discriminator_forward.8
= control target key start
LH: loop header
LB: loop body
LE: loop exit
PB: predicated region body
PF: predicated region fallthrough
CT: control target
= control target key end

     0   :  { %vm539_vm0 = vcmask 1040384   ;;  %s1241_s1 = inlined_call_operand.vmem [shape: f32[1024,128], index: 1, kind: input, shape index: {}]   ;;  %s1242_s0 = inlined_call_operand.vmem [shape: f32[32,1024], index: 0, kind: input, shape index: {}]   ;;  %s1243_s2 = inlined_call_operand.vmem [shape: f32[32,128], index: 2, kind: output, shape index: {0}]   ;;  %s1244_s3 = inlined_call_operand.vmem [shape: f32[1,2,128], index: 3, kind: output, shape index: {1}]  }
   0x1   :  { %v76_v0 = vld [vmem:[%s1241_s1 + $0xf8] sm:$0xff]  ;;  %v75_v4 = vld [vmem:[%s1241_s1 + $0xf0] sm:$0xff]  ;;  %v74_v8 = vld [vmem:[%s1241_s1 + $0xe8] sm:$0xff] }
   0x2   :  { %v108_v1 = vld [vmem:[%s1241_s1 + $0x1f8] sm:$0xff]  ;;  %550 = vmatprep.subr.mxu0 %v76_v0  ;;  %v107_v5 = vld [vmem:[%s1241_s1 + $0x1f0] sm:$0xff]  ;;  %v106_v9 = vld [vmem:[%s1241_s1 + $0x1e8] sm:$0xff] }
   0x3   :  { %v60_v2 = vld [vmem:[%s1241_s1 + $0x78] sm:$0xff]  ;;  %594 = vmatprep.subr.mxu1 %v108_v1  ;;  %v59_v6 = vld [vmem:[%s1241_s1 + $0x70] sm:$0xff]  ;;  %v58_v10 = vld [vmem:[%s1241_s1 + $0x68] sm:$0xff] }
   0x4   :  { %v92_v3 = vld [vmem:[%s1241_s1 + $0x178] sm:$0xff]  ;;  %551 = vmatpush3.msra.mxu0 %v60_v2  ;;  %v91_v7 = vld [vmem:[%s1241_s1 + $0x170] sm:$0xff]  ;;  %v90_v11 = vld [vmem:[%s1241_s1 + $0x168] sm:$0xff] }
   0x5   :  { %595 = vmatpush3.msra.mxu1 %v92_v3  ;;  %552 = vmatprep.subr.mxu0 %v75_v4  ;;  %v73_v12 = vld [vmem:[%s1241_s1 + $0xe0] sm:$0xff]  ;;  %v72_v16 = vld [vmem:[%s1241_s1 + $0xd8] sm:$0xff]  ;;  %v71_v20 = vld [vmem:[%s1241_s1 + $0xd0] sm:$0xff] }
   0x6   :  { %596 = vmatprep.subr.mxu1 %v107_v5  ;;  %553 = vmatpush3.msra.mxu0 %v59_v6  ;;  %v105_v13 = vld [vmem:[%s1241_s1 + $0x1e0] sm:$0xff]  ;;  %v104_v17 = vld [vmem:[%s1241_s1 + $0x1d8] sm:$0xff]  ;;  %v103_v21 = vld [vmem:[%s1241_s1 + $0x1d0] sm:$0xff] }
   0x7   :  { %597 = vmatpush3.msra.mxu1 %v91_v7  ;;  %554 = vmatprep.subr.mxu0 %v74_v8  ;;  %v57_v14 = vld [vmem:[%s1241_s1 + $0x60] sm:$0xff]  ;;  %v56_v18 = vld [vmem:[%s1241_s1 + $0x58] sm:$0xff]  ;;  %v55_v22 = vld [vmem:[%s1241_s1 + $0x50] sm:$0xff] }
   0x8   :  { %598 = vmatprep.subr.mxu1 %v106_v9  ;;  %v89_v15 = vld [vmem:[%s1241_s1 + $0x160] sm:$0xff]  ;;  %555 = vmatpush3.msra.mxu0 %v58_v10  ;;  %v88_v19 = vld [vmem:[%s1241_s1 + $0x158] sm:$0xff]  ;;  %v87_v23 = vld [vmem:[%s1241_s1 + $0x150] sm:$0xff] }
   0x9   :  { %599 = vmatpush3.msra.mxu1 %v90_v11  ;;  %556 = vmatprep.subr.mxu0 %v73_v12  ;;  %v70_v24 = vld [vmem:[%s1241_s1 + $0xc8] sm:$0xff]  ;;  %v69_v28 = vld [vmem:[%s1241_s1 + $0xc0] sm:$0xff]  ;;  %v68_v32 = vld [vmem:[%s1241_s1 + $0xb8] sm:$0xff] }
   0xa   :  { %600 = vmatprep.subr.mxu1 %v105_v13  ;;  %557 = vmatpush3.msra.mxu0 %v57_v14  ;;  %v102_v25 = vld [vmem:[%s1241_s1 + $0x1c8] sm:$0xff]  ;;  %v101_v29 = vld [vmem:[%s1241_s1 + $0x1c0] sm:$0xff]  ;;  %v100_v33 = vld [vmem:[%s1241_s1 + $0x1b8] sm:$0xff] }
   0xb   :  { %601 = vmatpush3.msra.mxu1 %v89_v15  ;;  %558 = vmatprep.subr.mxu0 %v72_v16  ;;  %v54_v26 = vld [vmem:[%s1241_s1 + $0x48] sm:$0xff]  ;;  %v53_v30 = vld [vmem:[%s1241_s1 + $0x40] sm:$0xff]  ;;  %v52_v34 = vld [vmem:[%s1241_s1 + $0x38] sm:$0xff] }
   0xc   :  { %602 = vmatprep.subr.mxu1 %v104_v17  ;;  %559 = vmatpush3.msra.mxu0 %v56_v18  ;;  %v86_v27 = vld [vmem:[%s1241_s1 + $0x148] sm:$0xff]  ;;  %v85_v31 = vld [vmem:[%s1241_s1 + $0x140] sm:$0xff]  ;;  %v84_v35 = vld [vmem:[%s1241_s1 + $0x138] sm:$0xff] }
   0xd   :  { %603 = vmatpush3.msra.mxu1 %v88_v19  ;;  %560 = vmatprep.subr.mxu0 %v71_v20  ;;  %v67_v36 = vld [vmem:[%s1241_s1 + $0xb0] sm:$0xff]  ;;  %v66_v40 = vld [vmem:[%s1241_s1 + $0xa8] sm:$0xff]  ;;  %v65_v44 = vld [vmem:[%s1241_s1 + $0xa0] sm:$0xff] }
   0xe   :  { %604 = vmatprep.subr.mxu1 %v103_v21  ;;  %561 = vmatpush3.msra.mxu0 %v55_v22  ;;  %v99_v37 = vld [vmem:[%s1241_s1 + $0x1b0] sm:$0xff]  ;;  %v98_v41 = vld [vmem:[%s1241_s1 + $0x1a8] sm:$0xff]  ;;  %v97_v45 = vld [vmem:[%s1241_s1 + $0x1a0] sm:$0xff] }
   0xf   :  { %605 = vmatpush3.msra.mxu1 %v87_v23  ;;  %562 = vmatprep.subr.mxu0 %v70_v24  ;;  %v51_v38 = vld [vmem:[%s1241_s1 + $0x30] sm:$0xff]  ;;  %v50_v42 = vld [vmem:[%s1241_s1 + $0x28] sm:$0xff]  ;;  %v49_v46 = vld [vmem:[%s1241_s1 + $0x20] sm:$0xff] }
  0x10   :  { %606 = vmatprep.subr.mxu1 %v102_v25  ;;  %563 = vmatpush3.msra.mxu0 %v54_v26  ;;  %v83_v39 = vld [vmem:[%s1241_s1 + $0x130] sm:$0xff]  ;;  %v82_v43 = vld [vmem:[%s1241_s1 + $0x128] sm:$0xff]  ;;  %v81_v47 = vld [vmem:[%s1241_s1 + $0x120] sm:$0xff] }
  0x11   :  { %607 = vmatpush3.msra.mxu1 %v86_v27  ;;  %564 = vmatprep.subr.mxu0 %v69_v28  ;;  %v64_v48 = vld [vmem:[%s1241_s1 + $0x98] sm:$0xff]  ;;  %v63_v52 = vld [vmem:[%s1241_s1 + $0x90] sm:$0xff]  ;;  %v62_v56 = vld [vmem:[%s1241_s1 + $0x88] sm:$0xff] }
  0x12   :  { %608 = vmatprep.subr.mxu1 %v101_v29  ;;  %565 = vmatpush3.msra.mxu0 %v53_v30  ;;  %v96_v49 = vld [vmem:[%s1241_s1 + $0x198] sm:$0xff]  ;;  %v95_v53 = vld [vmem:[%s1241_s1 + $0x190] sm:$0xff]  ;;  %v94_v57 = vld [vmem:[%s1241_s1 + $0x188] sm:$0xff] }
  0x13   :  { %609 = vmatpush3.msra.mxu1 %v85_v31  ;;  %566 = vmatprep.subr.mxu0 %v68_v32  ;;  %v48_v50 = vld [vmem:[%s1241_s1 + $0x18] sm:$0xff]  ;;  %v47_v54 = vld [vmem:[%s1241_s1 + $0x10] sm:$0xff]  ;;  %v46_v58 = vld [vmem:[%s1241_s1 + $0x8] sm:$0xff] }
  0x14   :  { %610 = vmatprep.subr.mxu1 %v100_v33  ;;  %567 = vmatpush3.msra.mxu0 %v52_v34  ;;  %v80_v51 = vld [vmem:[%s1241_s1 + $0x118] sm:$0xff]  ;;  %v79_v55 = vld [vmem:[%s1241_s1 + $0x110] sm:$0xff]  ;;  %v78_v59 = vld [vmem:[%s1241_s1 + $0x108] sm:$0xff] }
  0x15   :  { %611 = vmatpush3.msra.mxu1 %v84_v35  ;;  %568 = vmatprep.subr.mxu0 %v67_v36  ;;  %v61_v60 = vld [vmem:[%s1241_s1 + $0x80] sm:$0xff]  ;;  %v14_v63 = vld [vmem:[%s1242_s0 + $0x8] sm:$0xff]  ;;  %v16_v1 = vld [vmem:[%s1242_s0 + $0x18] sm:$0xff] }
  0x16   :  { %612 = vmatprep.subr.mxu1 %v99_v37  ;;  %569 = vmatpush3.msra.mxu0 %v51_v38  ;;  %v93_v61 = vld [vmem:[%s1241_s1 + $0x180] sm:$0xff]  ;;  %v15_v3 = vld [vmem:[%s1242_s0 + $0x10] sm:$0xff]  ;;  %v140_v4 = vld [vmem:[%s1241_s1 + $0x2f8] sm:$0xff] }
  0x17   :  { %613 = vmatpush3.msra.mxu1 %v83_v39  ;;  %570 = vmatprep.subr.mxu0 %v66_v40  ;;  %v45_v62 = vld [vmem:[%s1241_s1] sm:$0xff]  ;;  %v172_v5 = vld [vmem:[%s1241_s1 + $0x3f8] sm:$0xff]  ;;  %v139_v8 = vld [vmem:[%s1241_s1 + $0x2f0] sm:$0xff] }
  0x18   :  { %614 = vmatprep.subr.mxu1 %v98_v41  ;;  %571 = vmatpush3.msra.mxu0 %v50_v42  ;;  %v77_v0 = vld [vmem:[%s1241_s1 + $0x100] sm:$0xff]  ;;  %v124_v6 = vld [vmem:[%s1241_s1 + $0x278] sm:$0xff]  ;;  %v171_v9 = vld [vmem:[%s1241_s1 + $0x3f0] sm:$0xff] }
  0x19   :  { %615 = vmatpush3.msra.mxu1 %v82_v43  ;;  %572 = vmatprep.subr.mxu0 %v65_v44  ;;  %v13_v2 = vld [vmem:[%s1242_s0] sm:$0xff]  ;;  %v156_v7 = vld [vmem:[%s1241_s1 + $0x378] sm:$0xff]  ;;  %v123_v10 = vld [vmem:[%s1241_s1 + $0x270] sm:$0xff] }
  0x1a   :  { %616 = vmatprep.subr.mxu1 %v97_v45  ;;  %573 = vmatpush3.msra.mxu0 %v49_v46  ;;  %v155_v11 = vld [vmem:[%s1241_s1 + $0x370] sm:$0xff]  ;;  %v138_v12 = vld [vmem:[%s1241_s1 + $0x2e8] sm:$0xff]  ;;  %v137_v16 = vld [vmem:[%s1241_s1 + $0x2e0] sm:$0xff] }
  0x1b   :  { %617 = vmatpush3.msra.mxu1 %v81_v47  ;;  %574 = vmatprep.subr.mxu0 %v64_v48  ;;  %v170_v13 = vld [vmem:[%s1241_s1 + $0x3e8] sm:$0xff]  ;;  %v169_v17 = vld [vmem:[%s1241_s1 + $0x3e0] sm:$0xff]  ;;  %v136_v20 = vld [vmem:[%s1241_s1 + $0x2d8] sm:$0xff] }
  0x1c   :  { %618 = vmatprep.subr.mxu1 %v96_v49  ;;  %575 = vmatpush3.msra.mxu0 %v48_v50  ;;  %v122_v14 = vld [vmem:[%s1241_s1 + $0x268] sm:$0xff]  ;;  %v121_v18 = vld [vmem:[%s1241_s1 + $0x260] sm:$0xff]  ;;  %v168_v21 = vld [vmem:[%s1241_s1 + $0x3d8] sm:$0xff] }
  0x1d   :  { %619 = vmatpush3.msra.mxu1 %v80_v51  ;;  %576 = vmatprep.subr.mxu0 %v63_v52  ;;  %v154_v15 = vld [vmem:[%s1241_s1 + $0x368] sm:$0xff]  ;;  %v153_v19 = vld [vmem:[%s1241_s1 + $0x360] sm:$0xff]  ;;  %v120_v22 = vld [vmem:[%s1241_s1 + $0x258] sm:$0xff] }
  0x1e   :  { %620 = vmatprep.subr.mxu1 %v95_v53  ;;  %577 = vmatpush3.msra.mxu0 %v47_v54  ;;  %v152_v23 = vld [vmem:[%s1241_s1 + $0x358] sm:$0xff]  ;;  %v135_v24 = vld [vmem:[%s1241_s1 + $0x2d0] sm:$0xff]  ;;  %v134_v28 = vld [vmem:[%s1241_s1 + $0x2c8] sm:$0xff] }
  0x1f   :  { %621 = vmatpush3.msra.mxu1 %v79_v55  ;;  %578 = vmatprep.subr.mxu0 %v62_v56  ;;  %v167_v25 = vld [vmem:[%s1241_s1 + $0x3d0] sm:$0xff]  ;;  %v166_v29 = vld [vmem:[%s1241_s1 + $0x3c8] sm:$0xff]  ;;  %v133_v32 = vld [vmem:[%s1241_s1 + $0x2c0] sm:$0xff] }
  0x20   :  { %622 = vmatprep.subr.mxu1 %v94_v57  ;;  %579 = vmatpush3.msra.mxu0 %v46_v58  ;;  %v119_v26 = vld [vmem:[%s1241_s1 + $0x250] sm:$0xff]  ;;  %v118_v30 = vld [vmem:[%s1241_s1 + $0x248] sm:$0xff]  ;;  %v165_v33 = vld [vmem:[%s1241_s1 + $0x3c0] sm:$0xff] }
  0x21   :  { %623 = vmatpush3.msra.mxu1 %v78_v59  ;;  %580 = vmatprep.subr.mxu0 %v61_v60  ;;  %v151_v27 = vld [vmem:[%s1241_s1 + $0x350] sm:$0xff]  ;;  %v150_v31 = vld [vmem:[%s1241_s1 + $0x348] sm:$0xff]  ;;  %v117_v34 = vld [vmem:[%s1241_s1 + $0x240] sm:$0xff] }
  0x22   :  { %624 = vmatprep.subr.mxu1 %v93_v61  ;;  %581 = vmatpush3.msra.mxu0 %v45_v62  ;;  %v149_v35 = vld [vmem:[%s1241_s1 + $0x340] sm:$0xff]  ;;  %v132_v36 = vld [vmem:[%s1241_s1 + $0x2b8] sm:$0xff]  ;;  %v22_v38 = vld [vmem:[%s1242_s0 + $0x48] sm:$0xff] }
  0x23   :  { %237 = vmatprep.mubr.f32.mxu0 %v14_v63  ;;  %625 = vmatpush3.msra.mxu1 %v77_v0  ;;  %v164_v37 = vld [vmem:[%s1241_s1 + $0x3b8] sm:$0xff]  ;;  %v21_v42 = vld [vmem:[%s1242_s0 + $0x40] sm:$0xff]  ;;  %v23_v43 = vld [vmem:[%s1242_s0 + $0x50] sm:$0xff] }
  0x24   :  { %322 = vmatprep.mubr.f32.mxu1 %v16_v1  ;;  %238 = vmatmul.mubr.f32.vlgmr.msra.gmra.mxu0 %v13_v2  ;;  %v24_v39 = vld [vmem:[%s1242_s0 + $0x58] sm:$0xff]  ;;  %v131_v44 = vld [vmem:[%s1241_s1 + $0x2b0] sm:$0xff]  ;;  %v130_v48 = vld [vmem:[%s1241_s1 + $0x2a8] sm:$0xff] }
  0x25   :  { %323 = vmatmul.mubr.f32.vlgmr.msra.gmra.mxu1 %v15_v3  ;;  %638 = vmatprep.subr.mxu0 %v140_v4  ;;  %v116_v40 = vld [vmem:[%s1241_s1 + $0x238] sm:$0xff]  ;;  %v163_v45 = vld [vmem:[%s1241_s1 + $0x3b0] sm:$0xff]  ;;  %v162_v49 = vld [vmem:[%s1241_s1 + $0x3a8] sm:$0xff] }
  0x26   :  { %682 = vmatprep.subr.mxu1 %v172_v5  ;;  %639 = vmatpush3.msra.mxu0 %v124_v6  ;;  %v148_v41 = vld [vmem:[%s1241_s1 + $0x338] sm:$0xff]  ;;  %v115_v46 = vld [vmem:[%s1241_s1 + $0x230] sm:$0xff]  ;;  %v30_v50 = vld [vmem:[%s1242_s0 + $0x88] sm:$0xff] }
  0x27   :  { %683 = vmatpush3.msra.mxu1 %v156_v7  ;;  %640 = vmatprep.subr.mxu0 %v139_v8  ;;  %v147_v47 = vld [vmem:[%s1241_s1 + $0x330] sm:$0xff]  ;;  %v32_v51 = vld [vmem:[%s1242_s0 + $0x98] sm:$0xff]  ;;  %v114_v52 = vld [vmem:[%s1241_s1 + $0x228] sm:$0xff] }
  0x28   :  { %684 = vmatprep.subr.mxu1 %v171_v9  ;;  %641 = vmatpush3.msra.mxu0 %v123_v10  ;;  %v146_v53 = vld [vmem:[%s1241_s1 + $0x328] sm:$0xff]  ;;  %v29_v54 = vld [vmem:[%s1242_s0 + $0x80] sm:$0xff]  ;;  %v31_v55 = vld [vmem:[%s1242_s0 + $0x90] sm:$0xff] }
  0x29   :  { %685 = vmatpush3.msra.mxu1 %v155_v11  ;;  %642 = vmatprep.subr.mxu0 %v138_v12  ;;  %v129_v56 = vld [vmem:[%s1241_s1 + $0x2a0] sm:$0xff]  ;;  %v128_v60 = vld [vmem:[%s1241_s1 + $0x298] sm:$0xff]  ;;  %v38_v62 = vld [vmem:[%s1242_s0 + $0xc8] sm:$0xff] }
  0x2a   :  { %686 = vmatprep.subr.mxu1 %v170_v13  ;;  %643 = vmatpush3.msra.mxu0 %v122_v14  ;;  %v161_v57 = vld [vmem:[%s1241_s1 + $0x3a0] sm:$0xff]  ;;  %v160_v61 = vld [vmem:[%s1241_s1 + $0x398] sm:$0xff]  ;;  %v39_v3 = vld [vmem:[%s1242_s0 + $0xd0] sm:$0xff] }
  0x2b   :  { %687 = vmatpush3.msra.mxu1 %v154_v15  ;;  %644 = vmatprep.subr.mxu0 %v137_v16  ;;  %v113_v58 = vld [vmem:[%s1241_s1 + $0x220] sm:$0xff]  ;;  %v40_v63 = vld [vmem:[%s1242_s0 + $0xd8] sm:$0xff]  ;;  %v127_v4 = vld [vmem:[%s1241_s1 + $0x290] sm:$0xff] }
  0x2c   :  { %688 = vmatprep.subr.mxu1 %v169_v17  ;;  %645 = vmatpush3.msra.mxu0 %v121_v18  ;;  %v145_v59 = vld [vmem:[%s1241_s1 + $0x320] sm:$0xff]  ;;  %v112_v0 = vld [vmem:[%s1241_s1 + $0x218] sm:$0xff]  ;;  %v159_v5 = vld [vmem:[%s1241_s1 + $0x390] sm:$0xff] }
  0x2d   :  { %689 = vmatpush3.msra.mxu1 %v153_v19  ;;  %646 = vmatprep.subr.mxu0 %v136_v20  ;;  %v144_v1 = vld [vmem:[%s1241_s1 + $0x318] sm:$0xff]  ;;  %v37_v2 = vld [vmem:[%s1242_s0 + $0xc0] sm:$0xff]  ;;  %v111_v6 = vld [vmem:[%s1241_s1 + $0x210] sm:$0xff] }
  0x2e   :  { %690 = vmatprep.subr.mxu1 %v168_v21  ;;  %647 = vmatpush3.msra.mxu0 %v120_v22  ;;  %v143_v7 = vld [vmem:[%s1241_s1 + $0x310] sm:$0xff]  ;;  %v126_v8 = vld [vmem:[%s1241_s1 + $0x288] sm:$0xff]  ;;  %v125_v12 = vld [vmem:[%s1241_s1 + $0x280] sm:$0xff] }
  0x2f   :  { %691 = vmatpush3.msra.mxu1 %v152_v23  ;;  %648 = vmatprep.subr.mxu0 %v135_v24  ;;  %v158_v9 = vld [vmem:[%s1241_s1 + $0x388] sm:$0xff]  ;;  %v157_v13 = vld [vmem:[%s1241_s1 + $0x380] sm:$0xff]  ;;  %v20_v17 = vld [vmem:[%s1242_s0 + $0x38] sm:$0xff] }
  0x30   :  { %692 = vmatprep.subr.mxu1 %v167_v25  ;;  %649 = vmatpush3.msra.mxu0 %v119_v26  ;;  %v110_v10 = vld [vmem:[%s1241_s1 + $0x208] sm:$0xff]  ;;  %v109_v14 = vld [vmem:[%s1241_s1 + $0x200] sm:$0xff]  ;;  %v19_v19 = vld [vmem:[%s1242_s0 + $0x30] sm:$0xff] }
  0x31   :  { %693 = vmatpush3.msra.mxu1 %v151_v27  ;;  %650 = vmatprep.subr.mxu0 %v134_v28  ;;  %v142_v11 = vld [vmem:[%s1241_s1 + $0x308] sm:$0xff]  ;;  %v141_v16 = vld [vmem:[%s1241_s1 + $0x300] sm:$0xff]  ;;  %v28_v21 = vld [vmem:[%s1242_s0 + $0x78] sm:$0xff] }
  0x32   :  { %694 = vmatprep.subr.mxu1 %v166_v29  ;;  %651 = vmatpush3.msra.mxu0 %v118_v30  ;;  %v18_v15 = vld [vmem:[%s1242_s0 + $0x28] sm:$0xff]  ;;  %v17_v18 = vld [vmem:[%s1242_s0 + $0x20] sm:$0xff]  ;;  %v27_v23 = vld [vmem:[%s1242_s0 + $0x70] sm:$0xff] }
  0x33   :  { %695 = vmatpush3.msra.mxu1 %v150_v31  ;;  %652 = vmatprep.subr.mxu0 %v133_v32  ;;  %v26_v20 = vld [vmem:[%s1242_s0 + $0x68] sm:$0xff]  ;;  %v25_v22 = vld [vmem:[%s1242_s0 + $0x60] sm:$0xff]  ;;  %v36_v25 = vld [vmem:[%s1242_s0 + $0xb8] sm:$0xff] }
  0x34   :  { %696 = vmatprep.subr.mxu1 %v165_v33  ;;  %653 = vmatpush3.msra.mxu0 %v117_v34  ;;  %v34_v24 = vld [vmem:[%s1242_s0 + $0xa8] sm:$0xff]  ;;  %v33_v26 = vld [vmem:[%s1242_s0 + $0xa0] sm:$0xff]  ;;  %v35_v27 = vld [vmem:[%s1242_s0 + $0xb0] sm:$0xff] }
  0x35   :  { %697 = vmatpush3.msra.mxu1 %v149_v35  ;;  %654 = vmatprep.subr.mxu0 %v132_v36  ;;  %v42_v28 = vld [vmem:[%s1242_s0 + $0xe8] sm:$0xff]  ;;  %v44_v29 = vld [vmem:[%s1242_s0 + $0xf8] sm:$0xff]  ;;  %v41_v30 = vld [vmem:[%s1242_s0 + $0xe0] sm:$0xff] }
  0x36   :  { %698 = vmatprep.subr.mxu1 %v164_v37  ;;  %242 = vmatprep.mubr.f32.mxu0 %v22_v38  ;;  %v43_v31 = vld [vmem:[%s1242_s0 + $0xf0] sm:$0xff] }
  0x37   :  { %327 = vmatprep.mubr.f32.mxu1 %v24_v39  ;;  %655 = vmatpush3.msra.mxu0 %v116_v40 }
  0x38   :  { %699 = vmatpush3.msra.mxu1 %v148_v41  ;;  %243 = vmatmul.mubr.f32.gmra.mxu0 %v21_v42 }
  0x39   :  { %328 = vmatmul.mubr.f32.gmra.mxu1 %v23_v43  ;;  %656 = vmatprep.subr.mxu0 %v131_v44 }
  0x3a   :  { %700 = vmatprep.subr.mxu1 %v163_v45  ;;  %657 = vmatpush3.msra.mxu0 %v115_v46 }
  0x3b   :  { %701 = vmatpush3.msra.mxu1 %v147_v47  ;;  %658 = vmatprep.subr.mxu0 %v130_v48 }
  0x3c   :  { %702 = vmatprep.subr.mxu1 %v162_v49  ;;  %247 = vmatprep.mubr.f32.mxu0 %v30_v50 }
  0x3d   :  { %332 = vmatprep.mubr.f32.mxu1 %v32_v51  ;;  %659 = vmatpush3.msra.mxu0 %v114_v52 }
  0x3e   :  { %703 = vmatpush3.msra.mxu1 %v146_v53  ;;  %248 = vmatmul.mubr.f32.gmra.mxu0 %v29_v54 }
  0x3f   :  { %333 = vmatmul.mubr.f32.gmra.mxu1 %v31_v55  ;;  %660 = vmatprep.subr.mxu0 %v129_v56 }
  0x40   :  { %704 = vmatprep.subr.mxu1 %v161_v57  ;;  %661 = vmatpush3.msra.mxu0 %v113_v58 }
  0x41   :  { %705 = vmatpush3.msra.mxu1 %v145_v59  ;;  %662 = vmatprep.subr.mxu0 %v128_v60 }
  0x42   :  { %706 = vmatprep.subr.mxu1 %v160_v61  ;;  %252 = vmatprep.mubr.f32.mxu0 %v38_v62 }
  0x43   :  { %337 = vmatprep.mubr.f32.mxu1 %v40_v63  ;;  %663 = vmatpush3.msra.mxu0 %v112_v0 }
  0x44   :  { %707 = vmatpush3.msra.mxu1 %v144_v1  ;;  %253 = vmatmul.mubr.f32.gmra.mxu0 %v37_v2 }
  0x45   :  { %338 = vmatmul.mubr.f32.gmra.mxu1 %v39_v3  ;;  %664 = vmatprep.subr.mxu0 %v127_v4 }
  0x46   :  { %708 = vmatprep.subr.mxu1 %v159_v5  ;;  %665 = vmatpush3.msra.mxu0 %v111_v6 }
  0x47   :  { %709 = vmatpush3.msra.mxu1 %v143_v7  ;;  %666 = vmatprep.subr.mxu0 %v126_v8 }
  0x48   :  { %710 = vmatprep.subr.mxu1 %v158_v9  ;;  %667 = vmatpush3.msra.mxu0 %v110_v10 }
  0x49   :  { %711 = vmatpush3.msra.mxu1 %v142_v11  ;;  %668 = vmatprep.subr.mxu0 %v125_v12 }
  0x4a   :  { %712 = vmatprep.subr.mxu1 %v157_v13  ;;  %669 = vmatpush3.msra.mxu0 %v109_v14 }
  0x4b   :  { %407 = vmatprep.mubr.f32.mxu0 %v18_v15  ;;  %713 = vmatpush3.msra.mxu1 %v141_v16 }
  0x4c   :  { %492 = vmatprep.mubr.f32.mxu1 %v20_v17  ;;  %408 = vmatmul.mubr.f32.vlgmr.msra.gmra.mxu0 %v17_v18 }
  0x4d   :  { %493 = vmatmul.mubr.f32.vlgmr.msra.gmra.mxu1 %v19_v19  ;;  %412 = vmatprep.mubr.f32.mxu0 %v26_v20 }
  0x4e   :  { %497 = vmatprep.mubr.f32.mxu1 %v28_v21 }
  0x50   :  { %413 = vmatmul.mubr.f32.gmra.mxu0 %v25_v22 }
  0x51   :  { %498 = vmatmul.mubr.f32.gmra.mxu1 %v27_v23  ;;  %417 = vmatprep.mubr.f32.mxu0 %v34_v24 }
  0x52   :  { %502 = vmatprep.mubr.f32.mxu1 %v36_v25 }
  0x54   :  { %418 = vmatmul.mubr.f32.gmra.mxu0 %v33_v26 }
  0x55   :  { %503 = vmatmul.mubr.f32.gmra.mxu1 %v35_v27  ;;  %422 = vmatprep.mubr.f32.mxu0 %v42_v28 }
  0x56   :  { %507 = vmatprep.mubr.f32.mxu1 %v44_v29 }
  0x58   :  { %423 = vmatmul.mubr.f32.gmra.mxu0 %v41_v30 }
  0x59   :  { %508 = vmatmul.mubr.f32.gmra.mxu1 %v43_v31 }
  0xe4   :  { %v582_v32 = vpop.f32.mrf.mxu0 }
  0xe5   :  { %v626_v33 = vpop.f32.mrf.mxu1 }
  0xe6   :  { %v583_v34 = vpop.f32.mrf.mxu0 }
  0xe7   :  { %v627_v35 = vpop.f32.mrf.mxu1  ;;  %v584_v48 = vadd.f32 %v583_v34, %v582_v32 }
  0xe8   :  { %v628_v49 = vadd.f32 %v627_v35, %v626_v33 }
  0xea   :  { %v325_v54 = vadd.f32 %v628_v49, %v584_v48 }
  0xf8   :  { %v585_v36 = vpop.f32.mrf.mxu0 }
  0xf9   :  { %v629_v37 = vpop.f32.mrf.mxu1 }
  0xfa   :  { %v586_v38 = vpop.f32.mrf.mxu0 }
  0xfb   :  { %v630_v39 = vpop.f32.mrf.mxu1  ;;  %v587_v55 = vadd.f32 %v586_v38, %v585_v36 }
  0xfc   :  { %v631_v56 = vadd.f32 %v630_v39, %v629_v37 }
  0xfe   :  { %v588_v40 = vpop.f32.mrf.mxu0  ;;  %v330_v2 = vadd.f32 %v631_v56, %v587_v55 }
  0xff   :  { %v632_v41 = vpop.f32.mrf.mxu1 }
 0x100   :  { %v589_v42 = vpop.f32.mrf.mxu0 }
 0x101   :  { %v633_v43 = vpop.f32.mrf.mxu1  ;;  %v590_v62 = vadd.f32 %v589_v42, %v588_v40 }
 0x102   :  { %v634_v63 = vadd.f32 %v633_v43, %v632_v41 }
 0x104   :  { %v591_v44 = vpop.f32.mrf.mxu0  ;;  %v335_v9 = vadd.f32 %v634_v63, %v590_v62 }
 0x105   :  { %v635_v45 = vpop.f32.mrf.mxu1 }
 0x106   :  { %v592_v46 = vpop.f32.mrf.mxu0 }
 0x107   :  { %v636_v47 = vpop.f32.mrf.mxu1  ;;  %v593_v12 = vadd.f32 %v592_v46, %v591_v44 }
 0x108   :  { %v637_v13 = vadd.f32 %v636_v47, %v635_v45 }
 0x10a   :  { %v340_v22 = vadd.f32 %v637_v13, %v593_v12 }
 0x10c   :  { %v670_v50 = vpop.f32.mrf.mxu0 }
 0x10d   :  { %v714_v51 = vpop.f32.mrf.mxu1 }
 0x10e   :  { %v671_v52 = vpop.f32.mrf.mxu0 }
 0x10f   :  { %v715_v53 = vpop.f32.mrf.mxu1  ;;  %v672_v57 = vadd.f32 %v671_v52, %v670_v50 }
 0x110   :  { %v673_v58 = vpop.f32.mrf.mxu0  ;;  %v716_v61 = vadd.f32 %v715_v53, %v714_v51 }
 0x111   :  { %v717_v59 = vpop.f32.mrf.mxu1  ;;  %v410_v60 = vadd.f32 %v672_v57, %v325_v54 }
 0x112   :  { %v674_v0 = vpop.f32.mrf.mxu0 }
 0x113   :  { %v718_v1 = vpop.f32.mrf.mxu1  ;;  %v495_v3 = vadd.f32 %v716_v61, %v410_v60  ;;  %v675_v4 = vadd.f32 %v674_v0, %v673_v58 }
 0x114   :  { %v676_v5 = vpop.f32.mrf.mxu0  ;;  %v719_v8 = vadd.f32 %v718_v1, %v717_v59 }
 0x115   :  { %v720_v6 = vpop.f32.mrf.mxu1  ;;  %513 = vst [vmem:[%s1243_s2] sm:$0xff] %v495_v3  ;;  %v415_v7 = vadd.f32 %v675_v4, %v330_v2  ;;  %v526_v26 = vmul.f32 %v495_v3, %v495_v3 }
 0x116   :  { %v677_v10 = vpop.f32.mrf.mxu0 }
 0x117   :  { %v721_v11 = vpop.f32.mrf.mxu1  ;;  %v500_v14 = vadd.f32 %v719_v8, %v415_v7  ;;  %v678_v15 = vadd.f32 %v677_v10, %v676_v5 }
 0x118   :  { %v679_v16 = vpop.f32.mrf.mxu0  ;;  %v722_v19 = vadd.f32 %v721_v11, %v720_v6 }
 0x119   :  { %v723_v17 = vpop.f32.mrf.mxu1  ;;  %514 = vst [vmem:[%s1243_s2 + $0x8] sm:$0xff] %v500_v14  ;;  %v420_v18 = vadd.f32 %v678_v15, %v335_v9  ;;  %v527_v23 = vmul.f32 %v500_v14, %v500_v14  ;;  %v517_v27 = vadd.f32 %v500_v14, %v495_v3 }
 0x11a   :  { %v680_v20 = vpop.f32.mrf.mxu0 }
 0x11b   :  { %v724_v21 = vpop.f32.mrf.mxu1  ;;  %v505_v24 = vadd.f32 %v722_v19, %v420_v18  ;;  %v681_v25 = vadd.f32 %v680_v20, %v679_v16  ;;  %v530_v31 = vadd.f32 %v527_v23, %v526_v26 }
 0x11c   :  { %v725_v30 = vadd.f32 %v724_v21, %v723_v17 }
 0x11d   :  { %515 = vst [vmem:[%s1243_s2 + $0x10] sm:$0xff] %v505_v24  ;;  %v528_v28 = vmul.f32 %v505_v24, %v505_v24  ;;  %v425_v29 = vadd.f32 %v681_v25, %v340_v22  ;;  %v518_v32 = vadd.f32 %v517_v27, %v505_v24 }
 0x11f   :  { %v510_v33 = vadd.f32 %v725_v30, %v425_v29  ;;  %v531_v34 = vadd.f32 %v530_v31, %v528_v28 }
 0x121   :  { %516 = vst [vmem:[%s1243_s2 + $0x18] sm:$0xff] %v510_v33  ;;  %v519_v35 = vadd.f32 %v518_v32, %v510_v33  ;;  %v529_v36 = vmul.f32 %v510_v33, %v510_v33 }
 0x123   :  { %v520_v37 = vrot.slane %v519_v35, 4  ;;  %v532_v38 = vadd.f32 %v531_v34, %v529_v36 }
 0x125   :  { %v521_v39 = vadd.f32 %v520_v37, %v519_v35  ;;  %v533_v40 = vrot.slane %v532_v38, 4 }
 0x127   :  { %v522_v41 = vrot.slane %v521_v39, 2  ;;  %v534_v42 = vadd.f32 %v533_v40, %v532_v38 }
 0x129   :  { %v523_v43 = vadd.f32 %v522_v41, %v521_v39  ;;  %v535_v44 = vrot.slane %v534_v42, 2 }
 0x12b   :  { %v524_v45 = vrot.slane %v523_v43, 1  ;;  %v536_v46 = vadd.f32 %v535_v44, %v534_v42 }
 0x12d   :  { %v537_v47 = vrot.slane %v536_v46, 1  ;;  %v525_v48 = vadd.f32 %v524_v45, %v523_v43 }
 0x12f   :  { %v538_v49 = vadd.f32 %v537_v47, %v536_v46 }
 0x131   :  { %v540_v50 = vsel %vm539_vm0, %v525_v48, %v538_v49 }
 0x132   :  { %541 = vst [vmem:[%s1244_s3] sm:$0x3] %v540_v50 }

// kernel: discriminator_forward.9
= control target key start
LH: loop header
LB: loop body
LE: loop exit
PB: predicated region body
PF: predicated region fallthrough
CT: control target
= control target key end

     0   :  { %v1230_v30 = vmov 1983009808   ;;  %v289_v32 = vlaneseq  ;;  %s2047_s1 = inlined_call_operand.vmem [shape: f32[2048,128], index: 1, kind: input, shape index: {}]   ;;  %s2048_s0 = inlined_call_operand.vmem [shape: f32[2,2048], index: 0, kind: input, shape index: {}]   ;;  %s2049_s2 = inlined_call_operand.vmem [shape: f32[1,128], index: 2, kind: input, shape index: {}]   ;;  %s2050_s3 = inlined_call_operand.vmem [shape: f32[2,128], index: 3, kind: output, shape index: {}]  }
   0x1   :  { %v49_v0 = vld [vmem:[%s2047_s1 + $0xf8] sm:$0xff]  ;;  %v48_v4 = vld [vmem:[%s2047_s1 + $0xf0] sm:$0xff]  ;;  %v47_v8 = vld [vmem:[%s2047_s1 + $0xe8] sm:$0xff]  ;;  %v287_v31 = vunpack.c.l.s4 %v1230_v30 }
   0x2   :  { %v81_v1 = vld [vmem:[%s2047_s1 + $0x1f8] sm:$0xff]  ;;  %941 = vmatprep.subr.mxu0 %v49_v0  ;;  %v80_v5 = vld [vmem:[%s2047_s1 + $0x1f0] sm:$0xff]  ;;  %v79_v9 = vld [vmem:[%s2047_s1 + $0x1e8] sm:$0xff]  ;;  %v290_v42 = vshrl.u32 %v289_v32, 7 }
   0x3   :  { %v33_v2 = vld [vmem:[%s2047_s1 + $0x78] sm:$0xff]  ;;  %976 = vmatprep.subr.mxu1 %v81_v1  ;;  %v32_v6 = vld [vmem:[%s2047_s1 + $0x70] sm:$0xff]  ;;  %v31_v10 = vld [vmem:[%s2047_s1 + $0x68] sm:$0xff]  ;;  %v288_v41 = vunpack.c.0.s8 %v287_v31 }
   0x4   :  { %v65_v3 = vld [vmem:[%s2047_s1 + $0x178] sm:$0xff]  ;;  %942 = vmatpush3.msra.mxu0 %v33_v2  ;;  %v64_v7 = vld [vmem:[%s2047_s1 + $0x170] sm:$0xff]  ;;  %v63_v11 = vld [vmem:[%s2047_s1 + $0x168] sm:$0xff] }
   0x5   :  { %977 = vmatpush3.msra.mxu1 %v65_v3  ;;  %943 = vmatprep.subr.mxu0 %v48_v4  ;;  %v46_v12 = vld [vmem:[%s2047_s1 + $0xe0] sm:$0xff]  ;;  %v45_v16 = vld [vmem:[%s2047_s1 + $0xd8] sm:$0xff]  ;;  %v44_v20 = vld [vmem:[%s2047_s1 + $0xd0] sm:$0xff]  ;;  %v1389_v51 = vsub.s32 %v288_v41, %v290_v42 }
   0x6   :  { %978 = vmatprep.subr.mxu1 %v80_v5  ;;  %944 = vmatpush3.msra.mxu0 %v32_v6  ;;  %v78_v13 = vld [vmem:[%s2047_s1 + $0x1e0] sm:$0xff]  ;;  %v77_v17 = vld [vmem:[%s2047_s1 + $0x1d8] sm:$0xff]  ;;  %v76_v21 = vld [vmem:[%s2047_s1 + $0x1d0] sm:$0xff] }
   0x7   :  { %979 = vmatpush3.msra.mxu1 %v64_v7  ;;  %945 = vmatprep.subr.mxu0 %v47_v8  ;;  %v30_v14 = vld [vmem:[%s2047_s1 + $0x60] sm:$0xff]  ;;  %v29_v18 = vld [vmem:[%s2047_s1 + $0x58] sm:$0xff]  ;;  %v28_v22 = vld [vmem:[%s2047_s1 + $0x50] sm:$0xff] }
   0x8   :  { %980 = vmatprep.subr.mxu1 %v79_v9  ;;  %v62_v15 = vld [vmem:[%s2047_s1 + $0x160] sm:$0xff]  ;;  %946 = vmatpush3.msra.mxu0 %v31_v10  ;;  %v61_v19 = vld [vmem:[%s2047_s1 + $0x158] sm:$0xff]  ;;  %v60_v23 = vld [vmem:[%s2047_s1 + $0x150] sm:$0xff] }
   0x9   :  { %981 = vmatpush3.msra.mxu1 %v63_v11  ;;  %947 = vmatprep.subr.mxu0 %v46_v12  ;;  %v43_v24 = vld [vmem:[%s2047_s1 + $0xc8] sm:$0xff]  ;;  %v42_v28 = vld [vmem:[%s2047_s1 + $0xc0] sm:$0xff]  ;;  %v41_v35 = vld [vmem:[%s2047_s1 + $0xb8] sm:$0xff] }
   0xa   :  { %982 = vmatprep.subr.mxu1 %v78_v13  ;;  %948 = vmatpush3.msra.mxu0 %v30_v14  ;;  %v75_v25 = vld [vmem:[%s2047_s1 + $0x1c8] sm:$0xff]  ;;  %v74_v29 = vld [vmem:[%s2047_s1 + $0x1c0] sm:$0xff]  ;;  %v73_v36 = vld [vmem:[%s2047_s1 + $0x1b8] sm:$0xff] }
   0xb   :  { %983 = vmatpush3.msra.mxu1 %v62_v15  ;;  %949 = vmatprep.subr.mxu0 %v45_v16  ;;  %v27_v26 = vld [vmem:[%s2047_s1 + $0x48] sm:$0xff]  ;;  %v26_v33 = vld [vmem:[%s2047_s1 + $0x40] sm:$0xff]  ;;  %v25_v37 = vld [vmem:[%s2047_s1 + $0x38] sm:$0xff] }
   0xc   :  { %984 = vmatprep.subr.mxu1 %v77_v17  ;;  %950 = vmatpush3.msra.mxu0 %v29_v18  ;;  %v59_v27 = vld [vmem:[%s2047_s1 + $0x148] sm:$0xff]  ;;  %v58_v34 = vld [vmem:[%s2047_s1 + $0x140] sm:$0xff]  ;;  %v57_v38 = vld [vmem:[%s2047_s1 + $0x138] sm:$0xff] }
   0xd   :  { %985 = vmatpush3.msra.mxu1 %v61_v19  ;;  %951 = vmatprep.subr.mxu0 %v44_v20  ;;  %v40_v39 = vld [vmem:[%s2047_s1 + $0xb0] sm:$0xff]  ;;  %v39_v45 = vld [vmem:[%s2047_s1 + $0xa8] sm:$0xff]  ;;  %v38_v49 = vld [vmem:[%s2047_s1 + $0xa0] sm:$0xff] }
   0xe   :  { %986 = vmatprep.subr.mxu1 %v76_v21  ;;  %952 = vmatpush3.msra.mxu0 %v28_v22  ;;  %v72_v40 = vld [vmem:[%s2047_s1 + $0x1b0] sm:$0xff]  ;;  %v71_v46 = vld [vmem:[%s2047_s1 + $0x1a8] sm:$0xff]  ;;  %v70_v50 = vld [vmem:[%s2047_s1 + $0x1a0] sm:$0xff] }
   0xf   :  { %987 = vmatpush3.msra.mxu1 %v60_v23  ;;  %953 = vmatprep.subr.mxu0 %v43_v24  ;;  %v24_v43 = vld [vmem:[%s2047_s1 + $0x30] sm:$0xff]  ;;  %v23_v47 = vld [vmem:[%s2047_s1 + $0x28] sm:$0xff]  ;;  %v22_v52 = vld [vmem:[%s2047_s1 + $0x20] sm:$0xff] }
  0x10   :  { %988 = vmatprep.subr.mxu1 %v75_v25  ;;  %954 = vmatpush3.msra.mxu0 %v27_v26  ;;  %v56_v44 = vld [vmem:[%s2047_s1 + $0x130] sm:$0xff]  ;;  %v55_v48 = vld [vmem:[%s2047_s1 + $0x128] sm:$0xff]  ;;  %v54_v53 = vld [vmem:[%s2047_s1 + $0x120] sm:$0xff] }
  0x11   :  { %989 = vmatpush3.msra.mxu1 %v59_v27  ;;  %955 = vmatprep.subr.mxu0 %v42_v28  ;;  %v14_v54 = vld [vmem:[%s2048_s0] sm:$0xff]  ;;  %v37_v55 = vld [vmem:[%s2047_s1 + $0x98] sm:$0xff]  ;;  %v36_v60 = vld [vmem:[%s2047_s1 + $0x90] sm:$0xff] }
  0x12   :  { %990 = vmatprep.subr.mxu1 %v74_v29  ;;  %956 = vmatpush3.msra.mxu0 %v26_v33  ;;  %v69_v56 = vld [vmem:[%s2047_s1 + $0x198] sm:$0xff]  ;;  %v285_v57 = vcombine.high %v14_v54, %v14_v54  ;;  %v68_v61 = vld [vmem:[%s2047_s1 + $0x190] sm:$0xff]  ;;  %v292_v62 = vrot.slane %v14_v54, %v1389_v51  ;;  %v35_v1 = vld [vmem:[%s2047_s1 + $0x88] sm:$0xff] }
  0x13   :  { %991 = vmatpush3.msra.mxu1 %v58_v34  ;;  %957 = vmatprep.subr.mxu0 %v41_v35  ;;  %v21_v58 = vld [vmem:[%s2047_s1 + $0x18] sm:$0xff]  ;;  %v20_v63 = vld [vmem:[%s2047_s1 + $0x10] sm:$0xff]  ;;  %v67_v2 = vld [vmem:[%s2047_s1 + $0x188] sm:$0xff] }
  0x14   :  { %992 = vmatprep.subr.mxu1 %v73_v36  ;;  %958 = vmatpush3.msra.mxu0 %v25_v37  ;;  %v53_v59 = vld [vmem:[%s2047_s1 + $0x118] sm:$0xff]  ;;  %v52_v0 = vld [vmem:[%s2047_s1 + $0x110] sm:$0xff]  ;;  %v299_v3 = vrot.slane %v285_v57, %v1389_v51  ;;  %v19_v4 = vld [vmem:[%s2047_s1 + $0x8] sm:$0xff]  ;;  %v300_v8 = vcombine.high %v292_v62, %v292_v62 }
  0x15   :  { %993 = vmatpush3.msra.mxu1 %v57_v38  ;;  %959 = vmatprep.subr.mxu0 %v40_v39  ;;  %v51_v5 = vld [vmem:[%s2047_s1 + $0x108] sm:$0xff]  ;;  %v34_v6 = vld [vmem:[%s2047_s1 + $0x80] sm:$0xff]  ;;  %v113_v12 = vld [vmem:[%s2047_s1 + $0x2f8] sm:$0xff] }
  0x16   :  { %994 = vmatprep.subr.mxu1 %v72_v40  ;;  %960 = vmatpush3.msra.mxu0 %v24_v43  ;;  %v66_v7 = vld [vmem:[%s2047_s1 + $0x180] sm:$0xff]  ;;  %v301_v11 = vcombine.high %v299_v3, %v299_v3  ;;  %v145_v13 = vld [vmem:[%s2047_s1 + $0x3f8] sm:$0xff]  ;;  %v112_v16 = vld [vmem:[%s2047_s1 + $0x2f0] sm:$0xff] }
  0x17   :  { %995 = vmatpush3.msra.mxu1 %v56_v44  ;;  %961 = vmatprep.subr.mxu0 %v39_v45  ;;  %v18_v9 = vld [vmem:[%s2047_s1] sm:$0xff]  ;;  %v97_v14 = vld [vmem:[%s2047_s1 + $0x278] sm:$0xff]  ;;  %v144_v17 = vld [vmem:[%s2047_s1 + $0x3f0] sm:$0xff] }
  0x18   :  { %996 = vmatprep.subr.mxu1 %v71_v46  ;;  %962 = vmatpush3.msra.mxu0 %v23_v47  ;;  %v50_v10 = vld [vmem:[%s2047_s1 + $0x100] sm:$0xff]  ;;  %v129_v15 = vld [vmem:[%s2047_s1 + $0x378] sm:$0xff]  ;;  %v96_v18 = vld [vmem:[%s2047_s1 + $0x270] sm:$0xff] }
  0x19   :  { %997 = vmatpush3.msra.mxu1 %v55_v48  ;;  %963 = vmatprep.subr.mxu0 %v38_v49  ;;  %v128_v19 = vld [vmem:[%s2047_s1 + $0x370] sm:$0xff]  ;;  %v111_v20 = vld [vmem:[%s2047_s1 + $0x2e8] sm:$0xff]  ;;  %v110_v24 = vld [vmem:[%s2047_s1 + $0x2e0] sm:$0xff] }
  0x1a   :  { %998 = vmatprep.subr.mxu1 %v70_v50  ;;  %964 = vmatpush3.msra.mxu0 %v22_v52  ;;  %v143_v21 = vld [vmem:[%s2047_s1 + $0x3e8] sm:$0xff]  ;;  %v142_v25 = vld [vmem:[%s2047_s1 + $0x3e0] sm:$0xff]  ;;  %v109_v28 = vld [vmem:[%s2047_s1 + $0x2d8] sm:$0xff] }
  0x1b   :  { %999 = vmatpush3.msra.mxu1 %v54_v53  ;;  %965 = vmatprep.subr.mxu0 %v37_v55  ;;  %v95_v22 = vld [vmem:[%s2047_s1 + $0x268] sm:$0xff]  ;;  %v94_v26 = vld [vmem:[%s2047_s1 + $0x260] sm:$0xff]  ;;  %v141_v29 = vld [vmem:[%s2047_s1 + $0x3d8] sm:$0xff] }
  0x1c   :  { %1000 = vmatprep.subr.mxu1 %v69_v56  ;;  %966 = vmatpush3.msra.mxu0 %v21_v58  ;;  %v127_v23 = vld [vmem:[%s2047_s1 + $0x368] sm:$0xff]  ;;  %v126_v27 = vld [vmem:[%s2047_s1 + $0x360] sm:$0xff]  ;;  %v93_v30 = vld [vmem:[%s2047_s1 + $0x258] sm:$0xff] }
  0x1d   :  { %1001 = vmatpush3.msra.mxu1 %v53_v59  ;;  %967 = vmatprep.subr.mxu0 %v36_v60  ;;  %v125_v31 = vld [vmem:[%s2047_s1 + $0x358] sm:$0xff]  ;;  %v108_v32 = vld [vmem:[%s2047_s1 + $0x2d0] sm:$0xff]  ;;  %v107_v36 = vld [vmem:[%s2047_s1 + $0x2c8] sm:$0xff] }
  0x1e   :  { %1002 = vmatprep.subr.mxu1 %v68_v61  ;;  %968 = vmatpush3.msra.mxu0 %v20_v63  ;;  %v140_v33 = vld [vmem:[%s2047_s1 + $0x3d0] sm:$0xff]  ;;  %v139_v37 = vld [vmem:[%s2047_s1 + $0x3c8] sm:$0xff]  ;;  %v106_v40 = vld [vmem:[%s2047_s1 + $0x2c0] sm:$0xff] }
  0x1f   :  { %1003 = vmatpush3.msra.mxu1 %v52_v0  ;;  %969 = vmatprep.subr.mxu0 %v35_v1  ;;  %v92_v34 = vld [vmem:[%s2047_s1 + $0x250] sm:$0xff]  ;;  %v91_v38 = vld [vmem:[%s2047_s1 + $0x248] sm:$0xff]  ;;  %v138_v41 = vld [vmem:[%s2047_s1 + $0x3c0] sm:$0xff] }
  0x20   :  { %1004 = vmatprep.subr.mxu1 %v67_v2  ;;  %970 = vmatpush3.msra.mxu0 %v19_v4  ;;  %v124_v35 = vld [vmem:[%s2047_s1 + $0x350] sm:$0xff]  ;;  %v123_v39 = vld [vmem:[%s2047_s1 + $0x348] sm:$0xff]  ;;  %v90_v42 = vld [vmem:[%s2047_s1 + $0x240] sm:$0xff] }
  0x21   :  { %1005 = vmatpush3.msra.mxu1 %v51_v5  ;;  %971 = vmatprep.subr.mxu0 %v34_v6  ;;  %v122_v43 = vld [vmem:[%s2047_s1 + $0x340] sm:$0xff]  ;;  %v105_v44 = vld [vmem:[%s2047_s1 + $0x2b8] sm:$0xff]  ;;  %v104_v48 = vld [vmem:[%s2047_s1 + $0x2b0] sm:$0xff] }
  0x22   :  { %1006 = vmatprep.subr.mxu1 %v66_v7  ;;  %972 = vmatpush3.msra.mxu0 %v18_v9  ;;  %v137_v45 = vld [vmem:[%s2047_s1 + $0x3b8] sm:$0xff]  ;;  %v136_v49 = vld [vmem:[%s2047_s1 + $0x3b0] sm:$0xff]  ;;  %v103_v53 = vld [vmem:[%s2047_s1 + $0x2a8] sm:$0xff] }
  0x23   :  { %433 = vmatprep.mubr.f32.mxu0 %v300_v8  ;;  %1007 = vmatpush3.msra.mxu1 %v50_v10  ;;  %v89_v46 = vld [vmem:[%s2047_s1 + $0x238] sm:$0xff]  ;;  %v88_v50 = vld [vmem:[%s2047_s1 + $0x230] sm:$0xff]  ;;  %v135_v54 = vld [vmem:[%s2047_s1 + $0x3a8] sm:$0xff] }
  0x24   :  { %434 = vmatmul.mubr.f32.vlgmr.msra.gmra.mxu0 %v292_v62  ;;  %503 = vmatprep.mubr.f32.mxu1 %v301_v11  ;;  %v121_v47 = vld [vmem:[%s2047_s1 + $0x338] sm:$0xff]  ;;  %v120_v52 = vld [vmem:[%s2047_s1 + $0x330] sm:$0xff]  ;;  %v87_v55 = vld [vmem:[%s2047_s1 + $0x228] sm:$0xff] }
  0x25   :  { %1011 = vmatprep.subr.mxu0 %v113_v12  ;;  %1046 = vmatprep.subr.mxu1 %v145_v13  ;;  %v119_v56 = vld [vmem:[%s2047_s1 + $0x328] sm:$0xff]  ;;  %v102_v58 = vld [vmem:[%s2047_s1 + $0x2a0] sm:$0xff]  ;;  %v101_v62 = vld [vmem:[%s2047_s1 + $0x298] sm:$0xff] }
  0x26   :  { %504 = vmatmul.mubr.f32.vlgmr.msra.gmra.mxu1 %v299_v3  ;;  %1012 = vmatpush3.msra.mxu0 %v97_v14  ;;  %v15_v57 = vld [vmem:[%s2048_s0 + $0x8] sm:$0xff]  ;;  %v134_v59 = vld [vmem:[%s2047_s1 + $0x3a0] sm:$0xff]  ;;  %v133_v63 = vld [vmem:[%s2047_s1 + $0x398] sm:$0xff] }
  0x27   :  { %1047 = vmatpush3.msra.mxu1 %v129_v15  ;;  %1013 = vmatprep.subr.mxu0 %v112_v16  ;;  %v86_v60 = vld [vmem:[%s2047_s1 + $0x220] sm:$0xff]  ;;  %v302_v0 = vcombine.high %v15_v57, %v15_v57  ;;  %v85_v1 = vld [vmem:[%s2047_s1 + $0x218] sm:$0xff]  ;;  %v100_v3 = vld [vmem:[%s2047_s1 + $0x290] sm:$0xff]  ;;  %v309_v5 = vrot.slane %v15_v57, %v1389_v51 }
  0x28   :  { %1048 = vmatprep.subr.mxu1 %v144_v17  ;;  %1014 = vmatpush3.msra.mxu0 %v96_v18  ;;  %v118_v61 = vld [vmem:[%s2047_s1 + $0x320] sm:$0xff]  ;;  %v117_v2 = vld [vmem:[%s2047_s1 + $0x318] sm:$0xff]  ;;  %v132_v4 = vld [vmem:[%s2047_s1 + $0x390] sm:$0xff] }
  0x29   :  { %1049 = vmatpush3.msra.mxu1 %v128_v19  ;;  %1015 = vmatprep.subr.mxu0 %v111_v20  ;;  %v84_v6 = vld [vmem:[%s2047_s1 + $0x210] sm:$0xff]  ;;  %v99_v8 = vld [vmem:[%s2047_s1 + $0x288] sm:$0xff]  ;;  %v316_v10 = vrot.slane %v302_v0, %v1389_v51  ;;  %v98_v13 = vld [vmem:[%s2047_s1 + $0x280] sm:$0xff]  ;;  %v317_v15 = vcombine.high %v309_v5, %v309_v5 }
  0x2a   :  { %1050 = vmatprep.subr.mxu1 %v143_v21  ;;  %1016 = vmatpush3.msra.mxu0 %v95_v22  ;;  %v116_v7 = vld [vmem:[%s2047_s1 + $0x310] sm:$0xff]  ;;  %v131_v9 = vld [vmem:[%s2047_s1 + $0x388] sm:$0xff]  ;;  %v130_v14 = vld [vmem:[%s2047_s1 + $0x380] sm:$0xff] }
  0x2b   :  { %1051 = vmatpush3.msra.mxu1 %v127_v23  ;;  %1017 = vmatprep.subr.mxu0 %v110_v24  ;;  %v83_v11 = vld [vmem:[%s2047_s1 + $0x208] sm:$0xff]  ;;  %v82_v16 = vld [vmem:[%s2047_s1 + $0x200] sm:$0xff]  ;;  %v318_v18 = vcombine.high %v316_v10, %v316_v10  ;;  %v177_v19 = vld [vmem:[%s2047_s1 + $0x4f8] sm:$0xff] }
  0x2c   :  { %1052 = vmatprep.subr.mxu1 %v142_v25  ;;  %1018 = vmatpush3.msra.mxu0 %v94_v26  ;;  %v115_v12 = vld [vmem:[%s2047_s1 + $0x308] sm:$0xff]  ;;  %v114_v17 = vld [vmem:[%s2047_s1 + $0x300] sm:$0xff]  ;;  %v209_v20 = vld [vmem:[%s2047_s1 + $0x5f8] sm:$0xff] }
  0x2d   :  { %1053 = vmatpush3.msra.mxu1 %v126_v27  ;;  %1019 = vmatprep.subr.mxu0 %v109_v28  ;;  %v161_v21 = vld [vmem:[%s2047_s1 + $0x478] sm:$0xff]  ;;  %v176_v23 = vld [vmem:[%s2047_s1 + $0x4f0] sm:$0xff]  ;;  %v175_v27 = vld [vmem:[%s2047_s1 + $0x4e8] sm:$0xff] }
  0x2e   :  { %1054 = vmatprep.subr.mxu1 %v141_v29  ;;  %1020 = vmatpush3.msra.mxu0 %v93_v30  ;;  %v193_v22 = vld [vmem:[%s2047_s1 + $0x578] sm:$0xff]  ;;  %v208_v24 = vld [vmem:[%s2047_s1 + $0x5f0] sm:$0xff]  ;;  %v207_v28 = vld [vmem:[%s2047_s1 + $0x5e8] sm:$0xff] }
  0x2f   :  { %1055 = vmatpush3.msra.mxu1 %v125_v31  ;;  %1021 = vmatprep.subr.mxu0 %v108_v32  ;;  %v160_v25 = vld [vmem:[%s2047_s1 + $0x470] sm:$0xff]  ;;  %v159_v29 = vld [vmem:[%s2047_s1 + $0x468] sm:$0xff]  ;;  %v174_v31 = vld [vmem:[%s2047_s1 + $0x4e0] sm:$0xff] }
  0x30   :  { %1056 = vmatprep.subr.mxu1 %v140_v33  ;;  %1022 = vmatpush3.msra.mxu0 %v92_v34  ;;  %v192_v26 = vld [vmem:[%s2047_s1 + $0x570] sm:$0xff]  ;;  %v191_v30 = vld [vmem:[%s2047_s1 + $0x568] sm:$0xff]  ;;  %v206_v32 = vld [vmem:[%s2047_s1 + $0x5e0] sm:$0xff] }
  0x31   :  { %1057 = vmatpush3.msra.mxu1 %v124_v35  ;;  %1023 = vmatprep.subr.mxu0 %v107_v36  ;;  %v158_v33 = vld [vmem:[%s2047_s1 + $0x460] sm:$0xff]  ;;  %v173_v35 = vld [vmem:[%s2047_s1 + $0x4d8] sm:$0xff]  ;;  %v200_v57 = vld [vmem:[%s2047_s1 + $0x5b0] sm:$0xff] }
  0x32   :  { %1058 = vmatprep.subr.mxu1 %v139_v37  ;;  %1024 = vmatpush3.msra.mxu0 %v91_v38  ;;  %v190_v34 = vld [vmem:[%s2047_s1 + $0x560] sm:$0xff]  ;;  %v205_v36 = vld [vmem:[%s2047_s1 + $0x5d8] sm:$0xff]  ;;  %v16_v0 = vld [vmem:[%s2048_s0 + $0x10] sm:$0xff] }
  0x33   :  { %1059 = vmatpush3.msra.mxu1 %v123_v39  ;;  %1025 = vmatprep.subr.mxu0 %v106_v40  ;;  %v157_v37 = vld [vmem:[%s2047_s1 + $0x458] sm:$0xff]  ;;  %v172_v39 = vld [vmem:[%s2047_s1 + $0x4d0] sm:$0xff] }
  0x34   :  { %1060 = vmatprep.subr.mxu1 %v138_v41  ;;  %1026 = vmatpush3.msra.mxu0 %v90_v42  ;;  %v189_v38 = vld [vmem:[%s2047_s1 + $0x558] sm:$0xff]  ;;  %v204_v40 = vld [vmem:[%s2047_s1 + $0x5d0] sm:$0xff] }
  0x35   :  { %1061 = vmatpush3.msra.mxu1 %v122_v43  ;;  %1027 = vmatprep.subr.mxu0 %v105_v44  ;;  %v156_v41 = vld [vmem:[%s2047_s1 + $0x450] sm:$0xff]  ;;  %v171_v43 = vld [vmem:[%s2047_s1 + $0x4c8] sm:$0xff] }
  0x36   :  { %1062 = vmatprep.subr.mxu1 %v137_v45  ;;  %1028 = vmatpush3.msra.mxu0 %v89_v46  ;;  %v188_v42 = vld [vmem:[%s2047_s1 + $0x550] sm:$0xff]  ;;  %v203_v44 = vld [vmem:[%s2047_s1 + $0x5c8] sm:$0xff] }
  0x37   :  { %1063 = vmatpush3.msra.mxu1 %v121_v47  ;;  %1029 = vmatprep.subr.mxu0 %v104_v48  ;;  %v155_v45 = vld [vmem:[%s2047_s1 + $0x448] sm:$0xff]  ;;  %v170_v47 = vld [vmem:[%s2047_s1 + $0x4c0] sm:$0xff] }
  0x38   :  { %1064 = vmatprep.subr.mxu1 %v136_v49  ;;  %1030 = vmatpush3.msra.mxu0 %v88_v50  ;;  %v187_v46 = vld [vmem:[%s2047_s1 + $0x548] sm:$0xff]  ;;  %v202_v48 = vld [vmem:[%s2047_s1 + $0x5c0] sm:$0xff] }
  0x39   :  { %1065 = vmatpush3.msra.mxu1 %v120_v52  ;;  %1031 = vmatprep.subr.mxu0 %v103_v53  ;;  %v154_v49 = vld [vmem:[%s2047_s1 + $0x440] sm:$0xff]  ;;  %v169_v52 = vld [vmem:[%s2047_s1 + $0x4b8] sm:$0xff] }
  0x3a   :  { %1066 = vmatprep.subr.mxu1 %v135_v54  ;;  %1032 = vmatpush3.msra.mxu0 %v87_v55  ;;  %v186_v50 = vld [vmem:[%s2047_s1 + $0x540] sm:$0xff]  ;;  %v201_v53 = vld [vmem:[%s2047_s1 + $0x5b8] sm:$0xff] }
  0x3b   :  { %1067 = vmatpush3.msra.mxu1 %v119_v56  ;;  %1033 = vmatprep.subr.mxu0 %v102_v58  ;;  %v153_v54 = vld [vmem:[%s2047_s1 + $0x438] sm:$0xff]  ;;  %v168_v56 = vld [vmem:[%s2047_s1 + $0x4b0] sm:$0xff] }
  0x3c   :  { %1068 = vmatprep.subr.mxu1 %v134_v59  ;;  %1034 = vmatpush3.msra.mxu0 %v86_v60  ;;  %v185_v55 = vld [vmem:[%s2047_s1 + $0x538] sm:$0xff]  ;;  %v152_v58 = vld [vmem:[%s2047_s1 + $0x430] sm:$0xff]  ;;  %v167_v60 = vld [vmem:[%s2047_s1 + $0x4a8] sm:$0xff] }
  0x3d   :  { %1069 = vmatpush3.msra.mxu1 %v118_v61  ;;  %1035 = vmatprep.subr.mxu0 %v101_v62  ;;  %v184_v59 = vld [vmem:[%s2047_s1 + $0x530] sm:$0xff]  ;;  %v199_v61 = vld [vmem:[%s2047_s1 + $0x5a8] sm:$0xff] }
  0x3e   :  { %1070 = vmatprep.subr.mxu1 %v133_v63  ;;  %1036 = vmatpush3.msra.mxu0 %v85_v1  ;;  %v151_v62 = vld [vmem:[%s2047_s1 + $0x428] sm:$0xff]  ;;  %v166_v1 = vld [vmem:[%s2047_s1 + $0x4a0] sm:$0xff] }
  0x3f   :  { %1071 = vmatpush3.msra.mxu1 %v117_v2  ;;  %1037 = vmatprep.subr.mxu0 %v100_v3  ;;  %v183_v63 = vld [vmem:[%s2047_s1 + $0x528] sm:$0xff]  ;;  %v198_v2 = vld [vmem:[%s2047_s1 + $0x5a0] sm:$0xff] }
  0x40   :  { %1072 = vmatprep.subr.mxu1 %v132_v4  ;;  %1038 = vmatpush3.msra.mxu0 %v84_v6  ;;  %v150_v3 = vld [vmem:[%s2047_s1 + $0x420] sm:$0xff]  ;;  %v197_v6 = vld [vmem:[%s2047_s1 + $0x598] sm:$0xff] }
  0x41   :  { %1073 = vmatpush3.msra.mxu1 %v116_v7  ;;  %1039 = vmatprep.subr.mxu0 %v99_v8  ;;  %v182_v4 = vld [vmem:[%s2047_s1 + $0x520] sm:$0xff]  ;;  %v319_v7 = vcombine.high %v16_v0, %v16_v0  ;;  %v149_v8 = vld [vmem:[%s2047_s1 + $0x418] sm:$0xff] }
  0x42   :  { %1074 = vmatprep.subr.mxu1 %v131_v9  ;;  %1040 = vmatpush3.msra.mxu0 %v83_v11  ;;  %v181_v9 = vld [vmem:[%s2047_s1 + $0x518] sm:$0xff]  ;;  %v196_v11 = vld [vmem:[%s2047_s1 + $0x590] sm:$0xff] }
  0x43   :  { %1075 = vmatpush3.msra.mxu1 %v115_v12  ;;  %1041 = vmatprep.subr.mxu0 %v98_v13  ;;  %v326_v12 = vrot.slane %v16_v0, %v1389_v51  ;;  %v148_v13 = vld [vmem:[%s2047_s1 + $0x410] sm:$0xff] }
  0x44   :  { %1076 = vmatprep.subr.mxu1 %v130_v14  ;;  %1042 = vmatpush3.msra.mxu0 %v82_v16  ;;  %v180_v14 = vld [vmem:[%s2047_s1 + $0x510] sm:$0xff]  ;;  %v195_v16 = vld [vmem:[%s2047_s1 + $0x588] sm:$0xff] }
  0x45   :  { %573 = vmatprep.mubr.f32.mxu0 %v317_v15  ;;  %1077 = vmatpush3.msra.mxu1 %v114_v17  ;;  %v163_v15 = vld [vmem:[%s2047_s1 + $0x488] sm:$0xff]  ;;  %v333_v17 = vrot.slane %v319_v7, %v1389_v51  ;;  %v264_v0 = vld [vmem:[%s2047_s1 + $0x7b0] sm:$0xff] }
  0x46   :  { %574 = vmatmul.mubr.f32.vlgmr.msra.gmra.mxu0 %v309_v5  ;;  %643 = vmatprep.mubr.f32.mxu1 %v318_v18  ;;  %v165_v5 = vld [vmem:[%s2047_s1 + $0x498] sm:$0xff]  ;;  %v147_v18 = vld [vmem:[%s2047_s1 + $0x408] sm:$0xff] }
  0x47   :  { %1081 = vmatprep.subr.mxu0 %v177_v19  ;;  %1116 = vmatprep.subr.mxu1 %v209_v20  ;;  %v179_v19 = vld [vmem:[%s2047_s1 + $0x508] sm:$0xff]  ;;  %v162_v20 = vld [vmem:[%s2047_s1 + $0x480] sm:$0xff] }
  0x48   :  { %644 = vmatmul.mubr.f32.vlgmr.msra.gmra.mxu1 %v316_v10  ;;  %1082 = vmatpush3.msra.mxu0 %v161_v21  ;;  %v164_v10 = vld [vmem:[%s2047_s1 + $0x490] sm:$0xff]  ;;  %v194_v21 = vld [vmem:[%s2047_s1 + $0x580] sm:$0xff]  ;;  %v247_v7 = vld [vmem:[%s2047_s1 + $0x728] sm:$0xff] }
  0x49   :  { %1117 = vmatpush3.msra.mxu1 %v193_v22  ;;  %1083 = vmatprep.subr.mxu0 %v176_v23  ;;  %v334_v22 = vcombine.high %v326_v12, %v326_v12  ;;  %v146_v23 = vld [vmem:[%s2047_s1 + $0x400] sm:$0xff] }
  0x4a   :  { %1118 = vmatprep.subr.mxu1 %v208_v24  ;;  %1084 = vmatpush3.msra.mxu0 %v160_v25  ;;  %v178_v24 = vld [vmem:[%s2047_s1 + $0x500] sm:$0xff]  ;;  %v335_v25 = vcombine.high %v333_v17, %v333_v17 }
  0x4b   :  { %1119 = vmatpush3.msra.mxu1 %v192_v26  ;;  %1085 = vmatprep.subr.mxu0 %v175_v27  ;;  %v241_v26 = vld [vmem:[%s2047_s1 + $0x6f8] sm:$0xff] }
  0x4c   :  { %1120 = vmatprep.subr.mxu1 %v207_v28  ;;  %1086 = vmatpush3.msra.mxu0 %v159_v29  ;;  %v273_v27 = vld [vmem:[%s2047_s1 + $0x7f8] sm:$0xff] }
  0x4d   :  { %1121 = vmatpush3.msra.mxu1 %v191_v30  ;;  %1087 = vmatprep.subr.mxu0 %v174_v31  ;;  %v225_v28 = vld [vmem:[%s2047_s1 + $0x678] sm:$0xff]  ;;  %v240_v30 = vld [vmem:[%s2047_s1 + $0x6f0] sm:$0xff] }
  0x4e   :  { %1122 = vmatprep.subr.mxu1 %v206_v32  ;;  %1088 = vmatpush3.msra.mxu0 %v158_v33  ;;  %v257_v29 = vld [vmem:[%s2047_s1 + $0x778] sm:$0xff]  ;;  %v272_v31 = vld [vmem:[%s2047_s1 + $0x7f0] sm:$0xff] }
  0x4f   :  { %1123 = vmatpush3.msra.mxu1 %v190_v34  ;;  %1089 = vmatprep.subr.mxu0 %v173_v35  ;;  %v224_v32 = vld [vmem:[%s2047_s1 + $0x670] sm:$0xff]  ;;  %v239_v34 = vld [vmem:[%s2047_s1 + $0x6e8] sm:$0xff] }
  0x50   :  { %1124 = vmatprep.subr.mxu1 %v205_v36  ;;  %1090 = vmatpush3.msra.mxu0 %v157_v37  ;;  %v256_v33 = vld [vmem:[%s2047_s1 + $0x770] sm:$0xff]  ;;  %v271_v35 = vld [vmem:[%s2047_s1 + $0x7e8] sm:$0xff] }
  0x51   :  { %1125 = vmatpush3.msra.mxu1 %v189_v38  ;;  %1091 = vmatprep.subr.mxu0 %v172_v39  ;;  %v223_v36 = vld [vmem:[%s2047_s1 + $0x668] sm:$0xff]  ;;  %v238_v38 = vld [vmem:[%s2047_s1 + $0x6e0] sm:$0xff] }
  0x52   :  { %1126 = vmatprep.subr.mxu1 %v204_v40  ;;  %1092 = vmatpush3.msra.mxu0 %v156_v41  ;;  %v255_v37 = vld [vmem:[%s2047_s1 + $0x768] sm:$0xff]  ;;  %v270_v39 = vld [vmem:[%s2047_s1 + $0x7e0] sm:$0xff] }
  0x53   :  { %1127 = vmatpush3.msra.mxu1 %v188_v42  ;;  %1093 = vmatprep.subr.mxu0 %v171_v43  ;;  %v222_v40 = vld [vmem:[%s2047_s1 + $0x660] sm:$0xff]  ;;  %v237_v42 = vld [vmem:[%s2047_s1 + $0x6d8] sm:$0xff] }
  0x54   :  { %1128 = vmatprep.subr.mxu1 %v203_v44  ;;  %1094 = vmatpush3.msra.mxu0 %v155_v45  ;;  %v254_v41 = vld [vmem:[%s2047_s1 + $0x760] sm:$0xff]  ;;  %v269_v43 = vld [vmem:[%s2047_s1 + $0x7d8] sm:$0xff] }
  0x55   :  { %1129 = vmatpush3.msra.mxu1 %v187_v46  ;;  %1095 = vmatprep.subr.mxu0 %v170_v47  ;;  %v221_v44 = vld [vmem:[%s2047_s1 + $0x658] sm:$0xff]  ;;  %v236_v46 = vld [vmem:[%s2047_s1 + $0x6d0] sm:$0xff] }
  0x56   :  { %1130 = vmatprep.subr.mxu1 %v202_v48  ;;  %1096 = vmatpush3.msra.mxu0 %v154_v49  ;;  %v253_v45 = vld [vmem:[%s2047_s1 + $0x758] sm:$0xff]  ;;  %v268_v47 = vld [vmem:[%s2047_s1 + $0x7d0] sm:$0xff] }
  0x57   :  { %1131 = vmatpush3.msra.mxu1 %v186_v50  ;;  %1097 = vmatprep.subr.mxu0 %v169_v52  ;;  %v220_v48 = vld [vmem:[%s2047_s1 + $0x650] sm:$0xff]  ;;  %v235_v50 = vld [vmem:[%s2047_s1 + $0x6c8] sm:$0xff] }
  0x58   :  { %1132 = vmatprep.subr.mxu1 %v201_v53  ;;  %1098 = vmatpush3.msra.mxu0 %v153_v54  ;;  %v252_v49 = vld [vmem:[%s2047_s1 + $0x750] sm:$0xff]  ;;  %v267_v52 = vld [vmem:[%s2047_s1 + $0x7c8] sm:$0xff] }
  0x59   :  { %1133 = vmatpush3.msra.mxu1 %v185_v55  ;;  %1099 = vmatprep.subr.mxu0 %v168_v56  ;;  %v219_v53 = vld [vmem:[%s2047_s1 + $0x648] sm:$0xff]  ;;  %v234_v55 = vld [vmem:[%s2047_s1 + $0x6c0] sm:$0xff] }
  0x5a   :  { %1134 = vmatprep.subr.mxu1 %v200_v57  ;;  %1100 = vmatpush3.msra.mxu0 %v152_v58  ;;  %v251_v54 = vld [vmem:[%s2047_s1 + $0x748] sm:$0xff]  ;;  %v266_v56 = vld [vmem:[%s2047_s1 + $0x7c0] sm:$0xff] }
  0x5b   :  { %1135 = vmatpush3.msra.mxu1 %v184_v59  ;;  %1101 = vmatprep.subr.mxu0 %v167_v60  ;;  %v218_v57 = vld [vmem:[%s2047_s1 + $0x640] sm:$0xff]  ;;  %v233_v59 = vld [vmem:[%s2047_s1 + $0x6b8] sm:$0xff] }
  0x5c   :  { %1136 = vmatprep.subr.mxu1 %v199_v61  ;;  %1102 = vmatpush3.msra.mxu0 %v151_v62  ;;  %v250_v58 = vld [vmem:[%s2047_s1 + $0x740] sm:$0xff]  ;;  %v265_v60 = vld [vmem:[%s2047_s1 + $0x7b8] sm:$0xff] }
  0x5d   :  { %1137 = vmatpush3.msra.mxu1 %v183_v63  ;;  %1103 = vmatprep.subr.mxu0 %v166_v1  ;;  %v217_v61 = vld [vmem:[%s2047_s1 + $0x638] sm:$0xff]  ;;  %v232_v63 = vld [vmem:[%s2047_s1 + $0x6b0] sm:$0xff] }
  0x5e   :  { %1138 = vmatprep.subr.mxu1 %v198_v2  ;;  %1104 = vmatpush3.msra.mxu0 %v150_v3  ;;  %v249_v62 = vld [vmem:[%s2047_s1 + $0x738] sm:$0xff]  ;;  %v216_v1 = vld [vmem:[%s2047_s1 + $0x630] sm:$0xff]  ;;  %v231_v3 = vld [vmem:[%s2047_s1 + $0x6a8] sm:$0xff] }
  0x5f   :  { %1139 = vmatpush3.msra.mxu1 %v182_v4  ;;  %1105 = vmatprep.subr.mxu0 %v165_v5  ;;  %v248_v2 = vld [vmem:[%s2047_s1 + $0x730] sm:$0xff]  ;;  %v263_v4 = vld [vmem:[%s2047_s1 + $0x7a8] sm:$0xff]  ;;  %v17_v5 = vld [vmem:[%s2048_s0 + $0x18] sm:$0xff] }
  0x60   :  { %1140 = vmatprep.subr.mxu1 %v197_v6  ;;  %1106 = vmatpush3.msra.mxu0 %v149_v8  ;;  %v215_v6 = vld [vmem:[%s2047_s1 + $0x628] sm:$0xff]  ;;  %v230_v8 = vld [vmem:[%s2047_s1 + $0x6a0] sm:$0xff] }
  0x61   :  { %1141 = vmatpush3.msra.mxu1 %v181_v9  ;;  %1107 = vmatprep.subr.mxu0 %v164_v10  ;;  %v262_v9 = vld [vmem:[%s2047_s1 + $0x7a0] sm:$0xff] }
  0x62   :  { %1142 = vmatprep.subr.mxu1 %v196_v11  ;;  %1108 = vmatpush3.msra.mxu0 %v148_v13  ;;  %v214_v10 = vld [vmem:[%s2047_s1 + $0x620] sm:$0xff]  ;;  %v229_v13 = vld [vmem:[%s2047_s1 + $0x698] sm:$0xff] }
  0x63   :  { %1143 = vmatpush3.msra.mxu1 %v180_v14  ;;  %1109 = vmatprep.subr.mxu0 %v163_v15  ;;  %v246_v11 = vld [vmem:[%s2047_s1 + $0x720] sm:$0xff]  ;;  %v261_v14 = vld [vmem:[%s2047_s1 + $0x798] sm:$0xff] }
  0x64   :  { %1144 = vmatprep.subr.mxu1 %v195_v16  ;;  %1110 = vmatpush3.msra.mxu0 %v147_v18  ;;  %v213_v15 = vld [vmem:[%s2047_s1 + $0x618] sm:$0xff]  ;;  %v260_v18 = vld [vmem:[%s2047_s1 + $0x790] sm:$0xff] }
  0x65   :  { %1145 = vmatpush3.msra.mxu1 %v179_v19  ;;  %1111 = vmatprep.subr.mxu0 %v162_v20  ;;  %v245_v16 = vld [vmem:[%s2047_s1 + $0x718] sm:$0xff]  ;;  %v343_v19 = vrot.slane %v17_v5, %v1389_v51  ;;  %v212_v20 = vld [vmem:[%s2047_s1 + $0x610] sm:$0xff] }
  0x66   :  { %1146 = vmatprep.subr.mxu1 %v194_v21  ;;  %1112 = vmatpush3.msra.mxu0 %v146_v23  ;;  %v244_v21 = vld [vmem:[%s2047_s1 + $0x710] sm:$0xff]  ;;  %v227_v23 = vld [vmem:[%s2047_s1 + $0x688] sm:$0xff] }
  0x67   :  { %713 = vmatprep.mubr.f32.mxu0 %v334_v22  ;;  %1147 = vmatpush3.msra.mxu1 %v178_v24  ;;  %v259_v24 = vld [vmem:[%s2047_s1 + $0x788] sm:$0xff] }
  0x68   :  { %714 = vmatmul.mubr.f32.vlgmr.msra.gmra.mxu0 %v326_v12  ;;  %783 = vmatprep.mubr.f32.mxu1 %v335_v25  ;;  %v336_v12 = vcombine.high %v17_v5, %v17_v5  ;;  %v211_v25 = vld [vmem:[%s2047_s1 + $0x608] sm:$0xff] }
  0x69   :  { %1151 = vmatprep.subr.mxu0 %v241_v26  ;;  %1186 = vmatprep.subr.mxu1 %v273_v27  ;;  %v226_v26 = vld [vmem:[%s2047_s1 + $0x680] sm:$0xff] }
  0x6a   :  { %784 = vmatmul.mubr.f32.vlgmr.msra.gmra.mxu1 %v333_v17  ;;  %1152 = vmatpush3.msra.mxu0 %v225_v28  ;;  %v228_v17 = vld [vmem:[%s2047_s1 + $0x690] sm:$0xff]  ;;  %v350_v22 = vrot.slane %v336_v12, %v1389_v51  ;;  %v243_v51 = vld [vmem:[%s2047_s1 + $0x708] sm:$0xff]  ;;  %v258_v27 = vld [vmem:[%s2047_s1 + $0x780] sm:$0xff]  ;;  %v351_v28 = vcombine.high %v343_v19, %v343_v19 }
  0x6b   :  { %1187 = vmatpush3.msra.mxu1 %v257_v29  ;;  %1153 = vmatprep.subr.mxu0 %v240_v30  ;;  %v210_v29 = vld [vmem:[%s2047_s1 + $0x600] sm:$0xff] }
  0x6c   :  { %1188 = vmatprep.subr.mxu1 %v272_v31  ;;  %1154 = vmatpush3.msra.mxu0 %v224_v32  ;;  %v352_v30 = vcombine.high %v350_v22, %v350_v22  ;;  %v242_v31 = vld [vmem:[%s2047_s1 + $0x700] sm:$0xff] }
  0x6d   :  { %1189 = vmatpush3.msra.mxu1 %v256_v33  ;;  %1155 = vmatprep.subr.mxu0 %v239_v34 }
  0x6e   :  { %1190 = vmatprep.subr.mxu1 %v271_v35  ;;  %1156 = vmatpush3.msra.mxu0 %v223_v36 }
  0x6f   :  { %1191 = vmatpush3.msra.mxu1 %v255_v37  ;;  %1157 = vmatprep.subr.mxu0 %v238_v38  ;;  %v940_v37 = vld [vmem:[%s2049_s2] ss:$0 sm:$0xff] }
  0x70   :  { %1192 = vmatprep.subr.mxu1 %v270_v39  ;;  %1158 = vmatpush3.msra.mxu0 %v222_v40 }
  0x71   :  { %1193 = vmatpush3.msra.mxu1 %v254_v41  ;;  %1159 = vmatprep.subr.mxu0 %v237_v42 }
  0x72   :  { %1194 = vmatprep.subr.mxu1 %v269_v43  ;;  %1160 = vmatpush3.msra.mxu0 %v221_v44 }
  0x73   :  { %1195 = vmatpush3.msra.mxu1 %v253_v45  ;;  %1161 = vmatprep.subr.mxu0 %v236_v46 }
  0x74   :  { %1196 = vmatprep.subr.mxu1 %v268_v47  ;;  %1162 = vmatpush3.msra.mxu0 %v220_v48 }
  0x75   :  { %1197 = vmatpush3.msra.mxu1 %v252_v49  ;;  %1163 = vmatprep.subr.mxu0 %v235_v50 }
  0x76   :  { %1198 = vmatprep.subr.mxu1 %v267_v52  ;;  %1164 = vmatpush3.msra.mxu0 %v219_v53 }
  0x77   :  { %1199 = vmatpush3.msra.mxu1 %v251_v54  ;;  %1165 = vmatprep.subr.mxu0 %v234_v55 }
  0x78   :  { %1200 = vmatprep.subr.mxu1 %v266_v56  ;;  %1166 = vmatpush3.msra.mxu0 %v218_v57 }
  0x79   :  { %1201 = vmatpush3.msra.mxu1 %v250_v58  ;;  %1167 = vmatprep.subr.mxu0 %v233_v59 }
  0x7a   :  { %1202 = vmatprep.subr.mxu1 %v265_v60  ;;  %1168 = vmatpush3.msra.mxu0 %v217_v61 }
  0x7b   :  { %1203 = vmatpush3.msra.mxu1 %v249_v62  ;;  %1169 = vmatprep.subr.mxu0 %v232_v63 }
  0x7c   :  { %1204 = vmatprep.subr.mxu1 %v264_v0  ;;  %1170 = vmatpush3.msra.mxu0 %v216_v1 }
  0x7d   :  { %1205 = vmatpush3.msra.mxu1 %v248_v2  ;;  %1171 = vmatprep.subr.mxu0 %v231_v3 }
  0x7e   :  { %1206 = vmatprep.subr.mxu1 %v263_v4  ;;  %1172 = vmatpush3.msra.mxu0 %v215_v6 }
  0x7f   :  { %1207 = vmatpush3.msra.mxu1 %v247_v7  ;;  %1173 = vmatprep.subr.mxu0 %v230_v8 }
  0x80   :  { %1208 = vmatprep.subr.mxu1 %v262_v9  ;;  %1174 = vmatpush3.msra.mxu0 %v214_v10 }
  0x81   :  { %1209 = vmatpush3.msra.mxu1 %v246_v11  ;;  %1175 = vmatprep.subr.mxu0 %v229_v13 }
  0x82   :  { %1210 = vmatprep.subr.mxu1 %v261_v14  ;;  %1176 = vmatpush3.msra.mxu0 %v213_v15 }
  0x83   :  { %1211 = vmatpush3.msra.mxu1 %v245_v16  ;;  %1177 = vmatprep.subr.mxu0 %v228_v17 }
  0x84   :  { %1212 = vmatprep.subr.mxu1 %v260_v18  ;;  %1178 = vmatpush3.msra.mxu0 %v212_v20 }
  0x85   :  { %1213 = vmatpush3.msra.mxu1 %v244_v21  ;;  %1179 = vmatprep.subr.mxu0 %v227_v23 }
  0x86   :  { %1214 = vmatprep.subr.mxu1 %v259_v24  ;;  %1180 = vmatpush3.msra.mxu0 %v211_v25 }
  0x87   :  { %1215 = vmatpush3.msra.mxu1 %v243_v51  ;;  %1181 = vmatprep.subr.mxu0 %v226_v26 }
  0x88   :  { %1216 = vmatprep.subr.mxu1 %v258_v27  ;;  %1182 = vmatpush3.msra.mxu0 %v210_v29 }
  0x89   :  { %853 = vmatprep.mubr.f32.mxu0 %v351_v28  ;;  %1217 = vmatpush3.msra.mxu1 %v242_v31 }
  0x8a   :  { %923 = vmatprep.mubr.f32.mxu1 %v352_v30  ;;  %854 = vmatmul.mubr.f32.vlgmr.msra.gmra.mxu0 %v343_v19 }
  0x8b   :  { %924 = vmatmul.mubr.f32.vlgmr.msra.gmra.mxu1 %v350_v22 }
  0xe4   :  { %v973_v32 = vpop.f32.mrf.mxu0 }
  0xe6   :  { %v1008_v33 = vpop.f32.mrf.mxu1  ;;  %v974_v34 = vpop.f32.mrf.mxu0 }
  0xe7   :  { %v975_v36 = vadd.f32 %v974_v34, %v973_v32 }
  0xe8   :  { %v1009_v38 = vpop.f32.mrf.mxu1 }
  0xe9   :  { %v436_v41 = vadd.f32 %v975_v36, %v940_v37  ;;  %v1010_v42 = vadd.f32 %v1009_v38, %v1008_v33 }
  0xeb   :  { %v506_v46 = vadd.f32 %v1010_v42, %v436_v41 }
 0x106   :  { %v1043_v35 = vpop.f32.mrf.mxu0 }
 0x108   :  { %v1078_v39 = vpop.f32.mrf.mxu1  ;;  %v1044_v40 = vpop.f32.mrf.mxu0 }
 0x109   :  { %v1045_v44 = vadd.f32 %v1044_v40, %v1043_v35 }
 0x10a   :  { %v1079_v45 = vpop.f32.mrf.mxu1 }
 0x10b   :  { %v576_v49 = vadd.f32 %v1045_v44, %v506_v46  ;;  %v1080_v50 = vadd.f32 %v1079_v45, %v1078_v39 }
 0x10d   :  { %v646_v54 = vadd.f32 %v1080_v50, %v576_v49 }
 0x128   :  { %v1113_v43 = vpop.f32.mrf.mxu0 }
 0x12a   :  { %v1148_v47 = vpop.f32.mrf.mxu1  ;;  %v1114_v48 = vpop.f32.mrf.mxu0 }
 0x12b   :  { %v1115_v52 = vadd.f32 %v1114_v48, %v1113_v43 }
 0x12c   :  { %v1149_v53 = vpop.f32.mrf.mxu1 }
 0x12d   :  { %v716_v55 = vadd.f32 %v1115_v52, %v646_v54  ;;  %v1150_v56 = vadd.f32 %v1149_v53, %v1148_v47 }
 0x12f   :  { %v786_v61 = vadd.f32 %v1150_v56, %v716_v55 }
 0x14a   :  { %v1183_v57 = vpop.f32.mrf.mxu0 }
 0x14b   :  { %v1218_v58 = vpop.f32.mrf.mxu1 }
 0x14c   :  { %v1184_v59 = vpop.f32.mrf.mxu0 }
 0x14d   :  { %v1219_v60 = vpop.f32.mrf.mxu1  ;;  %v1185_v62 = vadd.f32 %v1184_v59, %v1183_v57 }
 0x14e   :  { %v1220_v0 = vadd.f32 %v1219_v60, %v1218_v58 }
 0x14f   :  { %v856_v63 = vadd.f32 %v1185_v62, %v786_v61 }
 0x151   :  { %v926_v1 = vadd.f32 %v1220_v0, %v856_v63 }
 0x153   :  { %v929_v2 = vsub.f32 0.0, %v926_v1 }
 0x155   :  { %v930_v3 = vmul.f32 1.442695, %v929_v2 }
 0x157   :  { %1226 = vpow2.f32 %v930_v3 }
 0x164   :  { %v1227_v4 = vpop.eup %1226 }
 0x165   :  { %v932_v5 = vadd.f32 1.0, %v1227_v4 }
 0x167   :  { %1228 = vrcp.f32 %v932_v5 }
 0x174   :  { %v1229_v6 = vpop.eup %1228 }
 0x175   :  { %935 = vst [vmem:[%s2050_s3] sm:$0x3] %v1229_v6 }

</bundles_post_ra>
